<compile_context>
chip_gen: v6e
topology: v6e:2x2x1
jax: 0.10.0
libtpu: 0.0.40
codegen_flags: <defaults>
</compile_context>

<pallas_src>
import functools

import jax
import jax.numpy as jnp
from jax.experimental import pallas as pl
from jax.experimental.pallas import tpu as pltpu


# ----------------------------------------------------------------------------
# Fused kernel: softmax + keypoint moments + triangulation statistics
# ----------------------------------------------------------------------------
def _fused_kernel(hm_ref, basis_ref, out_sm_ref, out_w2_ref, *,
                  det_conf_thr, apply_thr):
    # hm_ref:     [T, HW]    one row-tile of heatmaps (f32 or bf16), HW = 64*64
    # basis_ref:  [HW, 128]  bf16 constant basis: cols (1, col, row, col^2+row^2, 0..)
    # out_sm_ref: [T, 128]   moments of softmax (col0=sum, col1=sum*col,
    #                        col2=sum*row, col3=sum*(col^2+row^2), col4=amax)
    # out_w2_ref: [T, 128]   moments of w^2 (clamped triangulation weight)
    hm = hm_ref[...].astype(jnp.float32) * 100.0
    m = jnp.max(hm, axis=-1, keepdims=True)                 # XLU
    e = jnp.exp(hm - m)                                     # EUP
    denom = jnp.sum(e, axis=-1, keepdims=True)              # XLU
    inv_denom = pl.reciprocal(denom, approx=True)           # EUP, [T, 1]
    sm = e * inv_denom                                      # softmax over HW

    # Triangulation weights.  torch renorms by sum(softmax) first, but that is
    # exactly 1 here, so the renorm is dropped (breaks the MXU->VPU->MXU chain).
    w = jnp.clip(sm, 0.2, 1.0)
    w2 = w * w
    if apply_thr:                                           # static: only if thr >= clamp floor
        w2 = jnp.where(w > det_conf_thr, w2, 0.0)

    # One fused matmul sharing the weight push: [2T, HW] @ [HW, 128].
    lhs = jnp.concatenate([sm.astype(jnp.bfloat16), w2.astype(jnp.bfloat16)], axis=0)
    res = jnp.dot(lhs, basis_ref[...], preferred_element_type=jnp.float32)

    # amax(softmax) == exp(0) * inv_denom == inv_denom exactly; stash in col 4
    # (basis column 4 is all zeros).  Lane-dense unmasked stores.
    t = sm.shape[0]
    lane = jax.lax.broadcasted_iota(jnp.int32, (t, 128), 1)
    out_sm_ref[...] = jnp.where(lane == 4, inv_denom, res[0:t, :])
    out_w2_ref[...] = res[t:, :]


# ----------------------------------------------------------------------------
# Module wrapper
# ----------------------------------------------------------------------------
class DistTriangHead:
    def __init__(self, num_cams=3, img_shape=(256, 256), heatmap_shape=(64, 64),
                 softmax_heatmap=True, det_conf_thr=0.1):
        # In the torch module self.softmax = (False, softmax_heatmap) is always truthy.
        assert softmax_heatmap, "only the softmax branch is exercised"
        self.num_cams = num_cams
        self.h_img, self.w_img = img_shape
        self.h_map, self.w_map = heatmap_shape
        # torch's triangulate_heatmap hard-codes 64 and a *4 grid scale.
        assert self.h_map == 64 and self.w_map == 64
        self.det_conf_thr = det_conf_thr
        self._grid_scale = 4.0

    # ---- constant moment basis (bf16, DMA'd into VMEM exactly once) ----
    def _moment_basis(self):
        hw = self.h_map * self.w_map
        idx = jnp.arange(hw, dtype=jnp.int32)
        col = (idx % self.w_map).astype(jnp.float32)
        row = (idx // self.w_map).astype(jnp.float32)
        basis = jnp.zeros((hw, 128), jnp.float32)
        basis = basis.at[:, 0].set(1.0)
        basis = basis.at[:, 1].set(col)
        basis = basis.at[:, 2].set(row)
        basis = basis.at[:, 3].set(col * col + row * row)
        return basis.astype(jnp.bfloat16)

    # ---- the single fused Pallas call ----
    def _fused_stats(self, heatmap, bs, J):
        C, H, W = self.num_cams, self.h_map, self.w_map
        HW = H * W
        total_rows = bs * C * J
        hm = heatmap.reshape(total_rows, HW)          # free, contiguous in HBM

        # Row tile: big enough to amortize the MXU weight push / per-step
        # overhead, small enough for v7x's 64 MiB VMEM.  Multiple of 16 so the
        # block is sublane-aligned for both f32 and bf16 heatmaps.
        sub = 16
        tile_r = 256 if total_rows >= 256 else ((total_rows + sub - 1) // sub) * sub
        rows_pad = ((total_rows + tile_r - 1) // tile_r) * tile_r
        if rows_pad != total_rows:
            hm = jnp.pad(hm, ((0, rows_pad - total_rows), (0, 0)))
        num_tiles = rows_pad // tile_r

        basis = self._moment_basis()

        thr = 0.0 if self.det_conf_thr is None else float(self.det_conf_thr)
        apply_thr = (self.det_conf_thr is not None) and (thr >= 0.2)  # clamp floor
        kern = functools.partial(_fused_kernel, det_conf_thr=thr, apply_thr=apply_thr)

        out_sm, out_w2 = pl.pallas_call(
            kern,
            out_shape=(jax.ShapeDtypeStruct((rows_pad, 128), jnp.float32),
                       jax.ShapeDtypeStruct((rows_pad, 128), jnp.float32)),
            grid=(num_tiles,),
            in_specs=[
                pl.BlockSpec((tile_r, HW), lambda i: (i, 0)),
                pl.BlockSpec((HW, 128), lambda i: (0, 0)),   # constant block, DMA'd once
            ],
            out_specs=(pl.BlockSpec((tile_r, 128), lambda i: (i, 0)),
                       pl.BlockSpec((tile_r, 128), lambda i: (i, 0))),
            compiler_params=pltpu.CompilerParams(
                dimension_semantics=("parallel",),
                vmem_limit_bytes=48 * 1024 * 1024),
        )(hm, basis)

        s_sm = out_sm[:total_rows].reshape(bs, C, J, 128)
        s_w2 = out_w2[:total_rows].reshape(bs, C, J, 128)
        return s_sm, s_w2

    # ---- reproject (plain-JAX glue, tiny einsum) ----
    def reproject(self, kp_3d, proj_matrices):
        ones = jnp.ones((*kp_3d.shape[:-1], 1), kp_3d.dtype)
        kp_h = jnp.concatenate([kp_3d, ones], axis=-1)               # [bs, J, 4]
        pseudo = jnp.einsum('bcdk,bjk->bcjd', proj_matrices, kp_h)   # [bs, C, J, 3]
        return pseudo[..., :2] / pseudo[..., 2:3]

    # ---- forward ----
    def __call__(self, heatmap, proj_matrices):
        if heatmap.dtype not in (jnp.float32, jnp.bfloat16):
            heatmap = heatmap.astype(jnp.float32)
        proj_matrices = proj_matrices.astype(jnp.float32)
        N, J, H, W = heatmap.shape
        C = self.num_cams
        bs = N // C

        s_sm, s_w = self._fused_stats(heatmap, bs, J)      # each [bs, C, J, 128]

        # ---- compute_kp_coords outputs ----
        x = s_sm[..., 1]                                   # sum(softmax * col)
        y = s_sm[..., 2]                                   # sum(softmax * row)
        conf = s_sm[..., 4]                                # amax(softmax); sum(softmax)==1
        kp_2d_heatmap = jnp.stack([x, y, conf], axis=-1).reshape(N, J, 3)
        # (scaling x by h_img/h_map and y by w_img/w_map is faithful to the torch code)
        # TODO(synk): torch stores kp_2d_croped / reproject in float64; f32 here.
        kp_2d_croped = jnp.stack(
            [x * (self.h_img / self.h_map), y * (self.w_img / self.w_map), conf],
            axis=-1).reshape(N, J, 3)

        # ---- triangulation: assemble 4x4 Gram of the weighted DLT rows ----
        g = self._grid_scale
        s0 = jnp.transpose(s_w[..., 0], (0, 2, 1))         # [bs, J, C]  sum w^2
        su = g * jnp.transpose(s_w[..., 1], (0, 2, 1))     # sum w^2 * u,  u = 4*col
        sv = g * jnp.transpose(s_w[..., 2], (0, 2, 1))     # sum w^2 * v,  v = 4*row
        srr = g * g * jnp.transpose(s_w[..., 3], (0, 2, 1))  # sum w^2*(u^2+v^2)
        z = jnp.zeros_like(s0)
        # D_c = sum_p w^2 (c0 c0^T + c1 c1^T),  c0 = [-1, 0, u], c1 = [0, -1, v]
        D = jnp.stack([
            jnp.stack([s0, z, -su], axis=-1),
            jnp.stack([z, s0, -sv], axis=-1),
            jnp.stack([-su, -sv, srr], axis=-1)], axis=-2)   # [bs, J, C, 3, 3]
        # Gram = A^T A = sum_c P_c^T D_c P_c
        G = jnp.einsum('bcia,bjcik,bckd->bjad', proj_matrices, D, proj_matrices)

        # TODO(synk): torch.svd (f64) of the tall DLT matrix is replaced by the
        # mathematically equivalent eigendecomposition of the 4x4 Gram in f32.
        # TODO(synk): this tiny eigh/einsum epilogue stays in plain JAX (XLA);
        # a closed-form smallest-eigenpair Pallas kernel could remove its
        # op-launch overhead if it dominates end-to-end latency.
        evals, evecs = jnp.linalg.eigh(G)                  # ascending eigenvalues
        vec = evecs[..., :, 0]                             # [bs, J, 4]
        kp_3d = vec[..., :3] / vec[..., 3:4]               # sign cancels
        res_triang = jnp.sqrt(jnp.clip(evals[..., 0], 0.0, None))  # smallest sing. val

        reproject_kp_2d = self.reproject(kp_3d, proj_matrices)
        return kp_3d, res_triang, kp_2d_croped, reproject_kp_2d, kp_2d_heatmap


# ----------------------------------------------------------------------------
if __name__ == "__main__":
    bs, num_cams, n_joints = 2, 3, 4
    H = W = 64

    key = jax.random.PRNGKey(0)
    k1, k2 = jax.random.split(key)
    heatmap = jax.random.uniform(k1, (bs * num_cams, n_joints, H, W),
                                 dtype=jnp.float32) * 0.02
    proj_matrices = jax.random.normal(k2, (bs, num_cams, 3, 4), dtype=jnp.float32)

    head = DistTriangHead(num_cams=num_cams, img_shape=(256, 256),
                          heatmap_shape=(64, 64), det_conf_thr=0.1)
    outs = head(heatmap, proj_matrices)
    jax.block_until_ready(outs)
    kp_3d, res_triang, kp_2d_croped, reproject_kp_2d, kp_2d_heatmap = outs

    assert kp_3d.shape == (bs, n_joints, 3)
    assert res_triang.shape == (bs, n_joints)
    assert kp_2d_croped.shape == (bs * num_cams, n_joints, 3)
    assert reproject_kp_2d.shape == (bs, num_cams, n_joints, 2)
    assert kp_2d_heatmap.shape == (bs * num_cams, n_joints, 3)
    print("KERNEL_OK")
</pallas_src>

<mosaic_0001>
module attributes {stable_mosaic.version = 11 : i64} {
  func.func @_fused_kernel(%arg0: i32, %arg1: memref<32x4096xf32, #tpu.memory_space<vmem>>, %arg2: memref<4096x128xbf16, #tpu.memory_space<vmem>>, %arg3: memref<32x128xf32, #tpu.memory_space<vmem>>, %arg4: memref<32x128xf32, #tpu.memory_space<vmem>>) attributes {dimension_semantics = [#tpu.dimension_semantics<parallel>], iteration_bounds = array<i64: 1>, scalar_prefetch = 0 : i64, scratch_operands = 0 : i64, tpu.core_type = #tpu.core_type<tc>, window_params = [{transform_indices = @transform_0, window_bounds = array<i64: 32, 4096>}, {pipeline_mode = #tpu.pipeline_mode<synchronous>, transform_indices = @transform_1, window_bounds = array<i64: 4096, 128>}, {transform_indices = @transform_2, window_bounds = array<i64: 32, 128>}, {transform_indices = @transform_3, window_bounds = array<i64: 32, 128>}]} {
    %c0 = arith.constant 0 : index
    %c0_0 = arith.constant 0 : index
    %0 = vector.load %arg1[%c0, %c0_0] : memref<32x4096xf32, #tpu.memory_space<vmem>>, vector<32x4096xf32>
    %cst = arith.constant 1.000000e+02 : f32
    %1 = vector.broadcast %cst : f32 to vector<32x4096xf32>
    %2 = arith.mulf %0, %1 : vector<32x4096xf32>
    %cst_1 = arith.constant dense<0xFF800000> : vector<32xf32>
    %3 = vector.multi_reduction <maximumf>, %2, %cst_1 [1] : vector<32x4096xf32> to vector<32xf32>
    %4 = vector.shape_cast %3 : vector<32xf32> to vector<32x1xf32>
    %5 = vector.broadcast %4 : vector<32x1xf32> to vector<32x4096xf32>
    %6 = arith.subf %2, %5 : vector<32x4096xf32>
    %7 = math.exp %6 : vector<32x4096xf32>
    %cst_2 = arith.constant dense<0.000000e+00> : vector<32xf32>
    %8 = vector.multi_reduction <add>, %7, %cst_2 [1] : vector<32x4096xf32> to vector<32xf32>
    %9 = vector.shape_cast %8 : vector<32xf32> to vector<32x1xf32>
    %10 = tpu.reciprocal %9 {approx = true} : vector<32x1xf32> -> vector<32x1xf32>
    %11 = vector.broadcast %10 : vector<32x1xf32> to vector<32x4096xf32>
    %12 = arith.mulf %7, %11 : vector<32x4096xf32>
    %cst_3 = arith.constant 2.000000e-01 : f32
    %cst_4 = arith.constant 1.000000e+00 : f32
    %13 = vector.broadcast %cst_3 : f32 to vector<32x4096xf32>
    %14 = arith.maximumf %13, %12 : vector<32x4096xf32>
    %15 = vector.broadcast %cst_4 : f32 to vector<32x4096xf32>
    %16 = arith.minimumf %15, %14 : vector<32x4096xf32>
    %17 = arith.mulf %16, %16 : vector<32x4096xf32>
    %18 = arith.truncf %12 : vector<32x4096xf32> to vector<32x4096xbf16>
    %19 = arith.truncf %17 : vector<32x4096xf32> to vector<32x4096xbf16>
    %20 = tpu.concatenate %18, %19 in 0 : vector<32x4096xbf16>, vector<32x4096xbf16> -> vector<64x4096xbf16>
    %c0_5 = arith.constant 0 : index
    %c0_6 = arith.constant 0 : index
    %21 = vector.load %arg2[%c0_5, %c0_6] : memref<4096x128xbf16, #tpu.memory_space<vmem>>, vector<4096x128xbf16>
    %cst_7 = arith.constant dense<0.000000e+00> : vector<64x128xf32>
    %22 = tpu.matmul %20, %21, %cst_7 {dimension_numbers = #tpu.dot_dimension_numbers<[1], [0], [0], [1], [0, 0, 1, 1], [], []>} : vector<64x4096xbf16>, vector<4096x128xbf16>, vector<64x128xf32> -> vector<64x128xf32>
    %23 = tpu.iota {dimensions = array<i32: 1>} : vector<32x128xi32>
    %c4_i32 = arith.constant 4 : i32
    %24 = vector.broadcast %c4_i32 : i32 to vector<32x128xi32>
    %25 = arith.cmpi eq, %23, %24 : vector<32x128xi32>
    %26 = vector.extract_strided_slice %22 {offsets = [0, 0], sizes = [32, 128], strides = [1, 1]} : vector<64x128xf32> to vector<32x128xf32>
    %27 = vector.shape_cast %10 : vector<32x1xf32> to vector<32x1xf32>
    %28 = vector.broadcast %27 : vector<32x1xf32> to vector<32x128xf32>
    %29 = arith.select %25, %28, %26 : vector<32x128xi1>, vector<32x128xf32>
    %c0_8 = arith.constant 0 : index
    %c0_9 = arith.constant 0 : index
    %30 = vector.load %arg3[%c0_8, %c0_9] : memref<32x128xf32, #tpu.memory_space<vmem>>, vector<32x128xf32>
    tpu.vector_store %arg3[%c0_8, %c0_9], %29 {strides = array<i32>} : memref<32x128xf32, #tpu.memory_space<vmem>>, vector<32x128xf32>,
    %31 = vector.extract_strided_slice %22 {offsets = [32, 0], sizes = [32, 128], strides = [1, 1]} : vector<64x128xf32> to vector<32x128xf32>
    %c0_10 = arith.constant 0 : index
    %c0_11 = arith.constant 0 : index
    %32 = vector.load %arg4[%c0_10, %c0_11] : memref<32x128xf32, #tpu.memory_space<vmem>>, vector<32x128xf32>
    tpu.vector_store %arg4[%c0_10, %c0_11], %31 {strides = array<i32>} : memref<32x128xf32, #tpu.memory_space<vmem>>, vector<32x128xf32>,
    return
  }
  func.func @transform_0(%arg0: i32) -> (i32, i32) {
    %c0_i32 = arith.constant 0 : i32
    %c0_i32_0 = arith.constant 0 : i32
    return %arg0, %c0_i32 : i32, i32
  }
  func.func @transform_1(%arg0: i32) -> (i32, i32) {
    %c0_i32 = arith.constant 0 : i32
    %c0_i32_0 = arith.constant 0 : i32
    %c0_i32_1 = arith.constant 0 : i32
    return %c0_i32, %c0_i32_0 : i32, i32
  }
  func.func @transform_2(%arg0: i32) -> (i32, i32) {
    %c0_i32 = arith.constant 0 : i32
    %c0_i32_0 = arith.constant 0 : i32
    return %arg0, %c0_i32 : i32, i32
  }
  func.func @transform_3(%arg0: i32) -> (i32, i32) {
    %c0_i32 = arith.constant 0 : i32
    %c0_i32_0 = arith.constant 0 : i32
    return %arg0, %c0_i32 : i32, i32
  }
}

</mosaic_0001>

<bundles_post_ra>
// kernel: tpu_custom_call.1
= control target key start
LH: loop header
LB: loop body
LE: loop exit
PB: predicated region body
PF: predicated region fallthrough
CT: control target
= control target key end

     0   :  { %9 = vsyncpa [#allocation3], 0  ;;  %s8149_s0 = inlined_call_operand.hbm [shape: f32[32,4096], index: 0, kind: input, shape index: {}]   ;;  %s8150_s1 = inlined_call_operand.hbm [shape: bf16[4096,128], index: 1, kind: input, shape index: {}]   ;;  %s8151_s2 = inlined_call_operand.hbm [shape: f32[32,128], index: 2, kind: output, shape index: {0}]   ;;  %s8152_s3 = inlined_call_operand.hbm [shape: f32[32,128], index: 3, kind: output, shape index: {1}]  }
   0x1   :  { %10 = vsyncpa [#allocation6], 0 }
   0x2   :  { %11 = vsyncpa [#allocation4], 0 }
   0x3   :  { %12 = vsyncpa [#allocation9], 0  ;;  %s6243_s12 = smov [#allocation2]  }
   0x4   :  { %s18_s13 = sshll.u32 %s6243_s12, 4  ;;  %s19_s13 = int_to_ptr.vmem [resolvable:$true] %s18_s13 }
   0x5   :  { %s6163_s14 = scalar_lea.vmem %s19_s13, 16384  ;;  %p6168_p1 = scmp.lt.s32.totalorder %s19_s13, %s19_s13 }
   0x6   :  { %p6164_p0 = scmp.ne.s32.totalorder %s19_s13, %s6163_s14  ;;  %p6169_p2 = scmp.lt.s32.totalorder %s6163_s14, %s6163_s14 }
   0x8   :  { %p6170_p3 = por %p6169_p2, %p6168_p1 }
   0xa   :  { %p6171_p4 = pnand %p6170_p3, %p6164_p0 }
   0xc   :  { %6174 = shalt.err (!%p6171_p4)
}
   0xd   :  { %s6244_s15 = smov 4096   ;;  %s6245_s16 = smov 256  }
   0xe   :  { %24 = dma.hbm_to_vmem [thread:$0]  %s8149_s0, 16384, %s19_s13, [#allocation3], %s6244_s15, %s6244_s15, %s6245_s16  }
   0xf   :  { %s6246_s19 = smov [#allocation5]  }
  0x10   :  { %s30_s20 = sshll.u32 %s6246_s19, 4  ;;  %s31_s20 = int_to_ptr.vmem [resolvable:$true] %s30_s20 }
  0x11   :  { %s6183_s21 = scalar_lea.vmem %s31_s20, 32768  ;;  %p6188_p6 = scmp.lt.s32.totalorder %s31_s20, %s31_s20 }
  0x12   :  { %p6184_p5 = scmp.ne.s32.totalorder %s31_s20, %s6183_s21  ;;  %p6189_p7 = scmp.lt.s32.totalorder %s6183_s21, %s6183_s21 }
  0x14   :  { %p6190_p8 = por %p6189_p7, %p6188_p6 }
  0x16   :  { %p6191_p9 = pnand %p6190_p8, %p6184_p5 }
  0x18   :  { %6194 = shalt.err (!%p6191_p9)
}
  0x19   :  { %s6247_s22 = smov 64   ;;  %s6248_s23 = smov 4  }
  0x1a   :  { %36 = dma.hbm_to_vmem [thread:$0]  %s8150_s1, 32768, %s31_s20, [#allocation6], %s6247_s22, %s6247_s22, %s6248_s23  }
  0x1b   :  { %6235 = dma.done.wait [#allocation3], 16384  }
  0x1c   :  { %6236 = vsyncadd [#allocation3], 4294950912 }
  0x1d   :  { %6237 = dma.done.wait [#allocation6], 32768  }
  0x1e   :  { %6238 = vsyncadd [#allocation6], 4294934528  ;;  %v108_v0 = vld [vmem:[#allocation2 + $0x200] sm:$0xff]  ;;  %v109_v1 = vld [vmem:[#allocation2 + $0x208] sm:$0xff]  ;;  %s6249_s0 = smov [#allocation7]  }
  0x1f   :  { %v110_v2 = vld [vmem:[#allocation2 + $0x210] sm:$0xff]  ;;  %v111_v3 = vld [vmem:[#allocation2 + $0x218] sm:$0xff]  ;;  %v112_v4 = vld [vmem:[#allocation2 + $0x220] sm:$0xff]  ;;  %v6279_v6 = vmul.f32 100.0, %v108_v0  ;;  %v6281_v7 = vmul.f32 100.0, %v109_v1  ;;  %s4700_s1 = sshll.u32 %s6249_s0, 4  ;;  %s4701_s1 = int_to_ptr.vmem [resolvable:$true] %s4700_s1 }
  0x20   :  { %v113_v5 = vld [vmem:[#allocation2 + $0x228] sm:$0xff]  ;;  %v6283_v8 = vmul.f32 100.0, %v110_v2  ;;  %v114_v9 = vld [vmem:[#allocation2 + $0x230] sm:$0xff]  ;;  %v115_v10 = vld [vmem:[#allocation2 + $0x238] sm:$0xff]  ;;  %v6285_v12 = vmul.f32 100.0, %v111_v3  ;;  %v6287_v13 = vmul.f32 100.0, %v112_v4  ;;  %p6200_p11 = scmp.lt.s32.totalorder %s4701_s1, %s4701_s1 }
  0x21   :  { %8342 = vst [vmem:[#allocation14_spill] sm:$0xff] %v6279_v6  ;;  %8343 = vst [vmem:[#allocation15_spill] sm:$0xff] %v6281_v7  ;;  %v116_v11 = vld [vmem:[#allocation2 + $0x240] sm:$0xff]  ;;  %v6289_v14 = vmul.f32 100.0, %v113_v5  ;;  %v117_v15 = vld [vmem:[#allocation2 + $0x248] sm:$0xff]  ;;  %v6291_v18 = vmul.f32 100.0, %v114_v9  ;;  %v366_v21 = vmax.f32 %v6279_v6, %v6281_v7 }
  0x22   :  { %8344 = vst [vmem:[#allocation16_spill] sm:$0xff] %v6283_v8  ;;  %8345 = vst [vmem:[#allocation17_spill] sm:$0xff] %v6285_v12  ;;  %v118_v16 = vld [vmem:[#allocation2 + $0x250] sm:$0xff]  ;;  %v119_v17 = vld [vmem:[#allocation2 + $0x258] sm:$0xff]  ;;  %v6293_v19 = vmul.f32 100.0, %v115_v10  ;;  %v6295_v20 = vmul.f32 100.0, %v116_v11 }
  0x23   :  { %8346 = vst [vmem:[#allocation18_spill] sm:$0xff] %v6287_v13  ;;  %8347 = vst [vmem:[#allocation19_spill] sm:$0xff] %v6289_v14  ;;  %v120_v22 = vld [vmem:[#allocation2 + $0x260] sm:$0xff]  ;;  %v121_v23 = vld [vmem:[#allocation2 + $0x268] sm:$0xff]  ;;  %v6299_v25 = vmul.f32 100.0, %v117_v15  ;;  %v6301_v26 = vmul.f32 100.0, %v118_v16  ;;  %v367_v34 = vmax.f32 %v366_v21, %v6283_v8 }
  0x24   :  { %8348 = vst [vmem:[#allocation20_spill] sm:$0xff] %v6291_v18  ;;  %8349 = vst [vmem:[#allocation21_spill] sm:$0xff] %v6293_v19  ;;  %v122_v24 = vld [vmem:[#allocation2 + $0x270] sm:$0xff]  ;;  %v6303_v27 = vmul.f32 100.0, %v119_v17  ;;  %v123_v28 = vld [vmem:[#allocation2 + $0x278] sm:$0xff]  ;;  %v6305_v31 = vmul.f32 100.0, %v120_v22 }
  0x25   :  { %8350 = vst [vmem:[#allocation22_spill] sm:$0xff] %v6295_v20  ;;  %8351 = vst [vmem:[#allocation23_spill] sm:$0xff] %v6299_v25  ;;  %v124_v29 = vld [vmem:[#allocation2 + $0x280] sm:$0xff]  ;;  %v125_v30 = vld [vmem:[#allocation2 + $0x288] sm:$0xff]  ;;  %v6307_v32 = vmul.f32 100.0, %v121_v23  ;;  %v6309_v33 = vmul.f32 100.0, %v122_v24  ;;  %v368_v47 = vmax.f32 %v367_v34, %v6285_v12 }
  0x26   :  { %8352 = vst [vmem:[#allocation24_spill] sm:$0xff] %v6301_v26  ;;  %8353 = vst [vmem:[#allocation25_spill] sm:$0xff] %v6303_v27  ;;  %v126_v35 = vld [vmem:[#allocation2 + $0x290] sm:$0xff]  ;;  %v127_v36 = vld [vmem:[#allocation2 + $0x298] sm:$0xff]  ;;  %v6312_v38 = vmul.f32 100.0, %v123_v28  ;;  %v6314_v39 = vmul.f32 100.0, %v124_v29 }
  0x27   :  { %8354 = vst [vmem:[#allocation26_spill] sm:$0xff] %v6305_v31  ;;  %8355 = vst [vmem:[#allocation27_spill] sm:$0xff] %v6307_v32  ;;  %v128_v37 = vld [vmem:[#allocation2 + $0x2a0] sm:$0xff]  ;;  %v6316_v40 = vmul.f32 100.0, %v125_v30  ;;  %v129_v41 = vld [vmem:[#allocation2 + $0x2a8] sm:$0xff]  ;;  %v6318_v44 = vmul.f32 100.0, %v126_v35  ;;  %v369_v60 = vmax.f32 %v368_v47, %v6287_v13 }
  0x28   :  { %8356 = vst [vmem:[#allocation28_spill] sm:$0xff] %v6309_v33  ;;  %8357 = vst [vmem:[#allocation29_spill] sm:$0xff] %v6312_v38  ;;  %v130_v42 = vld [vmem:[#allocation2 + $0x2b0] sm:$0xff]  ;;  %v131_v43 = vld [vmem:[#allocation2 + $0x2b8] sm:$0xff]  ;;  %v6320_v45 = vmul.f32 100.0, %v127_v36  ;;  %v6322_v46 = vmul.f32 100.0, %v128_v37 }
  0x29   :  { %8358 = vst [vmem:[#allocation30_spill] sm:$0xff] %v6314_v39  ;;  %8359 = vst [vmem:[#allocation31_spill] sm:$0xff] %v6316_v40  ;;  %v132_v48 = vld [vmem:[#allocation2 + $0x2c0] sm:$0xff]  ;;  %v133_v49 = vld [vmem:[#allocation2 + $0x2c8] sm:$0xff]  ;;  %v6325_v51 = vmul.f32 100.0, %v129_v41  ;;  %v6327_v52 = vmul.f32 100.0, %v130_v42  ;;  %v370_v5 = vmax.f32 %v369_v60, %v6289_v14 }
  0x2a   :  { %8360 = vst [vmem:[#allocation32_spill] sm:$0xff] %v6318_v44  ;;  %8361 = vst [vmem:[#allocation33_spill] sm:$0xff] %v6320_v45  ;;  %v134_v50 = vld [vmem:[#allocation2 + $0x2d0] sm:$0xff]  ;;  %v6329_v53 = vmul.f32 100.0, %v131_v43  ;;  %v135_v54 = vld [vmem:[#allocation2 + $0x2d8] sm:$0xff]  ;;  %v6331_v57 = vmul.f32 100.0, %v132_v48 }
  0x2b   :  { %8362 = vst [vmem:[#allocation34_spill] sm:$0xff] %v6322_v46  ;;  %v136_v55 = vld [vmem:[#allocation2 + $0x2e0] sm:$0xff]  ;;  %v137_v56 = vld [vmem:[#allocation2 + $0x2e8] sm:$0xff]  ;;  %v6333_v58 = vmul.f32 100.0, %v133_v49  ;;  %v6335_v59 = vmul.f32 100.0, %v134_v50  ;;  %v138_v61 = vld [vmem:[#allocation2 + $0x2f0] sm:$0xff]  ;;  %v371_v28 = vmax.f32 %v370_v5, %v6291_v18 }
  0x2c   :  { %v139_v62 = vld [vmem:[#allocation2 + $0x2f8] sm:$0xff]  ;;  %v6338_v63 = vmul.f32 100.0, %v135_v54  ;;  %v6340_v0 = vmul.f32 100.0, %v136_v55  ;;  %v6342_v1 = vmul.f32 100.0, %v137_v56  ;;  %v44_v2 = vld [vmem:[#allocation2] sm:$0xff]  ;;  %v6344_v3 = vmul.f32 100.0, %v138_v61 }
  0x2d   :  { %8363 = vst [vmem:[#allocation35_spill] sm:$0xff] %v6335_v59  ;;  %v6346_v4 = vmul.f32 100.0, %v139_v62  ;;  %v45_v9 = vld [vmem:[#allocation2 + $0x8] sm:$0xff]  ;;  %v46_v10 = vld [vmem:[#allocation2 + $0x10] sm:$0xff]  ;;  %v47_v11 = vld [vmem:[#allocation2 + $0x18] sm:$0xff]  ;;  %v6349_v15 = vmul.f32 100.0, %v44_v2  ;;  %v372_v54 = vmax.f32 %v371_v28, %v6293_v19 }
  0x2e   :  { %8364 = vst [vmem:[#allocation36_spill] sm:$0xff] %v6338_v63  ;;  %8365 = vst [vmem:[#allocation37_spill] sm:$0xff] %v6340_v0  ;;  %v48_v16 = vld [vmem:[#allocation2 + $0x20] sm:$0xff]  ;;  %v49_v17 = vld [vmem:[#allocation2 + $0x28] sm:$0xff]  ;;  %v6351_v22 = vmul.f32 100.0, %v45_v9  ;;  %v6353_v23 = vmul.f32 100.0, %v46_v10 }
  0x2f   :  { %8366 = vst [vmem:[#allocation38_spill] sm:$0xff] %v6342_v1  ;;  %8367 = vst [vmem:[#allocation39_spill] sm:$0xff] %v6344_v3  ;;  %v50_v21 = vld [vmem:[#allocation2 + $0x30] sm:$0xff]  ;;  %v6355_v24 = vmul.f32 100.0, %v47_v11  ;;  %v51_v29 = vld [vmem:[#allocation2 + $0x38] sm:$0xff]  ;;  %v6358_v35 = vmul.f32 100.0, %v48_v16  ;;  %v373_v28 = vmax.f32 %v372_v54, %v6295_v20 }
  0x30   :  { %8368 = vst [vmem:[#allocation40_spill] sm:$0xff] %v6346_v4  ;;  %8369 = vst [vmem:[#allocation41_spill] sm:$0xff] %v6349_v15  ;;  %v52_v30 = vld [vmem:[#allocation2 + $0x40] sm:$0xff]  ;;  %v53_v34 = vld [vmem:[#allocation2 + $0x48] sm:$0xff]  ;;  %v6360_v36 = vmul.f32 100.0, %v49_v17  ;;  %v6362_v37 = vmul.f32 100.0, %v50_v21  ;;  %v300_v50 = vmax.f32 %v6349_v15, %v6351_v22 }
  0x31   :  { %8370 = vst [vmem:[#allocation42_spill] sm:$0xff] %v6351_v22  ;;  %8371 = vst [vmem:[#allocation43_spill] sm:$0xff] %v6353_v23  ;;  %v54_v41 = vld [vmem:[#allocation2 + $0x50] sm:$0xff]  ;;  %v55_v42 = vld [vmem:[#allocation2 + $0x58] sm:$0xff]  ;;  %v6364_v47 = vmul.f32 100.0, %v51_v29  ;;  %v6366_v48 = vmul.f32 100.0, %v52_v30  ;;  %v374_v54 = vmax.f32 %v373_v28, %v6299_v25 }
  0x32   :  { %8372 = vst [vmem:[#allocation44_spill] sm:$0xff] %v6355_v24  ;;  %8373 = vst [vmem:[#allocation45_spill] sm:$0xff] %v6358_v35  ;;  %v56_v43 = vld [vmem:[#allocation2 + $0x60] sm:$0xff]  ;;  %v6368_v49 = vmul.f32 100.0, %v53_v34  ;;  %v57_v55 = vld [vmem:[#allocation2 + $0x68] sm:$0xff]  ;;  %v6373_v61 = vmul.f32 100.0, %v54_v41  ;;  %v301_v21 = vmax.f32 %v300_v50, %v6353_v23 }
  0x33   :  { %8374 = vst [vmem:[#allocation46_spill] sm:$0xff] %v6360_v36  ;;  %8375 = vst [vmem:[#allocation47_spill] sm:$0xff] %v6362_v37  ;;  %v58_v56 = vld [vmem:[#allocation2 + $0x70] sm:$0xff]  ;;  %v59_v60 = vld [vmem:[#allocation2 + $0x78] sm:$0xff]  ;;  %v6375_v62 = vmul.f32 100.0, %v55_v42  ;;  %v6377_v2 = vmul.f32 100.0, %v56_v43  ;;  %v375_v28 = vmax.f32 %v374_v54, %v6301_v26 }
  0x34   :  { %8376 = vst [vmem:[#allocation48_spill] sm:$0xff] %v6364_v47  ;;  %8377 = vst [vmem:[#allocation49_spill] sm:$0xff] %v6366_v48  ;;  %v60_v5 = vld [vmem:[#allocation2 + $0x80] sm:$0xff]  ;;  %v61_v9 = vld [vmem:[#allocation2 + $0x88] sm:$0xff]  ;;  %v6379_v11 = vmul.f32 100.0, %v57_v55  ;;  %v6381_v16 = vmul.f32 100.0, %v58_v56  ;;  %v302_v50 = vmax.f32 %v301_v21, %v6355_v24 }
  0x35   :  { %8378 = vst [vmem:[#allocation50_spill] sm:$0xff] %v6368_v49  ;;  %8379 = vst [vmem:[#allocation51_spill] sm:$0xff] %v6373_v61  ;;  %v62_v10 = vld [vmem:[#allocation2 + $0x90] sm:$0xff]  ;;  %v6383_v17 = vmul.f32 100.0, %v59_v60  ;;  %v63_v29 = vld [vmem:[#allocation2 + $0x98] sm:$0xff]  ;;  %v6387_v41 = vmul.f32 100.0, %v60_v5 }
  0x36   :  { %8380 = vst [vmem:[#allocation52_spill] sm:$0xff] %v6375_v62  ;;  %8381 = vst [vmem:[#allocation53_spill] sm:$0xff] %v6377_v2  ;;  %v64_v30 = vld [vmem:[#allocation2 + $0xa0] sm:$0xff]  ;;  %v65_v34 = vld [vmem:[#allocation2 + $0xa8] sm:$0xff]  ;;  %v6389_v42 = vmul.f32 100.0, %v61_v9  ;;  %v6391_v43 = vmul.f32 100.0, %v62_v10  ;;  %v303_v21 = vmax.f32 %v302_v50, %v6358_v35 }
  0x37   :  { %8382 = vst [vmem:[#allocation54_spill] sm:$0xff] %v6379_v11  ;;  %8383 = vst [vmem:[#allocation55_spill] sm:$0xff] %v6381_v16  ;;  %v66_v19 = vld [vmem:[#allocation2 + $0xb0] sm:$0xff]  ;;  %v67_v55 = vld [vmem:[#allocation2 + $0xb8] sm:$0xff]  ;;  %v6393_v56 = vmul.f32 100.0, %v63_v29  ;;  %v6395_v60 = vmul.f32 100.0, %v64_v30 }
  0x38   :  { %8384 = vst [vmem:[#allocation56_spill] sm:$0xff] %v6383_v17  ;;  %v68_v18 = vld [vmem:[#allocation2 + $0xc0] sm:$0xff]  ;;  %v6397_v14 = vmul.f32 100.0, %v65_v34  ;;  %v69_v20 = vld [vmem:[#allocation2 + $0xc8] sm:$0xff]  ;;  %v70_v5 = vld [vmem:[#allocation2 + $0xd0] sm:$0xff]  ;;  %v6401_v9 = vmul.f32 100.0, %v66_v19 }
  0x39   :  { %v71_v13 = vld [vmem:[#allocation2 + $0xd8] sm:$0xff]  ;;  %v6403_v10 = vmul.f32 100.0, %v67_v55  ;;  %v6405_v12 = vmul.f32 100.0, %v68_v18  ;;  %v72_v8 = vld [vmem:[#allocation2 + $0xe0] sm:$0xff]  ;;  %v73_v29 = vld [vmem:[#allocation2 + $0xe8] sm:$0xff]  ;;  %v6407_v30 = vmul.f32 100.0, %v69_v20  ;;  %v304_v20 = vmax.f32 %v303_v21, %v6360_v36 }
  0x3a   :  { %v74_v7 = vld [vmem:[#allocation2 + $0xf0] sm:$0xff]  ;;  %v6409_v34 = vmul.f32 100.0, %v70_v5  ;;  %v6411_v6 = vmul.f32 100.0, %v71_v13  ;;  %v75_v25 = vld [vmem:[#allocation2 + $0xf8] sm:$0xff]  ;;  %v6415_v19 = vmul.f32 100.0, %v72_v8  ;;  %v6417_v55 = vmul.f32 100.0, %v73_v29 }
  0x3b   :  { %8385 = vst [vmem:[#allocation57_spill] sm:$0xff] %v6403_v10  ;;  %8386 = vst [vmem:[#allocation58_spill] sm:$0xff] %v6405_v12  ;;  %v6419_v18 = vmul.f32 100.0, %v74_v7  ;;  %v140_v24 = vld [vmem:[#allocation2 + $0x300] sm:$0xff]  ;;  %v141_v23 = vld [vmem:[#allocation2 + $0x308] sm:$0xff]  ;;  %v6421_v22 = vmul.f32 100.0, %v75_v25  ;;  %v376_v8 = vmax.f32 %v375_v28, %v6303_v27  ;;  %v305_v21 = vmax.f32 %v304_v20, %v6362_v37 }
  0x3c   :  { %8387 = vst [vmem:[#allocation59_spill] sm:$0xff] %v6407_v30  ;;  %8388 = vst [vmem:[#allocation60_spill] sm:$0xff] %v6409_v34  ;;  %v142_v5 = vld [vmem:[#allocation2 + $0x310] sm:$0xff]  ;;  %v143_v13 = vld [vmem:[#allocation2 + $0x318] sm:$0xff]  ;;  %v6426_v50 = vmul.f32 100.0, %v141_v23  ;;  %s6195_s26 = scalar_lea.vmem %s4701_s1, 512 }
  0x3d   :  { %8389 = vst [vmem:[#allocation61_spill] sm:$0xff] %v6411_v6  ;;  %8390 = vst [vmem:[#allocation62_spill] sm:$0xff] %v6415_v19  ;;  %v144_v15 = vld [vmem:[#allocation2 + $0x320] sm:$0xff]  ;;  %v6424_v6 = vmul.f32 100.0, %v140_v24  ;;  %v145_v54 = vld [vmem:[#allocation2 + $0x328] sm:$0xff]  ;;  %v6429_v7 = vmul.f32 100.0, %v142_v5  ;;  %v377_v28 = vmax.f32 %v376_v8, %v6305_v31  ;;  %v306_v20 = vmax.f32 %v305_v21, %v6364_v47  ;;  %p6196_p10 = scmp.ne.s32.totalorder %s4701_s1, %s6195_s26  ;;  %p6201_p12 = scmp.lt.s32.totalorder %s6195_s26, %s6195_s26 }
  0x3e   :  { %8391 = vst [vmem:[#allocation63_spill] sm:$0xff] %v6417_v55  ;;  %8392 = vst [vmem:[#allocation64_spill] sm:$0xff] %v6419_v18  ;;  %v146_v29 = vld [vmem:[#allocation2 + $0x330] sm:$0xff]  ;;  %v147_v26 = vld [vmem:[#allocation2 + $0x338] sm:$0xff]  ;;  %v6431_v35 = vmul.f32 100.0, %v143_v13  ;;  %v6433_v25 = vmul.f32 100.0, %v144_v15 }
  0x3f   :  { %8393 = vst [vmem:[#allocation65_spill] sm:$0xff] %v6421_v22  ;;  %8394 = vst [vmem:[#allocation66_spill] sm:$0xff] %v6424_v6  ;;  %v148_v36 = vld [vmem:[#allocation2 + $0x340] sm:$0xff]  ;;  %v149_v22 = vld [vmem:[#allocation2 + $0x348] sm:$0xff]  ;;  %v6436_v24 = vmul.f32 100.0, %v145_v54  ;;  %v6438_v23 = vmul.f32 100.0, %v146_v29  ;;  %v378_v8 = vmax.f32 %v377_v28, %v6307_v32  ;;  %v307_v21 = vmax.f32 %v306_v20, %v6366_v48  ;;  %p6202_p13 = por %p6201_p12, %p6200_p11 }
  0x40   :  { %8395 = vst [vmem:[#allocation67_spill] sm:$0xff] %v6426_v50  ;;  %8396 = vst [vmem:[#allocation68_spill] sm:$0xff] %v6429_v7  ;;  %v150_v18 = vld [vmem:[#allocation2 + $0x350] sm:$0xff]  ;;  %v6440_v55 = vmul.f32 100.0, %v147_v26  ;;  %v151_v27 = vld [vmem:[#allocation2 + $0x358] sm:$0xff]  ;;  %v6443_v13 = vmul.f32 100.0, %v148_v36 }
  0x41   :  { %8397 = vst [vmem:[#allocation69_spill] sm:$0xff] %v6431_v35  ;;  %8398 = vst [vmem:[#allocation70_spill] sm:$0xff] %v6433_v25  ;;  %v152_v5 = vld [vmem:[#allocation2 + $0x360] sm:$0xff]  ;;  %v153_v19 = vld [vmem:[#allocation2 + $0x368] sm:$0xff]  ;;  %v6445_v15 = vmul.f32 100.0, %v149_v22  ;;  %v6447_v34 = vmul.f32 100.0, %v150_v18  ;;  %v379_v28 = vmax.f32 %v378_v8, %v6309_v33  ;;  %v308_v20 = vmax.f32 %v307_v21, %v6368_v49  ;;  %p6203_p0 = pnand %p6202_p13, %p6196_p10 }
  0x42   :  { %8399 = vst [vmem:[#allocation71_spill] sm:$0xff] %v6436_v24  ;;  %8400 = vst [vmem:[#allocation72_spill] sm:$0xff] %v6438_v23  ;;  %v154_v37 = vld [vmem:[#allocation2 + $0x370] sm:$0xff]  ;;  %v155_v54 = vld [vmem:[#allocation2 + $0x378] sm:$0xff]  ;;  %v6450_v29 = vmul.f32 100.0, %v151_v27  ;;  %v6452_v26 = vmul.f32 100.0, %v152_v5 }
  0x43   :  { %8401 = vst [vmem:[#allocation73_spill] sm:$0xff] %v6440_v55  ;;  %8402 = vst [vmem:[#allocation74_spill] sm:$0xff] %v6443_v13  ;;  %v156_v4 = vld [vmem:[#allocation2 + $0x380] sm:$0xff]  ;;  %v6454_v30 = vmul.f32 100.0, %v153_v19  ;;  %v157_v31 = vld [vmem:[#allocation2 + $0x388] sm:$0xff]  ;;  %v6457_v22 = vmul.f32 100.0, %v154_v37  ;;  %v380_v8 = vmax.f32 %v379_v28, %v6312_v38  ;;  %v309_v21 = vmax.f32 %v308_v20, %v6373_v61 }
  0x44   :  { %8403 = vst [vmem:[#allocation75_spill] sm:$0xff] %v6445_v15  ;;  %8404 = vst [vmem:[#allocation76_spill] sm:$0xff] %v6447_v34  ;;  %v158_v36 = vld [vmem:[#allocation2 + $0x390] sm:$0xff]  ;;  %v159_v3 = vld [vmem:[#allocation2 + $0x398] sm:$0xff]  ;;  %v6459_v18 = vmul.f32 100.0, %v155_v54  ;;  %v6461_v12 = vmul.f32 100.0, %v156_v4 }
  0x45   :  { %8405 = vst [vmem:[#allocation77_spill] sm:$0xff] %v6450_v29  ;;  %8406 = vst [vmem:[#allocation78_spill] sm:$0xff] %v6452_v26  ;;  %v160_v47 = vld [vmem:[#allocation2 + $0x3a0] sm:$0xff]  ;;  %v161_v27 = vld [vmem:[#allocation2 + $0x3a8] sm:$0xff]  ;;  %v6464_v5 = vmul.f32 100.0, %v157_v31  ;;  %v6466_v19 = vmul.f32 100.0, %v158_v36  ;;  %v381_v38 = vmax.f32 %v380_v8, %v6314_v39 }
  0x46   :  { %8407 = vst [vmem:[#allocation79_spill] sm:$0xff] %v6454_v30  ;;  %8408 = vst [vmem:[#allocation80_spill] sm:$0xff] %v6457_v22  ;;  %v162_v1 = vld [vmem:[#allocation2 + $0x3b0] sm:$0xff]  ;;  %v6468_v10 = vmul.f32 100.0, %v159_v3  ;;  %v163_v32 = vld [vmem:[#allocation2 + $0x3b8] sm:$0xff]  ;;  %v6471_v54 = vmul.f32 100.0, %v160_v47 }
  0x47   :  { %8409 = vst [vmem:[#allocation81_spill] sm:$0xff] %v6459_v18  ;;  %8410 = vst [vmem:[#allocation82_spill] sm:$0xff] %v6461_v12  ;;  %v164_v37 = vld [vmem:[#allocation2 + $0x3c0] sm:$0xff]  ;;  %v165_v22 = vld [vmem:[#allocation2 + $0x3c8] sm:$0xff]  ;;  %v6473_v4 = vmul.f32 100.0, %v161_v27  ;;  %v6475_v12 = vmul.f32 100.0, %v162_v1 }
  0x48   :  { %8411 = vst [vmem:[#allocation83_spill] sm:$0xff] %v6464_v5  ;;  %8412 = vst [vmem:[#allocation84_spill] sm:$0xff] %v6466_v19  ;;  %v166_v48 = vld [vmem:[#allocation2 + $0x3d0] sm:$0xff]  ;;  %v167_v31 = vld [vmem:[#allocation2 + $0x3d8] sm:$0xff]  ;;  %v6478_v36 = vmul.f32 100.0, %v163_v32  ;;  %v6480_v3 = vmul.f32 100.0, %v164_v37 }
  0x49   :  { %8413 = vst [vmem:[#allocation85_spill] sm:$0xff] %v6468_v10  ;;  %8414 = vst [vmem:[#allocation86_spill] sm:$0xff] %v6471_v54  ;;  %v168_v5 = vld [vmem:[#allocation2 + $0x3e0] sm:$0xff]  ;;  %v6482_v10 = vmul.f32 100.0, %v165_v22  ;;  %v169_v33 = vld [vmem:[#allocation2 + $0x3e8] sm:$0xff]  ;;  %v6485_v27 = vmul.f32 100.0, %v166_v48  ;;  %v399_v48 = vmax.f32 %v6424_v6, %v6426_v50  ;;  %v382_v50 = vmax.f32 %v381_v38, %v6316_v40 }
  0x4a   :  { %8415 = vst [vmem:[#allocation87_spill] sm:$0xff] %v6473_v4  ;;  %8416 = vst [vmem:[#allocation88_spill] sm:$0xff] %v6475_v12  ;;  %v170_v47 = vld [vmem:[#allocation2 + $0x3f0] sm:$0xff]  ;;  %v171_v54 = vld [vmem:[#allocation2 + $0x3f8] sm:$0xff]  ;;  %v6487_v1 = vmul.f32 100.0, %v167_v31  ;;  %v6489_v12 = vmul.f32 100.0, %v168_v5 }
  0x4b   :  { %8417 = vst [vmem:[#allocation89_spill] sm:$0xff] %v6478_v36  ;;  %8418 = vst [vmem:[#allocation90_spill] sm:$0xff] %v6480_v3  ;;  %v6492_v49 = vmul.f32 100.0, %v169_v33  ;;  %v6494_v32 = vmul.f32 100.0, %v170_v47  ;;  %v6496_v37 = vmul.f32 100.0, %v171_v54  ;;  %v76_v22 = vld [vmem:[#allocation2 + $0x100] sm:$0xff]  ;;  %v310_v33 = vmax.f32 %v309_v21, %v6375_v62 }
  0x4c   :  { %8419 = vst [vmem:[#allocation91_spill] sm:$0xff] %v6482_v10  ;;  %8420 = vst [vmem:[#allocation92_spill] sm:$0xff] %v6485_v27  ;;  %v77_v10 = vld [vmem:[#allocation2 + $0x108] sm:$0xff]  ;;  %v78_v28 = vld [vmem:[#allocation2 + $0x110] sm:$0xff]  ;;  %v400_v6 = vmax.f32 %v399_v48, %v6429_v7  ;;  %v383_v38 = vmax.f32 %v382_v50, %v6318_v44 }
  0x4d   :  { %8421 = vst [vmem:[#allocation93_spill] sm:$0xff] %v6487_v1  ;;  %8422 = vst [vmem:[#allocation94_spill] sm:$0xff] %v6489_v12  ;;  %v79_v31 = vld [vmem:[#allocation2 + $0x118] sm:$0xff]  ;;  %v80_v1 = vld [vmem:[#allocation2 + $0x120] sm:$0xff]  ;;  %v6501_v12 = vmul.f32 100.0, %v76_v22  ;;  %v6503_v20 = vmul.f32 100.0, %v77_v10  ;;  %v311_v21 = vmax.f32 %v310_v33, %v6377_v2 }
  0x4e   :  { %8423 = vst [vmem:[#allocation95_spill] sm:$0xff] %v6492_v49  ;;  %8424 = vst [vmem:[#allocation96_spill] sm:$0xff] %v6494_v32  ;;  %v81_v5 = vld [vmem:[#allocation2 + $0x128] sm:$0xff]  ;;  %v82_v47 = vld [vmem:[#allocation2 + $0x130] sm:$0xff]  ;;  %v6508_v32 = vmul.f32 100.0, %v79_v31  ;;  %v6510_v8 = vmul.f32 100.0, %v80_v1  ;;  %v401_v48 = vmax.f32 %v400_v6, %v6431_v35  ;;  %v384_v6 = vmax.f32 %v383_v38, %v6320_v45 }
  0x4f   :  { %8425 = vst [vmem:[#allocation97_spill] sm:$0xff] %v6496_v37  ;;  %v83_v54 = vld [vmem:[#allocation2 + $0x138] sm:$0xff]  ;;  %v84_v61 = vld [vmem:[#allocation2 + $0x140] sm:$0xff]  ;;  %v6506_v37 = vmul.f32 100.0, %v78_v28  ;;  %v85_v39 = vld [vmem:[#allocation2 + $0x148] sm:$0xff]  ;;  %v6514_v10 = vmul.f32 100.0, %v81_v5  ;;  %v312_v33 = vmax.f32 %v311_v21, %v6379_v11 }
  0x50   :  { %v86_v22 = vld [vmem:[#allocation2 + $0x150] sm:$0xff]  ;;  %v87_v49 = vld [vmem:[#allocation2 + $0x158] sm:$0xff]  ;;  %v6516_v27 = vmul.f32 100.0, %v82_v47  ;;  %v88_v62 = vld [vmem:[#allocation2 + $0x160] sm:$0xff]  ;;  %v6519_v31 = vmul.f32 100.0, %v83_v54  ;;  %v6521_v1 = vmul.f32 100.0, %v84_v61  ;;  %v402_v50 = vmax.f32 %v401_v48, %v6433_v25 }
  0x51   :  { %v89_v28 = vld [vmem:[#allocation2 + $0x168] sm:$0xff]  ;;  %v90_v3 = vld [vmem:[#allocation2 + $0x170] sm:$0xff]  ;;  %v6523_v36 = vmul.f32 100.0, %v85_v39  ;;  %v91_v7 = vld [vmem:[#allocation2 + $0x178] sm:$0xff]  ;;  %v6527_v47 = vmul.f32 100.0, %v86_v22  ;;  %v6529_v4 = vmul.f32 100.0, %v87_v49  ;;  %v313_v21 = vmax.f32 %v312_v33, %v6381_v16 }
  0x52   :  { %8426 = vst [vmem:[#allocation98_spill] sm:$0xff] %v6521_v1  ;;  %v92_v5 = vld [vmem:[#allocation2 + $0x180] sm:$0xff]  ;;  %v93_v40 = vld [vmem:[#allocation2 + $0x188] sm:$0xff]  ;;  %v94_v2 = vld [vmem:[#allocation2 + $0x190] sm:$0xff]  ;;  %v6532_v61 = vmul.f32 100.0, %v88_v62  ;;  %v6534_v39 = vmul.f32 100.0, %v89_v28  ;;  %v385_v38 = vmax.f32 %v384_v6, %v6322_v46  ;;  %v403_v48 = vmax.f32 %v402_v50, %v6436_v24 }
  0x53   :  { %8427 = vst [vmem:[#allocation99_spill] sm:$0xff] %v6523_v36  ;;  %8428 = vst [vmem:[#allocation100_spill] sm:$0xff] %v6527_v47  ;;  %v95_v54 = vld [vmem:[#allocation2 + $0x198] sm:$0xff]  ;;  %v96_v19 = vld [vmem:[#allocation2 + $0x1a0] sm:$0xff]  ;;  %v6536_v36 = vmul.f32 100.0, %v90_v3  ;;  %v6540_v49 = vmul.f32 100.0, %v91_v7  ;;  %v314_v33 = vmax.f32 %v313_v21, %v6383_v17 }
  0x54   :  { %8429 = vst [vmem:[#allocation101_spill] sm:$0xff] %v6529_v4  ;;  %8430 = vst [vmem:[#allocation102_spill] sm:$0xff] %v6532_v61  ;;  %v97_v35 = vld [vmem:[#allocation2 + $0x1a8] sm:$0xff]  ;;  %v98_v22 = vld [vmem:[#allocation2 + $0x1b0] sm:$0xff]  ;;  %v6542_v4 = vmul.f32 100.0, %v92_v5  ;;  %v6545_v28 = vmul.f32 100.0, %v93_v40  ;;  %v386_v6 = vmax.f32 %v385_v38, %v6325_v51  ;;  %v404_v50 = vmax.f32 %v403_v48, %v6438_v23 }
  0x55   :  { %8431 = vst [vmem:[#allocation103_spill] sm:$0xff] %v6534_v39  ;;  %8432 = vst [vmem:[#allocation104_spill] sm:$0xff] %v6536_v36  ;;  %v99_v44 = vld [vmem:[#allocation2 + $0x1b8] sm:$0xff]  ;;  %v100_v11 = vld [vmem:[#allocation2 + $0x1c0] sm:$0xff]  ;;  %v6547_v3 = vmul.f32 100.0, %v94_v2  ;;  %v6549_v36 = vmul.f32 100.0, %v95_v54 }
  0x56   :  { %8433 = vst [vmem:[#allocation105_spill] sm:$0xff] %v6542_v4  ;;  %v101_v62 = vld [vmem:[#allocation2 + $0x1c8] sm:$0xff]  ;;  %v102_v61 = vld [vmem:[#allocation2 + $0x1d0] sm:$0xff]  ;;  %8434 = vst [vmem:[#allocation106_spill] sm:$0xff] %v6545_v28  ;;  %v6553_v5 = vmul.f32 100.0, %v96_v19  ;;  %v6555_v4 = vmul.f32 100.0, %v97_v35  ;;  %v315_v35 = vmax.f32 %v314_v33, %v6387_v41 }
  0x57   :  { %v103_v25 = vld [vmem:[#allocation2 + $0x1d8] sm:$0xff]  ;;  %v104_v7 = vld [vmem:[#allocation2 + $0x1e0] sm:$0xff]  ;;  %v105_v45 = vld [vmem:[#allocation2 + $0x1e8] sm:$0xff]  ;;  %v6558_v28 = vmul.f32 100.0, %v98_v22  ;;  %v6560_v2 = vmul.f32 100.0, %v99_v44  ;;  %v6562_v54 = vmul.f32 100.0, %v100_v11  ;;  %v387_v44 = vmax.f32 %v386_v6, %v6327_v52 }
  0x58   :  { %v106_v16 = vld [vmem:[#allocation2 + $0x1f0] sm:$0xff]  ;;  %v107_v40 = vld [vmem:[#allocation2 + $0x1f8] sm:$0xff]  ;;  %v6566_v24 = vmul.f32 100.0, %v101_v62  ;;  %v6568_v19 = vmul.f32 100.0, %v102_v61  ;;  %v6571_v46 = vmul.f32 100.0, %v103_v25  ;;  %v6573_v21 = vmul.f32 100.0, %v104_v7 }
  0x59   :  { %v6575_v22 = vmul.f32 100.0, %v105_v45  ;;  %v405_v11 = vmax.f32 %v404_v50, %v6440_v55  ;;  %v6579_v17 = vmul.f32 100.0, %v106_v16  ;;  %v6581_v38 = vmul.f32 100.0, %v107_v40  ;;  %v8445_v55 = vld [vmem:[#allocation59_spill] sm:$0xff] }
  0x5a   :  { %8435 = vst [vmem:[#allocation107_spill] sm:$0xff] %v6571_v46  ;;  %8436 = vst [vmem:[#allocation108_spill] sm:$0xff] %v6573_v21  ;;  %v316_v62 = vmax.f32 %v315_v35, %v6389_v42  ;;  %v333_v61 = vmax.f32 %v6501_v12, %v6503_v20  ;;  %v388_v25 = vmax.f32 %v387_v44, %v6329_v53  ;;  %v8446_v23 = vld [vmem:[#allocation99_spill] sm:$0xff] }
  0x5b   :  { %8437 = vst [vmem:[#allocation109_spill] sm:$0xff] %v6575_v22  ;;  %8438 = vst [vmem:[#allocation110_spill] sm:$0xff] %v6579_v17  ;;  %v406_v48 = vmax.f32 %v405_v11, %v6443_v13  ;;  %v8443_v13 = vld [vmem:[#allocation58_spill] sm:$0xff] }
  0x5c   :  { %8439 = vst [vmem:[#allocation111_spill] sm:$0xff] %v6581_v38  ;;  %v317_v45 = vmax.f32 %v316_v62, %v6391_v43  ;;  %v334_v7 = vmax.f32 %v333_v61, %v6506_v37  ;;  %v389_v33 = vmax.f32 %v388_v25, %v6331_v57 }
  0x5d   :  { %v407_v16 = vmax.f32 %v406_v48, %v6445_v15  ;;  %v8442_v15 = vld [vmem:[#allocation80_spill] sm:$0xff] }
  0x5e   :  { %v318_v40 = vmax.f32 %v317_v45, %v6393_v56  ;;  %v335_v6 = vmax.f32 %v334_v7, %v6508_v32  ;;  %v390_v50 = vmax.f32 %v389_v33, %v6333_v58 }
  0x5f   :  { %v408_v35 = vmax.f32 %v407_v16, %v6447_v34  ;;  %v8440_v34 = vld [vmem:[#allocation57_spill] sm:$0xff] }
  0x60   :  { %v319_v44 = vmax.f32 %v318_v40, %v6395_v60  ;;  %v336_v11 = vmax.f32 %v335_v6, %v6510_v8  ;;  %v391_v62 = vmax.f32 %v390_v50, %v6335_v59  ;;  %v8461_v59 = vld [vmem:[#allocation87_spill] sm:$0xff] }
  0x61   :  { %v409_v61 = vmax.f32 %v408_v35, %v6450_v29  ;;  %v8441_v29 = vld [vmem:[#allocation38_spill] sm:$0xff] }
  0x62   :  { %v320_v25 = vmax.f32 %v319_v44, %v6397_v14  ;;  %v337_v48 = vmax.f32 %v336_v11, %v6514_v10  ;;  %v392_v45 = vmax.f32 %v391_v62, %v6338_v63  ;;  %v8449_v63 = vld [vmem:[#allocation60_spill] sm:$0xff] }
  0x63   :  { %v410_v7 = vmax.f32 %v409_v61, %v6452_v26  ;;  %v8444_v26 = vld [vmem:[#allocation39_spill] sm:$0xff] }
  0x64   :  { %v321_v33 = vmax.f32 %v320_v25, %v6401_v9  ;;  %v338_v16 = vmax.f32 %v337_v48, %v6516_v27  ;;  %v393_v40 = vmax.f32 %v392_v45, %v6340_v0  ;;  %v8448_v0 = vld [vmem:[#allocation82_spill] sm:$0xff] }
  0x65   :  { %v411_v6 = vmax.f32 %v410_v7, %v6454_v30  ;;  %v8447_v30 = vld [vmem:[#allocation40_spill] sm:$0xff] }
  0x66   :  { %v322_v50 = vmax.f32 %v321_v33, %v8440_v34  ;;  %v339_v35 = vmax.f32 %v338_v16, %v6519_v31  ;;  %v394_v44 = vmax.f32 %v393_v40, %v8441_v29 }
  0x67   :  { %v412_v11 = vmax.f32 %v411_v6, %v8442_v15 }
  0x68   :  { %v323_v62 = vmax.f32 %v322_v50, %v8443_v13  ;;  %v340_v61 = vmax.f32 %v339_v35, %v6521_v1  ;;  %v395_v25 = vmax.f32 %v394_v44, %v8444_v26  ;;  %v8450_v50 = vld [vmem:[#allocation83_spill] sm:$0xff]  ;;  %v8451_v35 = vld [vmem:[#allocation61_spill] sm:$0xff] }
  0x69   :  { %v413_v48 = vmax.f32 %v412_v11, %v6459_v18  ;;  %v8452_v44 = vld [vmem:[#allocation101_spill] sm:$0xff]  ;;  %v8453_v11 = vld [vmem:[#allocation84_spill] sm:$0xff] }
  0x6a   :  { %v324_v45 = vmax.f32 %v323_v62, %v8445_v55  ;;  %v341_v7 = vmax.f32 %v340_v61, %v8446_v23  ;;  %v396_v33 = vmax.f32 %v395_v25, %v8447_v30  ;;  %v8454_v62 = vld [vmem:[#allocation62_spill] sm:$0xff]  ;;  %v8456_v25 = vld [vmem:[#allocation85_spill] sm:$0xff] }
  0x6b   :  { %v414_v16 = vmax.f32 %v413_v48, %v8448_v0  ;;  %v8455_v61 = vld [vmem:[#allocation102_spill] sm:$0xff]  ;;  %v8457_v48 = vld [vmem:[#allocation63_spill] sm:$0xff] }
  0x6c   :  { %v325_v40 = vmax.f32 %v324_v45, %v8449_v63  ;;  %v342_v6 = vmax.f32 %v341_v7, %v6527_v47  ;;  %397 = vmax.xlane.f32.xlu1 %v396_v33  ;;  %v8458_v7 = vld [vmem:[#allocation86_spill] sm:$0xff]  ;;  %v8459_v47 = vld [vmem:[#allocation64_spill] sm:$0xff] }
  0x6d   :  { %v415_v15 = vmax.f32 %v414_v16, %v8450_v50  ;;  %v8460_v50 = vld [vmem:[#allocation104_spill] sm:$0xff] }
  0x6e   :  { %v326_v29 = vmax.f32 %v325_v40, %v8451_v35  ;;  %v343_v26 = vmax.f32 %v342_v6, %v8452_v44  ;;  %v8462_v44 = vld [vmem:[#allocation65_spill] sm:$0xff] }
  0x6f   :  { %v416_v18 = vmax.f32 %v415_v15, %v8453_v11  ;;  %v8463_v11 = vld [vmem:[#allocation88_spill] sm:$0xff] }
  0x70   :  { %v327_v1 = vmax.f32 %v326_v29, %v8454_v62  ;;  %v344_v23 = vmax.f32 %v343_v26, %v8455_v61 }
  0x71   :  { %v417_v30 = vmax.f32 %v416_v18, %v8456_v25  ;;  %v8464_v18 = vld [vmem:[#allocation105_spill] sm:$0xff] }
  0x72   :  { %v328_v0 = vmax.f32 %v327_v1, %v8457_v48  ;;  %v345_v45 = vmax.f32 %v344_v23, %v6534_v39  ;;  %v8465_v1 = vld [vmem:[#allocation89_spill] sm:$0xff]  ;;  %v8466_v23 = vld [vmem:[#allocation106_spill] sm:$0xff] }
  0x73   :  { %v418_v33 = vmax.f32 %v417_v30, %v8458_v7  ;;  %v8467_v30 = vld [vmem:[#allocation90_spill] sm:$0xff] }
  0x74   :  { %v329_v16 = vmax.f32 %v328_v0, %v8459_v47  ;;  %v346_v40 = vmax.f32 %v345_v45, %v8460_v50  ;;  %v8468_v45 = vld [vmem:[#allocation91_spill] sm:$0xff] }
  0x75   :  { %v419_v6 = vmax.f32 %v418_v33, %v8461_v59 }
  0x76   :  { %v330_v15 = vmax.f32 %v329_v16, %v8462_v44  ;;  %v347_v29 = vmax.f32 %v346_v40, %v6540_v49  ;;  %v8469_v16 = vld [vmem:[#allocation92_spill] sm:$0xff] }
  0x77   :  { %v420_v26 = vmax.f32 %v419_v6, %v8463_v11  ;;  %v8470_v6 = vld [vmem:[#allocation93_spill] sm:$0xff]  ;;  %v8471_v11 = vld [vmem:[#allocation94_spill] sm:$0xff] }
  0x78   :  { %331 = vmax.xlane.f32.xlu0 %v330_v15  ;;  %v348_v25 = vmax.f32 %v347_v29, %v8464_v18 }
  0x79   :  { %v421_v61 = vmax.f32 %v420_v26, %v8465_v1  ;;  %v8472_v1 = vld [vmem:[#allocation95_spill] sm:$0xff] }
  0x7a   :  { %v349_v39 = vmax.f32 %v348_v25, %v8466_v23 }
  0x7b   :  { %v422_v7 = vmax.f32 %v421_v61, %v8467_v30  ;;  %v8473_v30 = vld [vmem:[#allocation96_spill] sm:$0xff] }
  0x7c   :  { %v350_v0 = vmax.f32 %v349_v39, %v6547_v3 }
  0x7d   :  { %v423_v50 = vmax.f32 %v422_v7, %v8468_v45  ;;  %v8474_v45 = vld [vmem:[#allocation97_spill] sm:$0xff] }
  0x7e   :  { %v351_v33 = vmax.f32 %v350_v0, %v6549_v36 }
  0x7f   :  { %v424_v59 = vmax.f32 %v423_v50, %v8469_v16  ;;  %v8482_v16 = vld [vmem:[#allocation48_spill] sm:$0xff] }
  0x80   :  { %v352_v40 = vmax.f32 %v351_v33, %v6553_v5 }
  0x81   :  { %v425_v15 = vmax.f32 %v424_v59, %v8470_v6 }
  0x82   :  { %v353_v29 = vmax.f32 %v352_v40, %v6555_v4 }
  0x83   :  { %v426_v26 = vmax.f32 %v425_v15, %v8471_v11 }
  0x84   :  { %v354_v25 = vmax.f32 %v353_v29, %v6558_v28 }
  0x85   :  { %v427_v61 = vmax.f32 %v426_v26, %v8472_v1  ;;  %v8480_v1 = vld [vmem:[#allocation46_spill] sm:$0xff] }
  0x86   :  { %v355_v39 = vmax.f32 %v354_v25, %v6560_v2 }
  0x87   :  { %v428_v7 = vmax.f32 %v427_v61, %v8473_v30 }
  0x88   :  { %v356_v0 = vmax.f32 %v355_v39, %v6562_v54  ;;  %v8475_v39 = vld [vmem:[#allocation41_spill] sm:$0xff] }
  0x89   :  { %v429_v50 = vmax.f32 %v428_v7, %v8474_v45 }
  0x8a   :  { %v357_v33 = vmax.f32 %v356_v0, %v6566_v24  ;;  %v8476_v0 = vld [vmem:[#allocation42_spill] sm:$0xff] }
  0x8b   :  { %430 = vmax.xlane.f32.xlu1 %v429_v50 }
  0x8c   :  { %v358_v59 = vmax.f32 %v357_v33, %v6568_v19  ;;  %v8477_v33 = vld [vmem:[#allocation43_spill] sm:$0xff] }
  0x8e   :  { %v359_v40 = vmax.f32 %v358_v59, %v6571_v46 }
  0x90   :  { %v360_v15 = vmax.f32 %v359_v40, %v6573_v21  ;;  %v8478_v40 = vld [vmem:[#allocation44_spill] sm:$0xff] }
  0x92   :  { %v361_v29 = vmax.f32 %v360_v15, %v6575_v22 }
  0x94   :  { %v362_v26 = vmax.f32 %v361_v29, %v6579_v17  ;;  %v8479_v29 = vld [vmem:[#allocation45_spill] sm:$0xff] }
  0x96   :  { %v363_v25 = vmax.f32 %v362_v26, %v6581_v38 }
  0x98   :  { %364 = vmax.xlane.f32.xlu0 %v363_v25 }
 0x101   :  { %v6663_v61 = vpop.xlane.xlu0 %331 }
 0x102   :  { %v432_v7 = vsub.f32 %v8475_v39, %v6663_v61  ;;  %v433_v50 = vsub.f32 %v8476_v0, %v6663_v61  ;;  %v434_v59 = vsub.f32 %v8477_v33, %v6663_v61  ;;  %v435_v45 = vsub.f32 %v8478_v40, %v6663_v61  ;;  %v8481_v0 = vld [vmem:[#allocation47_spill] sm:$0xff] }
 0x103   :  { %v436_v26 = vsub.f32 %v8479_v29, %v6663_v61  ;;  %v437_v11 = vsub.f32 %v8480_v1, %v6663_v61  ;;  %v438_v6 = vsub.f32 %v8481_v0, %v6663_v61  ;;  %v439_v40 = vsub.f32 %v8482_v16, %v6663_v61  ;;  %v8484_v1 = vld [vmem:[#allocation50_spill] sm:$0xff] }
 0x104   :  { %v560_v15 = vmul.f32 1.442695, %v432_v7  ;;  %v562_v30 = vmul.f32 1.442695, %v433_v50  ;;  %v564_v25 = vmul.f32 1.442695, %v434_v59 }
 0x105   :  { %v566_v39 = vmul.f32 1.442695, %v435_v45  ;;  %v568_v33 = vmul.f32 1.442695, %v436_v26  ;;  %v570_v7 = vmul.f32 1.442695, %v437_v11 }
 0x106   :  { %5891 = vpow2.f32 %v560_v15  ;;  %v8483_v50 = vld [vmem:[#allocation49_spill] sm:$0xff]  ;;  %v572_v59 = vmul.f32 1.442695, %v438_v6  ;;  %v6683_v15 = vpop.xlane.xlu1 %397  ;;  %v574_v45 = vmul.f32 1.442695, %v439_v40  ;;  %v8486_v16 = vld [vmem:[#allocation14_spill] sm:$0xff] }
 0x107   :  { %5893 = vpow2.f32 %v562_v30  ;;  %v440_v29 = vsub.f32 %v8483_v50, %v6663_v61  ;;  %v441_v30 = vsub.f32 %v8484_v1, %v6663_v61  ;;  %v496_v11 = vsub.f32 %v8486_v16, %v6683_v15  ;;  %v8491_v1 = vld [vmem:[#allocation53_spill] sm:$0xff] }
 0x108   :  { %5895 = vpow2.f32 %v564_v25  ;;  %v8485_v25 = vld [vmem:[#allocation51_spill] sm:$0xff] }
 0x109   :  { %5897 = vpow2.f32 %v566_v39  ;;  %v442_v26 = vsub.f32 %v8485_v25, %v6663_v61  ;;  %v576_v0 = vmul.f32 1.442695, %v440_v29  ;;  %v578_v50 = vmul.f32 1.442695, %v441_v30 }
 0x10a   :  { %5899 = vpow2.f32 %v568_v33  ;;  %v8488_v33 = vld [vmem:[#allocation52_spill] sm:$0xff]  ;;  %v444_v25 = vsub.f32 %v8491_v1, %v6663_v61  ;;  %v688_v17 = vmul.f32 1.442695, %v496_v11 }
 0x10b   :  { %5901 = vpow2.f32 %v570_v7  ;;  %v443_v6 = vsub.f32 %v8488_v33, %v6663_v61  ;;  %v8490_v7 = vld [vmem:[#allocation15_spill] sm:$0xff]  ;;  %v580_v29 = vmul.f32 1.442695, %v442_v26  ;;  %v8492_v33 = vld [vmem:[#allocation54_spill] sm:$0xff] }
 0x10c   :  { %5903 = vpow2.f32 %v572_v59  ;;  %v497_v40 = vsub.f32 %v8490_v7, %v6683_v15  ;;  %v8493_v7 = vld [vmem:[#allocation16_spill] sm:$0xff]  ;;  %v8494_v26 = vld [vmem:[#allocation55_spill] sm:$0xff] }
 0x10d   :  { %5905 = vpow2.f32 %v574_v45  ;;  %v445_v45 = vsub.f32 %v8492_v33, %v6663_v61  ;;  %v582_v30 = vmul.f32 1.442695, %v443_v6  ;;  %v498_v1 = vsub.f32 %v8493_v7, %v6683_v15 }
 0x10e   :  { %5907 = vpow2.f32 %v576_v0  ;;  %v690_v0 = vmul.f32 1.442695, %v497_v40  ;;  %v446_v46 = vsub.f32 %v8494_v26, %v6663_v61 }
 0x10f   :  { %5909 = vpow2.f32 %v578_v50  ;;  %v8496_v50 = vld [vmem:[#allocation56_spill] sm:$0xff]  ;;  %v586_v33 = vmul.f32 1.442695, %v445_v45  ;;  %v8499_v45 = vld [vmem:[#allocation17_spill] sm:$0xff] }
 0x110   :  { %5911 = vpow2.f32 %v580_v29  ;;  %v447_v6 = vsub.f32 %v8496_v50, %v6663_v61  ;;  %v450_v29 = vsub.f32 %v6391_v43, %v6663_v61  ;;  %v588_v26 = vmul.f32 1.442695, %v446_v46  ;;  %v8502_v46 = vld [vmem:[#allocation19_spill] sm:$0xff] }
 0x111   :  { %5913 = vpow2.f32 %v688_v17 }
 0x112   :  { %5915 = vpow2.f32 %v582_v30  ;;  %v499_v30 = vsub.f32 %v8499_v45, %v6683_v15 }
 0x113   :  { %v6691_v39 = vpop.eup %5891  ;;  %5917 = vpow2.f32 %v690_v0 }
 0x114   :  { %8487 = vst [vmem:[#allocation57_spill] sm:$0xff] %v6691_v39  ;;  %v6695_v38 = vpop.eup %5893  ;;  %v694_v45 = vmul.f32 1.442695, %v499_v30 }
 0x115   :  { %8489 = vst [vmem:[#allocation58_spill] sm:$0xff] %v6695_v38  ;;  %v816_v59 = vadd.f32 %v6695_v38, %v6691_v39  ;;  %v6703_v16 = vpop.eup %5895  ;;  %v584_v39 = vmul.f32 1.442695, %v444_v25  ;;  %v449_v25 = vsub.f32 %v6389_v42, %v6663_v61  ;;  %v8500_v42 = vld [vmem:[#allocation18_spill] sm:$0xff] }
 0x116   :  { %v6708_v21 = vpop.eup %5897 }
 0x117   :  { %v817_v22 = vadd.f32 %v6703_v16, %v816_v59  ;;  %v6715_v38 = vpop.eup %5899  ;;  %v448_v59 = vsub.f32 %v6387_v41, %v6663_v61  ;;  %5919 = vpow2.f32 %v584_v39  ;;  %v590_v41 = vmul.f32 1.442695, %v447_v6 }
 0x118   :  { %8495 = vst [vmem:[#allocation59_spill] sm:$0xff] %v6715_v38  ;;  %v6722_v7 = vpop.eup %5901  ;;  %5921 = vpow2.f32 %v586_v33  ;;  %v594_v43 = vmul.f32 1.442695, %v449_v25  ;;  %v501_v39 = vsub.f32 %v8502_v46, %v6683_v15  ;;  %v451_v6 = vsub.f32 %v6393_v56, %v6663_v61  ;;  %v8505_v56 = vld [vmem:[#allocation20_spill] sm:$0xff] }
 0x119   :  { %v818_v11 = vadd.f32 %v6708_v21, %v817_v22  ;;  %8497 = vst [vmem:[#allocation60_spill] sm:$0xff] %v6722_v7  ;;  %v692_v22 = vmul.f32 1.442695, %v498_v1  ;;  %v6729_v50 = vpop.eup %5903  ;;  %v500_v1 = vsub.f32 %v8500_v42, %v6683_v15  ;;  %v453_v25 = vsub.f32 %v6397_v14, %v6663_v61 }
 0x11a   :  { %8498 = vst [vmem:[#allocation61_spill] sm:$0xff] %v6729_v50  ;;  %v6736_v0 = vpop.eup %5905 }
 0x11b   :  { %v819_v40 = vadd.f32 %v6715_v38, %v818_v11  ;;  %v592_v11 = vmul.f32 1.442695, %v448_v59  ;;  %8501 = vst [vmem:[#allocation62_spill] sm:$0xff] %v6736_v0  ;;  %5923 = vpow2.f32 %v692_v22  ;;  %v6743_v59 = vpop.eup %5907  ;;  %v696_v42 = vmul.f32 1.442695, %v500_v1 }
 0x11c   :  { %5925 = vpow2.f32 %v588_v26  ;;  %8503 = vst [vmem:[#allocation63_spill] sm:$0xff] %v6743_v59  ;;  %v6750_v46 = vpop.eup %5909  ;;  %v454_v26 = vsub.f32 %v6401_v9, %v6663_v61 }
 0x11d   :  { %v820_v17 = vadd.f32 %v6722_v7, %v819_v40  ;;  %v596_v40 = vmul.f32 1.442695, %v450_v29  ;;  %5927 = vpow2.f32 %v590_v41  ;;  %8504 = vst [vmem:[#allocation64_spill] sm:$0xff] %v6750_v46  ;;  %v698_v29 = vmul.f32 1.442695, %v501_v39  ;;  %v6757_v30 = vpop.eup %5911  ;;  %v5640_v7 = vld [vmem:[#allocation5 + $0x30] sm:$0xff]  }
 0x11e   :  { %5929 = vpow2.f32 %v592_v11  ;;  %8506 = vst [vmem:[#allocation65_spill] sm:$0xff] %v6757_v30  ;;  %v8507_v11 = vld [vmem:[#allocation21_spill] sm:$0xff]  ;;  %v602_v39 = vmul.f32 1.442695, %v453_v25 }
 0x11f   :  { %v821_v38 = vadd.f32 %v6729_v50, %v820_v17  ;;  %v452_v17 = vsub.f32 %v6395_v60, %v6663_v61  ;;  %5931 = vpow2.f32 %v594_v43  ;;  %v598_v60 = vmul.f32 1.442695, %v451_v6  ;;  %v8509_v6 = vld [vmem:[#allocation22_spill] sm:$0xff] }
 0x120   :  { %5933 = vpow2.f32 %v596_v40  ;;  %v503_v1 = vsub.f32 %v8507_v11, %v6683_v15  ;;  %v455_v43 = vsub.f32 %v8440_v34, %v6663_v61  ;;  %v504_v40 = vsub.f32 %v8509_v6, %v6683_v15 }
 0x121   :  { %v822_v33 = vadd.f32 %v6736_v0, %v821_v38  ;;  %v502_v38 = vsub.f32 %v8505_v56, %v6683_v15  ;;  %v600_v14 = vmul.f32 1.442695, %v452_v17  ;;  %5935 = vpow2.f32 %v694_v45 }
 0x122   :  { %5937 = vpow2.f32 %v696_v42  ;;  %v456_v45 = vsub.f32 %v8443_v13, %v6663_v61  ;;  %v604_v11 = vmul.f32 1.442695, %v454_v26  ;;  %v8511_v42 = vld [vmem:[#allocation23_spill] sm:$0xff]  ;;  %v8513_v13 = vld [vmem:[#allocation24_spill] sm:$0xff] }
 0x123   :  { %v823_v22 = vadd.f32 %v6743_v59, %v822_v33  ;;  %v6761_v33 = vpop.eup %5913  ;;  %5939 = vpow2.f32 %v698_v29  ;;  %v700_v17 = vmul.f32 1.442695, %v502_v38  ;;  %v457_v29 = vsub.f32 %v8445_v55, %v6663_v61 }
 0x124   :  { %v6766_v9 = vpop.eup %5915  ;;  %5941 = vpow2.f32 %v598_v60  ;;  %v606_v38 = vmul.f32 1.442695, %v455_v43  ;;  %v506_v26 = vsub.f32 %v8513_v13, %v6683_v15  ;;  %v704_v60 = vmul.f32 1.442695, %v504_v40 }
 0x125   :  { %v824_v41 = vadd.f32 %v6750_v46, %v823_v22  ;;  %8508 = vst [vmem:[#allocation105_spill] sm:$0xff] %v6766_v9  ;;  %v6770_v22 = vpop.eup %5917  ;;  %5943 = vpow2.f32 %v600_v14  ;;  %v608_v55 = vmul.f32 1.442695, %v456_v45  ;;  %v459_v13 = vsub.f32 %v8451_v35, %v6663_v61  ;;  %v8519_v45 = vld [vmem:[#allocation26_spill] sm:$0xff] }
 0x126   :  { %v6775_v25 = vpop.eup %5919  ;;  %5945 = vpow2.f32 %v602_v39  ;;  %v882_v14 = vadd.f32 %v6770_v22, %v6761_v33 }
 0x127   :  { %v825_v56 = vadd.f32 %v6757_v30, %v824_v41  ;;  %8510 = vst [vmem:[#allocation106_spill] sm:$0xff] %v6775_v25  ;;  %v505_v41 = vsub.f32 %v8511_v42, %v6683_v15  ;;  %v702_v30 = vmul.f32 1.442695, %v503_v1  ;;  %v6782_v59 = vpop.eup %5921  ;;  %5947 = vpow2.f32 %v700_v17 }
 0x128   :  { %8512 = vst [vmem:[#allocation41_spill] sm:$0xff] %v6782_v59  ;;  %v458_v1 = vsub.f32 %v8449_v63, %v6663_v61  ;;  %5949 = vpow2.f32 %v604_v11 }
 0x129   :  { %v826_v34 = vadd.f32 %v6766_v9, %v825_v56  ;;  %v6788_v56 = vpop.eup %5923  ;;  %5951 = vpow2.f32 %v702_v30  ;;  %v706_v17 = vmul.f32 1.442695, %v505_v41  ;;  %v460_v41 = vsub.f32 %v8454_v62, %v6663_v61  ;;  %v8522_v9 = vld [vmem:[#allocation27_spill] sm:$0xff] }
 0x12a   :  { %8514 = vst [vmem:[#allocation42_spill] sm:$0xff] %v6788_v56  ;;  %v6793_v39 = vpop.eup %5925  ;;  %5953 = vpow2.f32 %v606_v38  ;;  %v612_v35 = vmul.f32 1.442695, %v458_v1  ;;  %v5635_v38 = vld [vmem:[#allocation5 + $0x78] sm:$0xff]   ;;  %v461_v62 = vsub.f32 %v8457_v48, %v6663_v61  ;;  %v614_v1 = vmul.f32 1.442695, %v459_v13 }
 0x12b   :  { %v827_v6 = vadd.f32 %v6775_v25, %v826_v34  ;;  %8515 = vst [vmem:[#allocation43_spill] sm:$0xff] %v6793_v39  ;;  %v8516_v34 = vld [vmem:[#allocation25_spill] sm:$0xff]  ;;  %v6797_v40 = vpop.eup %5927  ;;  %v610_v25 = vmul.f32 1.442695, %v457_v29  ;;  %5955 = vpow2.f32 %v704_v60  ;;  %4985 = vmatprep.subr.bf16.mxu0 %v5635_v38  ;;  %v616_v13 = vmul.f32 1.442695, %v460_v41 }
 0x12c   :  { %v507_v42 = vsub.f32 %v8516_v34, %v6683_v15  ;;  %8517 = vst [vmem:[#allocation44_spill] sm:$0xff] %v6797_v40  ;;  %v6802_v11 = vpop.eup %5929  ;;  %v883_v34 = vadd.f32 %v6788_v56, %v882_v14  ;;  %5957 = vpow2.f32 %v608_v55  ;;  %v5641_v38 = vld [vmem:[#allocation5 + $0xf0] sm:$0xff]   ;;  %v5643_v56 = vld [vmem:[#allocation5 + $0x68] sm:$0xff]   ;;  %v463_v41 = vsub.f32 %v8462_v44, %v6663_v61 }
 0x12d   :  { %v828_v43 = vadd.f32 %v6782_v59, %v827_v6  ;;  %8518 = vst [vmem:[#allocation45_spill] sm:$0xff] %v6802_v11  ;;  %v508_v6 = vsub.f32 %v8519_v45, %v6683_v15  ;;  %v708_v59 = vmul.f32 1.442695, %v506_v26  ;;  %v6807_v30 = vpop.eup %5931  ;;  %v509_v45 = vsub.f32 %v8522_v9, %v6683_v15  ;;  %v8523_v26 = vld [vmem:[#allocation28_spill] sm:$0xff]  ;;  %v8524_v9 = vld [vmem:[#allocation29_spill] sm:$0xff] }
 0x12e   :  { %8520 = vst [vmem:[#allocation46_spill] sm:$0xff] %v6807_v30  ;;  %v510_v60 = vsub.f32 %v8523_v26, %v6683_v15  ;;  %5959 = vpow2.f32 %v706_v17  ;;  %v710_v14 = vmul.f32 1.442695, %v507_v42  ;;  %v511_v0 = vsub.f32 %v8524_v9, %v6683_v15  ;;  %v5639_v26 = vld [vmem:[#allocation5 + $0x70] sm:$0xff]  }
 0x12f   :  { %v829_v63 = vadd.f32 %v6793_v39, %v828_v43  ;;  %v5636_v43 = vld [vmem:[#allocation5 + $0x38] sm:$0xff]   ;;  %v6812_v39 = vpop.eup %5933  ;;  %5961 = vpow2.f32 %v610_v25  ;;  %v712_v17 = vmul.f32 1.442695, %v508_v6  ;;  %v462_v25 = vsub.f32 %v8459_v47, %v6663_v61  ;;  %v5642_v9 = vld [vmem:[#allocation5 + $0xb0] sm:$0xff]  }
 0x130   :  { %8521 = vst [vmem:[#allocation47_spill] sm:$0xff] %v6812_v39  ;;  %v6818_v46 = vpop.eup %5935  ;;  %5963 = vpow2.f32 %v708_v59  ;;  %4986 = vmatpush3.bf16.msra.mxu0 %v5636_v43  ;;  %v8526_v59 = vld [vmem:[#allocation30_spill] sm:$0xff] }
 0x131   :  { %v830_v29 = vadd.f32 %v6797_v40, %v829_v63  ;;  %v5637_v63 = vld [vmem:[#allocation5 + $0xf8] sm:$0xff]   ;;  %v6823_v50 = vpop.eup %5937  ;;  %v884_v42 = vadd.f32 %v6818_v46, %v883_v34  ;;  %5965 = vpow2.f32 %v612_v35  ;;  %v512_v6 = vsub.f32 %v8526_v59, %v6683_v15  ;;  %4987 = vmatprep.subr.bf16.mxu0 %v5639_v26 }
 0x132   :  { %v5638_v40 = vld [vmem:[#allocation5 + $0xb8] sm:$0xff]   ;;  %v6828_v48 = vpop.eup %5939  ;;  %5025 = vmatprep.subr.bf16.mxu1 %v5637_v63  ;;  %5967 = vpow2.f32 %v710_v14  ;;  %v714_v34 = vmul.f32 1.442695, %v509_v45  ;;  %v618_v35 = vmul.f32 1.442695, %v461_v62  ;;  %v5645_v63 = vld [vmem:[#allocation5 + $0xe8] sm:$0xff]   ;;  %v6845_v45 = vpop.xlane.xlu0 %364 }
 0x133   :  { %v831_v55 = vadd.f32 %v6802_v11, %v830_v29  ;;  %v6833_v11 = vpop.eup %5941  ;;  %v885_v43 = vadd.f32 %v6823_v50, %v884_v42  ;;  %5026 = vmatpush3.bf16.msra.mxu1 %v5638_v40  ;;  %5969 = vpow2.f32 %v614_v1  ;;  %v8529_v40 = vld [vmem:[#allocation31_spill] sm:$0xff]  ;;  %v716_v42 = vmul.f32 1.442695, %v510_v60  ;;  %v8530_v1 = vld [vmem:[#allocation32_spill] sm:$0xff] }
 0x134   :  { %8525 = vst [vmem:[#allocation48_spill] sm:$0xff] %v6833_v11  ;;  %v6838_v47 = vpop.eup %5943  ;;  %5027 = vmatprep.subr.bf16.mxu1 %v5641_v38  ;;  %v513_v14 = vsub.f32 %v8529_v40, %v6683_v15  ;;  %5971 = vpow2.f32 %v712_v17  ;;  %4988 = vmatpush3.bf16.msra.mxu0 %v5640_v7  ;;  %v620_v61 = vmul.f32 1.442695, %v462_v25  ;;  %v8532_v40 = vld [vmem:[#allocation33_spill] sm:$0xff]  ;;  %v718_v60 = vmul.f32 1.442695, %v511_v0 }
 0x135   :  { %v832_v29 = vadd.f32 %v6807_v30, %v831_v55  ;;  %8527 = vst [vmem:[#allocation49_spill] sm:$0xff] %v6838_v47  ;;  %v6843_v59 = vpop.eup %5945  ;;  %v886_v26 = vadd.f32 %v6828_v48, %v885_v43  ;;  %v5644_v30 = vld [vmem:[#allocation5 + $0x28] sm:$0xff]   ;;  %5973 = vpow2.f32 %v616_v13  ;;  %4989 = vmatprep.subr.bf16.mxu0 %v5643_v56  ;;  %v515_v17 = vsub.f32 %v8532_v40, %v6683_v15 }
 0x136   :  { %8528 = vst [vmem:[#allocation50_spill] sm:$0xff] %v6843_v59  ;;  %v6850_v44 = vpop.eup %5947  ;;  %5975 = vpow2.f32 %v714_v34  ;;  %v622_v25 = vmul.f32 1.442695, %v463_v41  ;;  %v465_v0 = vsub.f32 %v6503_v20, %v6845_v45 }
 0x137   :  { %v833_v55 = vadd.f32 %v6812_v39, %v832_v29  ;;  %v514_v29 = vsub.f32 %v8530_v1, %v6683_v15  ;;  %v6855_v38 = vpop.eup %5949  ;;  %v887_v7 = vadd.f32 %v6850_v44, %v886_v26  ;;  %5028 = vmatpush3.bf16.msra.mxu1 %v5642_v9  ;;  %5977 = vpow2.f32 %v618_v35  ;;  %v8534_v35 = vld [vmem:[#allocation34_spill] sm:$0xff] }
 0x138   :  { %8531 = vst [vmem:[#allocation51_spill] sm:$0xff] %v6855_v38  ;;  %v6860_v43 = vpop.eup %5951  ;;  %5029 = vmatprep.subr.bf16.mxu1 %v5645_v63  ;;  %5979 = vpow2.f32 %v716_v42  ;;  %v720_v1 = vmul.f32 1.442695, %v512_v6  ;;  %4990 = vmatpush3.bf16.msra.mxu0 %v5644_v30  ;;  %v516_v26 = vsub.f32 %v8534_v35, %v6683_v15  ;;  %v519_v35 = vsub.f32 %v6329_v53, %v6683_v15 }
 0x139   :  { %v834_v62 = vadd.f32 %v6833_v11, %v833_v55  ;;  %v464_v55 = vsub.f32 %v6501_v12, %v6845_v45  ;;  %v6865_v56 = vpop.eup %5953  ;;  %v888_v34 = vadd.f32 %v6860_v43, %v887_v7  ;;  %5981 = vpow2.f32 %v620_v61 }
 0x13a   :  { %8533 = vst [vmem:[#allocation14_spill] sm:$0xff] %v6865_v56  ;;  %v6870_v9 = vpop.eup %5955  ;;  %v722_v12 = vmul.f32 1.442695, %v513_v14  ;;  %5983 = vpow2.f32 %v718_v60  ;;  %v724_v42 = vmul.f32 1.442695, %v514_v29  ;;  %v517_v61 = vsub.f32 %v6325_v51, %v6683_v15 }
 0x13b   :  { %v835_v13 = vadd.f32 %v6838_v47, %v834_v62  ;;  %v6875_v63 = vpop.eup %5957  ;;  %v889_v6 = vadd.f32 %v6870_v9, %v888_v34  ;;  %v466_v62 = vsub.f32 %v6506_v37, %v6845_v45  ;;  %5985 = vpow2.f32 %v622_v25 }
 0x13c   :  { %8535 = vst [vmem:[#allocation52_spill] sm:$0xff] %v6875_v63  ;;  %v6880_v20 = vpop.eup %5959  ;;  %v624_v40 = vmul.f32 1.442695, %v464_v55  ;;  %5987 = vpow2.f32 %v720_v1  ;;  %v467_v29 = vsub.f32 %v6508_v32, %v6845_v45  ;;  %v626_v60 = vmul.f32 1.442695, %v465_v0 }
 0x13d   :  { %v836_v41 = vadd.f32 %v6843_v59, %v835_v13  ;;  %v6885_v7 = vpop.eup %5961  ;;  %v890_v14 = vadd.f32 %v6880_v20, %v889_v6  ;;  %v518_v25 = vsub.f32 %v6327_v52, %v6683_v15  ;;  %5989 = vpow2.f32 %v722_v12  ;;  %v5646_v59 = vld [vmem:[#allocation5 + $0xa8] sm:$0xff]  }
 0x13e   :  { %8536 = vst [vmem:[#allocation15_spill] sm:$0xff] %v6885_v7  ;;  %v6890_v13 = vpop.eup %5963  ;;  %v726_v34 = vmul.f32 1.442695, %v515_v17  ;;  %5991 = vpow2.f32 %v724_v42  ;;  %v468_v1 = vsub.f32 %v6510_v8, %v6845_v45  ;;  %v728_v6 = vmul.f32 1.442695, %v516_v26  ;;  %5030 = vmatpush3.bf16.msra.mxu1 %v5646_v59 }
 0x13f   :  { %v837_v30 = vadd.f32 %v6855_v38, %v836_v41  ;;  %v6895_v51 = vpop.eup %5965  ;;  %v891_v55 = vadd.f32 %v6890_v13, %v890_v14  ;;  %v628_v41 = vmul.f32 1.442695, %v466_v62  ;;  %5993 = vpow2.f32 %v624_v40 }
 0x140   :  { %8537 = vst [vmem:[#allocation53_spill] sm:$0xff] %v6895_v51  ;;  %v6900_v32 = vpop.eup %5967  ;;  %v469_v12 = vsub.f32 %v6514_v10, %v6845_v45  ;;  %5995 = vpow2.f32 %v626_v60  ;;  %v630_v42 = vmul.f32 1.442695, %v467_v29  ;;  %v730_v53 = vmul.f32 1.442695, %v517_v61 }
 0x141   :  { %v838_v37 = vadd.f32 %v6865_v56, %v837_v30  ;;  %v6905_v52 = vpop.eup %5969  ;;  %v892_v17 = vadd.f32 %v6900_v32, %v891_v55  ;;  %v520_v30 = vsub.f32 %v6331_v57, %v6683_v15  ;;  %5997 = vpow2.f32 %v726_v34 }
 0x142   :  { %8538 = vst [vmem:[#allocation54_spill] sm:$0xff] %v6905_v52  ;;  %v6910_v8 = vpop.eup %5971  ;;  %v470_v14 = vsub.f32 %v6516_v27, %v6845_v45  ;;  %5999 = vpow2.f32 %v628_v41  ;;  %v632_v10 = vmul.f32 1.442695, %v468_v1  ;;  %v732_v57 = vmul.f32 1.442695, %v518_v25 }
 0x143   :  { %v839_v0 = vadd.f32 %v6875_v63, %v838_v37  ;;  %8539 = vst [vmem:[#allocation16_spill] sm:$0xff] %v6910_v8  ;;  %v6915_v26 = vpop.eup %5973  ;;  %v893_v40 = vadd.f32 %v6910_v8, %v892_v17  ;;  %v521_v37 = vsub.f32 %v6333_v58, %v6683_v15  ;;  %6001 = vpow2.f32 %v728_v6 }
 0x144   :  { %8540 = vst [vmem:[#allocation55_spill] sm:$0xff] %v6915_v26  ;;  %v6920_v60 = vpop.eup %5975  ;;  %v471_v55 = vsub.f32 %v6519_v31, %v6845_v45  ;;  %6003 = vpow2.f32 %v630_v42  ;;  %v634_v27 = vmul.f32 1.442695, %v469_v12  ;;  %v734_v58 = vmul.f32 1.442695, %v519_v35 }
 0x145   :  { %v840_v62 = vadd.f32 %v6885_v7, %v839_v0  ;;  %8541 = vst [vmem:[#allocation56_spill] sm:$0xff] %v6920_v60  ;;  %v6925_v34 = vpop.eup %5977  ;;  %v894_v61 = vadd.f32 %v6920_v60, %v893_v40  ;;  %v8544_v0 = vld [vmem:[#allocation35_spill] sm:$0xff]  ;;  %6005 = vpow2.f32 %v730_v53  ;;  %v636_v31 = vmul.f32 1.442695, %v470_v14 }
 0x146   :  { %8542 = vst [vmem:[#allocation17_spill] sm:$0xff] %v6925_v34  ;;  %v6930_v41 = vpop.eup %5979  ;;  %v522_v17 = vsub.f32 %v8544_v0, %v6683_v15  ;;  %6007 = vpow2.f32 %v632_v10  ;;  %v736_v0 = vmul.f32 1.442695, %v520_v30 }
 0x147   :  { %v841_v29 = vadd.f32 %v6895_v51, %v840_v62  ;;  %8543 = vst [vmem:[#allocation18_spill] sm:$0xff] %v6930_v41  ;;  %v6935_v6 = vpop.eup %5981  ;;  %v895_v25 = vadd.f32 %v6930_v41, %v894_v61  ;;  %v8546_v62 = vld [vmem:[#allocation98_spill] sm:$0xff]  ;;  %6009 = vpow2.f32 %v732_v57  ;;  %v8550_v61 = vld [vmem:[#allocation99_spill] sm:$0xff] }
 0x148   :  { %8545 = vst [vmem:[#allocation19_spill] sm:$0xff] %v6935_v6  ;;  %v472_v40 = vsub.f32 %v8546_v62, %v6845_v45  ;;  %v6940_v42 = vpop.eup %5983  ;;  %v473_v63 = vsub.f32 %v8550_v61, %v6845_v45  ;;  %6011 = vpow2.f32 %v634_v27  ;;  %v638_v62 = vmul.f32 1.442695, %v471_v55 }
 0x149   :  { %v842_v1 = vadd.f32 %v6905_v52, %v841_v29  ;;  %8547 = vst [vmem:[#allocation20_spill] sm:$0xff] %v6940_v42  ;;  %v8548_v29 = vld [vmem:[#allocation36_spill] sm:$0xff]  ;;  %v6945_v53 = vpop.eup %5985  ;;  %v896_v35 = vadd.f32 %v6940_v42, %v895_v25  ;;  %6013 = vpow2.f32 %v734_v58 }
 0x14a   :  { %v523_v51 = vsub.f32 %v8548_v29, %v6683_v15  ;;  %8549 = vst [vmem:[#allocation21_spill] sm:$0xff] %v6945_v53  ;;  %v6950_v10 = vpop.eup %5987  ;;  %v738_v29 = vmul.f32 1.442695, %v521_v37  ;;  %v8554_v25 = vld [vmem:[#allocation100_spill] sm:$0xff]  ;;  %6015 = vpow2.f32 %v636_v31  ;;  %v640_v61 = vmul.f32 1.442695, %v472_v40 }
 0x14b   :  { %v843_v12 = vadd.f32 %v6915_v26, %v842_v1  ;;  %8551 = vst [vmem:[#allocation22_spill] sm:$0xff] %v6950_v10  ;;  %v8552_v1 = vld [vmem:[#allocation37_spill] sm:$0xff]  ;;  %v6955_v57 = vpop.eup %5989  ;;  %v897_v30 = vadd.f32 %v6950_v10, %v896_v35  ;;  %v474_v52 = vsub.f32 %v8554_v25, %v6845_v45  ;;  %6017 = vpow2.f32 %v736_v0 }
 0x14c   :  { %v524_v26 = vsub.f32 %v8552_v1, %v6683_v15  ;;  %8553 = vst [vmem:[#allocation23_spill] sm:$0xff] %v6955_v57  ;;  %v6960_v27 = vpop.eup %5991  ;;  %v740_v1 = vmul.f32 1.442695, %v522_v17  ;;  %v8557_v35 = vld [vmem:[#allocation101_spill] sm:$0xff]  ;;  %6019 = vpow2.f32 %v638_v62  ;;  %v642_v25 = vmul.f32 1.442695, %v473_v63 }
 0x14d   :  { %v844_v14 = vadd.f32 %v6925_v34, %v843_v12  ;;  %8555 = vst [vmem:[#allocation24_spill] sm:$0xff] %v6960_v27  ;;  %v8556_v12 = vld [vmem:[#allocation38_spill] sm:$0xff]  ;;  %v6965_v58 = vpop.eup %5993  ;;  %v898_v37 = vadd.f32 %v6955_v57, %v897_v30  ;;  %v475_v7 = vsub.f32 %v8557_v35, %v6845_v45  ;;  %6021 = vpow2.f32 %v738_v29  ;;  %v8560_v63 = vld [vmem:[#allocation39_spill] sm:$0xff] }
 0x14e   :  { %v525_v34 = vsub.f32 %v8556_v12, %v6683_v15  ;;  %v6970_v31 = vpop.eup %5995  ;;  %6023 = vpow2.f32 %v640_v61  ;;  %v644_v30 = vmul.f32 1.442695, %v474_v52  ;;  %v8561_v29 = vld [vmem:[#allocation103_spill] sm:$0xff]  ;;  %v8599_v57 = vld [vmem:[#allocation110_spill] sm:$0xff] }
 0x14f   :  { %v845_v55 = vadd.f32 %v6935_v6, %v844_v14  ;;  %v742_v14 = vmul.f32 1.442695, %v523_v51  ;;  %v8558_v6 = vld [vmem:[#allocation102_spill] sm:$0xff]  ;;  %v6975_v0 = vpop.eup %5997  ;;  %v899_v17 = vadd.f32 %v6960_v27, %v898_v37  ;;  %v849_v35 = vadd.f32 %v6970_v31, %v6965_v58 }
 0x150   :  { %v476_v12 = vsub.f32 %v8558_v6, %v6845_v45  ;;  %8559 = vst [vmem:[#allocation25_spill] sm:$0xff] %v6975_v0  ;;  %v6980_v62 = vpop.eup %5999  ;;  %6025 = vpow2.f32 %v740_v1  ;;  %v744_v51 = vmul.f32 1.442695, %v524_v26  ;;  %v477_v6 = vsub.f32 %v8561_v29, %v6845_v45  ;;  %v8564_v26 = vld [vmem:[#allocation104_spill] sm:$0xff]  ;;  %v5648_v27 = vld [vmem:[#allocation5 + $0x20] sm:$0xff]  }
 0x151   :  { %v846_v40 = vadd.f32 %v6945_v53, %v845_v55  ;;  %v526_v55 = vsub.f32 %v8560_v63, %v6683_v15  ;;  %v6986_v53 = vpop.eup %6001  ;;  %v900_v37 = vadd.f32 %v6975_v0, %v899_v17  ;;  %6027 = vpow2.f32 %v642_v25 }
 0x152   :  { %8562 = vst [vmem:[#allocation26_spill] sm:$0xff] %v6986_v53  ;;  %v646_v52 = vmul.f32 1.442695, %v475_v7  ;;  %v850_v61 = vadd.f32 %v6980_v62, %v849_v35  ;;  %v6990_v38 = vpop.eup %6003  ;;  %6029 = vpow2.f32 %v742_v14  ;;  %v746_v63 = vmul.f32 1.442695, %v525_v34 }
 0x153   :  { %847 = vadd.xlane.f32.xlu0 %v846_v40  ;;  %v8563_v40 = vld [vmem:[#allocation40_spill] sm:$0xff]  ;;  %v478_v1 = vsub.f32 %v8564_v26, %v6845_v45  ;;  %v6996_v56 = vpop.eup %6005  ;;  %v901_v29 = vadd.f32 %v6986_v53, %v900_v37  ;;  %6031 = vpow2.f32 %v644_v30  ;;  %v648_v17 = vmul.f32 1.442695, %v476_v12 }
 0x154   :  { %v527_v47 = vsub.f32 %v8563_v40, %v6683_v15  ;;  %8565 = vst [vmem:[#allocation27_spill] sm:$0xff] %v6996_v56  ;;  %v851_v7 = vadd.f32 %v6990_v38, %v850_v61  ;;  %v7000_v25 = vpop.eup %6007  ;;  %6033 = vpow2.f32 %v744_v51  ;;  %v748_v35 = vmul.f32 1.442695, %v526_v55  ;;  %v7008_v40 = vpop.xlane.xlu1 %430 }
 0x155   :  { %v479_v15 = vsub.f32 %v6540_v49, %v6845_v45  ;;  %v480_v34 = vsub.f32 %v8464_v18, %v6845_v45  ;;  %v7006_v14 = vpop.eup %6009  ;;  %v902_v37 = vadd.f32 %v6996_v56, %v901_v29  ;;  %6035 = vpow2.f32 %v646_v52 }
 0x156   :  { %8566 = vst [vmem:[#allocation28_spill] sm:$0xff] %v7006_v14  ;;  %v650_v12 = vmul.f32 1.442695, %v477_v6  ;;  %v852_v30 = vadd.f32 %v7000_v25, %v851_v7  ;;  %v7012_v61 = vpop.eup %6011  ;;  %6037 = vpow2.f32 %v746_v63  ;;  %v750_v55 = vmul.f32 1.442695, %v527_v47  ;;  %v8568_v47 = vld [vmem:[#allocation66_spill] sm:$0xff] }
 0x157   :  { %v481_v49 = vsub.f32 %v8466_v23, %v6845_v45  ;;  %v482_v18 = vsub.f32 %v6547_v3, %v6845_v45  ;;  %v7018_v51 = vpop.eup %6013  ;;  %v903_v26 = vadd.f32 %v7006_v14, %v902_v37  ;;  %6039 = vpow2.f32 %v648_v17  ;;  %v8569_v23 = vld [vmem:[#allocation67_spill] sm:$0xff] }
 0x158   :  { %8567 = vst [vmem:[#allocation29_spill] sm:$0xff] %v7018_v51  ;;  %v652_v29 = vmul.f32 1.442695, %v478_v1  ;;  %v853_v6 = vadd.f32 %v7012_v61, %v852_v30  ;;  %v7022_v52 = vpop.eup %6015  ;;  %6041 = vpow2.f32 %v748_v35  ;;  %v654_v7 = vmul.f32 1.442695, %v479_v15  ;;  %v8571_v35 = vld [vmem:[#allocation68_spill] sm:$0xff] }
 0x159   :  { %v528_v63 = vsub.f32 %v8568_v47, %v7008_v40  ;;  %v529_v53 = vsub.f32 %v8569_v23, %v7008_v40  ;;  %v7028_v56 = vpop.eup %6017  ;;  %v904_v3 = vadd.f32 %v7018_v51, %v903_v26  ;;  %6043 = vpow2.f32 %v650_v12  ;;  %v8572_v47 = vld [vmem:[#allocation69_spill] sm:$0xff]  ;;  %v5647_v23 = vld [vmem:[#allocation5 + $0x60] sm:$0xff]  }
 0x15a   :  { %8570 = vst [vmem:[#allocation30_spill] sm:$0xff] %v7028_v56  ;;  %v656_v37 = vmul.f32 1.442695, %v480_v34  ;;  %v854_v1 = vadd.f32 %v7022_v52, %v853_v6  ;;  %v7032_v17 = vpop.eup %6019  ;;  %6045 = vpow2.f32 %v750_v55  ;;  %v658_v30 = vmul.f32 1.442695, %v481_v49  ;;  %v5649_v6 = vld [vmem:[#allocation5 + $0xe0] sm:$0xff]   ;;  %4991 = vmatprep.subr.bf16.mxu0 %v5647_v23 }
 0x15b   :  { %v530_v15 = vsub.f32 %v8571_v35, %v7008_v40  ;;  %v531_v14 = vsub.f32 %v8572_v47, %v7008_v40  ;;  %v7038_v10 = vpop.eup %6021  ;;  %v905_v12 = vadd.f32 %v7028_v56, %v904_v3  ;;  %6047 = vpow2.f32 %v652_v29  ;;  %v8574_v35 = vld [vmem:[#allocation70_spill] sm:$0xff]  ;;  %4992 = vmatpush3.bf16.msra.mxu0 %v5648_v27  ;;  %5031 = vmatprep.subr.bf16.mxu1 %v5649_v6 }
 0x15c   :  { %8573 = vst [vmem:[#allocation31_spill] sm:$0xff] %v7038_v10  ;;  %v660_v34 = vmul.f32 1.442695, %v482_v18  ;;  %v855_v26 = vadd.f32 %v7032_v17, %v854_v1  ;;  %v7042_v55 = vpop.eup %6023  ;;  %v483_v49 = vsub.f32 %v6549_v36, %v6845_v45  ;;  %6049 = vpow2.f32 %v654_v7  ;;  %v8576_v7 = vld [vmem:[#allocation71_spill] sm:$0xff] }
 0x15d   :  { %v532_v47 = vsub.f32 %v8574_v35, %v7008_v40  ;;  %v752_v51 = vmul.f32 1.442695, %v528_v63  ;;  %v7048_v0 = vpop.eup %6025  ;;  %v906_v29 = vadd.f32 %v7038_v10, %v905_v12  ;;  %6051 = vpow2.f32 %v656_v37 }
 0x15e   :  { %8575 = vst [vmem:[#allocation32_spill] sm:$0xff] %v7048_v0  ;;  %v856_v18 = vadd.f32 %v7042_v55, %v855_v26  ;;  %v754_v3 = vmul.f32 1.442695, %v529_v53  ;;  %v7052_v1 = vpop.eup %6027  ;;  %v484_v36 = vsub.f32 %v6553_v5, %v6845_v45  ;;  %6053 = vpow2.f32 %v658_v30 }
 0x15f   :  { %v533_v59 = vsub.f32 %v8576_v7, %v7008_v40  ;;  %v756_v63 = vmul.f32 1.442695, %v530_v15  ;;  %v7058_v23 = vpop.eup %6029  ;;  %v907_v12 = vadd.f32 %v7048_v0, %v906_v29  ;;  %6055 = vpow2.f32 %v660_v34 }
 0x160   :  { %8577 = vst [vmem:[#allocation33_spill] sm:$0xff] %v7058_v23  ;;  %v857_v37 = vadd.f32 %v7052_v1, %v856_v18  ;;  %v758_v53 = vmul.f32 1.442695, %v531_v14  ;;  %v7062_v27 = vpop.eup %6031  ;;  %v485_v26 = vsub.f32 %v6555_v4, %v6845_v45  ;;  %v662_v6 = vmul.f32 1.442695, %v483_v49  ;;  %v8579_v18 = vld [vmem:[#allocation72_spill] sm:$0xff] }
 0x161   :  { %6057 = vpow2.f32 %v752_v51  ;;  %v7066_v5 = vpop.eup %6033  ;;  %v908_v30 = vadd.f32 %v7058_v23, %v907_v12  ;;  %v760_v35 = vmul.f32 1.442695, %v532_v47  ;;  %v486_v14 = vsub.f32 %v6558_v28, %v6845_v45  ;;  %v8582_v28 = vld [vmem:[#allocation73_spill] sm:$0xff] }
 0x162   :  { %8578 = vst [vmem:[#allocation34_spill] sm:$0xff] %v7066_v5  ;;  %v858_v15 = vadd.f32 %v7062_v27, %v857_v37  ;;  %6059 = vpow2.f32 %v754_v3  ;;  %v7070_v29 = vpop.eup %6035  ;;  %v664_v34 = vmul.f32 1.442695, %v484_v36  ;;  %v534_v7 = vsub.f32 %v8579_v18, %v7008_v40 }
 0x163   :  { %6061 = vpow2.f32 %v756_v63  ;;  %v7076_v4 = vpop.eup %6037  ;;  %v909_v51 = vadd.f32 %v7066_v5, %v908_v30  ;;  %v762_v12 = vmul.f32 1.442695, %v533_v59  ;;  %v487_v47 = vsub.f32 %v6560_v2, %v6845_v45  ;;  %v8584_v2 = vld [vmem:[#allocation74_spill] sm:$0xff] }
 0x164   :  { %8580 = vst [vmem:[#allocation35_spill] sm:$0xff] %v7076_v4  ;;  %v859_v49 = vadd.f32 %v7070_v29, %v858_v15  ;;  %6063 = vpow2.f32 %v758_v53  ;;  %v7080_v3 = vpop.eup %6039  ;;  %v535_v36 = vsub.f32 %v8582_v28, %v7008_v40  ;;  %v666_v18 = vmul.f32 1.442695, %v485_v26 }
 0x165   :  { %8581 = vst [vmem:[#allocation98_spill] sm:$0xff] %v7080_v3  ;;  %6065 = vpow2.f32 %v662_v6  ;;  %v7086_v37 = vpop.eup %6041  ;;  %v910_v63 = vadd.f32 %v7076_v4, %v909_v51  ;;  %v488_v59 = vsub.f32 %v6562_v54, %v6845_v45  ;;  %v668_v53 = vmul.f32 1.442695, %v486_v14  ;;  %v8587_v54 = vld [vmem:[#allocation75_spill] sm:$0xff] }
 0x166   :  { %8583 = vst [vmem:[#allocation36_spill] sm:$0xff] %v7086_v37  ;;  %v860_v30 = vadd.f32 %v7080_v3, %v859_v49  ;;  %6067 = vpow2.f32 %v760_v35  ;;  %v7090_v15 = vpop.eup %6043  ;;  %v536_v6 = vsub.f32 %v8584_v2, %v7008_v40  ;;  %v764_v26 = vmul.f32 1.442695, %v534_v7 }
 0x167   :  { %6069 = vpow2.f32 %v664_v34  ;;  %v7096_v5 = vpop.eup %6045  ;;  %v911_v28 = vadd.f32 %v7086_v37, %v910_v63  ;;  %v489_v35 = vsub.f32 %v6566_v24, %v6845_v45  ;;  %v670_v4 = vmul.f32 1.442695, %v487_v47 }
 0x168   :  { %8585 = vst [vmem:[#allocation99_spill] sm:$0xff] %v7096_v5  ;;  %v861_v51 = vadd.f32 %v7090_v15, %v860_v30  ;;  %6071 = vpow2.f32 %v762_v12  ;;  %v7100_v49 = vpop.eup %6047  ;;  %v537_v14 = vsub.f32 %v8587_v54, %v7008_v40  ;;  %v766_v37 = vmul.f32 1.442695, %v535_v36  ;;  %v8590_v54 = vld [vmem:[#allocation76_spill] sm:$0xff]  ;;  %v8592_v36 = vld [vmem:[#allocation107_spill] sm:$0xff] }
 0x169   :  { %8586 = vst [vmem:[#allocation37_spill] sm:$0xff] %v7100_v49  ;;  %v7106_v34 = vpop.eup %6049  ;;  %v912_v2 = vadd.f32 %v7096_v5, %v911_v28  ;;  %6073 = vpow2.f32 %v666_v18  ;;  %v490_v7 = vsub.f32 %v6568_v19, %v6845_v45  ;;  %v672_v12 = vmul.f32 1.442695, %v488_v59 }
 0x16a   :  { %v862_v63 = vadd.f32 %v7100_v49, %v861_v51  ;;  %v7110_v30 = vpop.eup %6051  ;;  %6075 = vpow2.f32 %v668_v53  ;;  %v538_v0 = vsub.f32 %v8590_v54, %v7008_v40  ;;  %v768_v18 = vmul.f32 1.442695, %v536_v6  ;;  %v8593_v53 = vld [vmem:[#allocation77_spill] sm:$0xff]  ;;  %v8594_v6 = vld [vmem:[#allocation108_spill] sm:$0xff] }
 0x16b   :  { %8588 = vst [vmem:[#allocation100_spill] sm:$0xff] %v7110_v30  ;;  %v7114_v24 = vpop.eup %6053  ;;  %913 = vadd.xlane.f32.xlu0 %v912_v2  ;;  %6077 = vpow2.f32 %v764_v26  ;;  %v491_v51 = vsub.f32 %v8592_v36, %v6845_v45  ;;  %v674_v5 = vmul.f32 1.442695, %v489_v35  ;;  %v539_v2 = vsub.f32 %v8593_v53, %v7008_v40  ;;  %v8595_v36 = vld [vmem:[#allocation78_spill] sm:$0xff]  ;;  %v8596_v53 = vld [vmem:[#allocation109_spill] sm:$0xff] }
 0x16c   :  { %8589 = vst [vmem:[#allocation38_spill] sm:$0xff] %v7114_v24  ;;  %v863_v47 = vadd.f32 %v7106_v34, %v862_v63  ;;  %v7119_v28 = vpop.eup %6055  ;;  %6079 = vpow2.f32 %v670_v4  ;;  %v770_v63 = vmul.f32 1.442695, %v537_v14  ;;  %v492_v26 = vsub.f32 %v8594_v6, %v6845_v45 }
 0x16d   :  { %8591 = vst [vmem:[#allocation101_spill] sm:$0xff] %v7119_v28  ;;  %6081 = vpow2.f32 %v766_v37  ;;  %v676_v54 = vmul.f32 1.442695, %v490_v7  ;;  %v540_v4 = vsub.f32 %v8595_v36, %v7008_v40  ;;  %v493_v10 = vsub.f32 %v8596_v53, %v6845_v45  ;;  %v8597_v7 = vld [vmem:[#allocation79_spill] sm:$0xff] }
 0x16e   :  { %v7123_v19 = vpop.eup %6057  ;;  %v864_v59 = vadd.f32 %v7110_v30, %v863_v47  ;;  %6083 = vpow2.f32 %v672_v12  ;;  %v772_v47 = vmul.f32 1.442695, %v538_v0  ;;  %v678_v12 = vmul.f32 1.442695, %v491_v51 }
 0x16f   :  { %v7128_v56 = vpop.eup %6059  ;;  %6085 = vpow2.f32 %v768_v18  ;;  %v541_v6 = vsub.f32 %v8597_v7, %v7008_v40  ;;  %v774_v18 = vmul.f32 1.442695, %v539_v2  ;;  %v494_v30 = vsub.f32 %v8599_v57, %v6845_v45 }
 0x170   :  { %v7134_v35 = vpop.eup %6061  ;;  %v865_v23 = vadd.f32 %v7114_v24, %v864_v59  ;;  %v915_v37 = vadd.f32 %v7128_v56, %v7123_v19  ;;  %6087 = vpow2.f32 %v674_v5  ;;  %v680_v53 = vmul.f32 1.442695, %v492_v26  ;;  %v8600_v5 = vld [vmem:[#allocation80_spill] sm:$0xff]  ;;  %v8603_v26 = vld [vmem:[#allocation81_spill] sm:$0xff] }
 0x171   :  { %v7139_v14 = vpop.eup %6063  ;;  %6089 = vpow2.f32 %v770_v63  ;;  %v542_v51 = vsub.f32 %v8600_v5, %v7008_v40  ;;  %v682_v57 = vmul.f32 1.442695, %v493_v10  ;;  %v778_v24 = vmul.f32 1.442695, %v541_v6 }
 0x172   :  { %v7145_v36 = vpop.eup %6065  ;;  %v866_v39 = vadd.f32 %v7119_v28, %v865_v23  ;;  %v916_v0 = vadd.f32 %v7134_v35, %v915_v37  ;;  %6091 = vpow2.f32 %v676_v54  ;;  %v776_v23 = vmul.f32 1.442695, %v540_v4  ;;  %v8602_v37 = vld [vmem:[#allocation111_spill] sm:$0xff] }
 0x173   :  { %8598 = vst [vmem:[#allocation102_spill] sm:$0xff] %v7145_v36  ;;  %v7149_v59 = vpop.eup %6067  ;;  %6093 = vpow2.f32 %v772_v47  ;;  %v495_v28 = vsub.f32 %v8602_v37, %v6845_v45  ;;  %v543_v54 = vsub.f32 %v8603_v26, %v7008_v40  ;;  %v684_v4 = vmul.f32 1.442695, %v494_v30 }
 0x174   :  { %v7155_v11 = vpop.eup %6069  ;;  %v867_v7 = vadd.f32 %v7145_v36, %v866_v39  ;;  %v917_v2 = vadd.f32 %v7139_v14, %v916_v0  ;;  %6095 = vpow2.f32 %v678_v12  ;;  %v8605_v0 = vld [vmem:[#allocation82_spill] sm:$0xff]  ;;  %v780_v10 = vmul.f32 1.442695, %v542_v51  ;;  %v8609_v51 = vld [vmem:[#allocation84_spill] sm:$0xff] }
 0x175   :  { %8601 = vst [vmem:[#allocation39_spill] sm:$0xff] %v7155_v11  ;;  %v7159_v63 = vpop.eup %6071  ;;  %6097 = vpow2.f32 %v774_v18  ;;  %v544_v36 = vsub.f32 %v8605_v0, %v7008_v40  ;;  %v686_v6 = vmul.f32 1.442695, %v495_v28  ;;  %v8607_v18 = vld [vmem:[#allocation83_spill] sm:$0xff]  ;;  %v782_v37 = vmul.f32 1.442695, %v543_v54 }
 0x176   :  { %v868_v5 = vadd.f32 %v7155_v11, %v867_v7  ;;  %v918_v39 = vadd.f32 %v7149_v59, %v917_v2  ;;  %v7167_v47 = vpop.eup %6073  ;;  %6099 = vpow2.f32 %v680_v53  ;;  %v545_v2 = vsub.f32 %v8607_v18, %v7008_v40 }
 0x177   :  { %8604 = vst [vmem:[#allocation103_spill] sm:$0xff] %v7167_v47  ;;  %v7171_v41 = vpop.eup %6075  ;;  %6101 = vpow2.f32 %v776_v23  ;;  %v546_v23 = vsub.f32 %v8609_v51, %v7008_v40 }
 0x178   :  { %8606 = vst [vmem:[#allocation40_spill] sm:$0xff] %v7171_v41  ;;  %v869_v45 = vadd.f32 %v7167_v47, %v868_v5  ;;  %v919_v12 = vadd.f32 %v7159_v63, %v918_v39  ;;  %v7175_v7 = vpop.eup %6077  ;;  %6103 = vpow2.f32 %v682_v57  ;;  %v784_v57 = vmul.f32 1.442695, %v544_v36  ;;  %v8613_v36 = vld [vmem:[#allocation86_spill] sm:$0xff] }
 0x179   :  { %v7179_v53 = vpop.eup %6079  ;;  %6105 = vpow2.f32 %v778_v24  ;;  %v8611_v24 = vld [vmem:[#allocation85_spill] sm:$0xff] }
 0x17a   :  { %8608 = vst [vmem:[#allocation104_spill] sm:$0xff] %v7179_v53  ;;  %v870_v30 = vadd.f32 %v7171_v41, %v869_v45  ;;  %v920_v26 = vadd.f32 %v7175_v7, %v919_v12  ;;  %v7183_v5 = vpop.eup %6081  ;;  %6107 = vpow2.f32 %v684_v4  ;;  %v547_v54 = vsub.f32 %v8611_v24, %v7008_v40 }
 0x17b   :  { %v7187_v39 = vpop.eup %6083  ;;  %6109 = vpow2.f32 %v780_v10  ;;  %v786_v12 = vmul.f32 1.442695, %v545_v2  ;;  %v548_v10 = vsub.f32 %v8613_v36, %v7008_v40 }
 0x17c   :  { %8610 = vst [vmem:[#allocation66_spill] sm:$0xff] %v7187_v39  ;;  %v871_v28 = vadd.f32 %v7179_v53, %v870_v30  ;;  %v921_v0 = vadd.f32 %v7183_v5, %v920_v26  ;;  %v7191_v18 = vpop.eup %6085  ;;  %6111 = vpow2.f32 %v686_v6  ;;  %v788_v26 = vmul.f32 1.442695, %v546_v23 }
 0x17d   :  { %v7195_v45 = vpop.eup %6087  ;;  %6113 = vpow2.f32 %v782_v37  ;;  %v8615_v37 = vld [vmem:[#allocation87_spill] sm:$0xff] }
 0x17e   :  { %8612 = vst [vmem:[#allocation67_spill] sm:$0xff] %v7195_v45  ;;  %v872_v4 = vadd.f32 %v7187_v39, %v871_v28  ;;  %v922_v51 = vadd.f32 %v7191_v18, %v921_v0  ;;  %v7199_v41 = vpop.eup %6089  ;;  %6115 = vpow2.f32 %v784_v57  ;;  %v549_v2 = vsub.f32 %v8615_v37, %v7008_v40  ;;  %v8617_v57 = vld [vmem:[#allocation88_spill] sm:$0xff] }
 0x17f   :  { %v7203_v30 = vpop.eup %6091  ;;  %6117 = vpow2.f32 %v786_v12  ;;  %v790_v39 = vmul.f32 1.442695, %v547_v54  ;;  %v550_v23 = vsub.f32 %v8617_v57, %v7008_v40  ;;  %v8620_v12 = vld [vmem:[#allocation89_spill] sm:$0xff] }
 0x180   :  { %8614 = vst [vmem:[#allocation68_spill] sm:$0xff] %v7203_v30  ;;  %v873_v6 = vadd.f32 %v7195_v45, %v872_v4  ;;  %v923_v24 = vadd.f32 %v7199_v41, %v922_v51  ;;  %v7207_v11 = vpop.eup %6093  ;;  %6119 = vpow2.f32 %v788_v26  ;;  %v792_v45 = vmul.f32 1.442695, %v548_v10  ;;  %v8623_v26 = vld [vmem:[#allocation90_spill] sm:$0xff] }
 0x181   :  { %v7211_v28 = vpop.eup %6095  ;;  %v551_v54 = vsub.f32 %v8620_v12, %v7008_v40  ;;  %6121 = vpow2.f32 %v790_v39  ;;  %v552_v10 = vsub.f32 %v8623_v26, %v7008_v40  ;;  %v8626_v39 = vld [vmem:[#allocation91_spill] sm:$0xff] }
 0x182   :  { %8616 = vst [vmem:[#allocation69_spill] sm:$0xff] %v7211_v28  ;;  %v874_v0 = vadd.f32 %v7203_v30, %v873_v6  ;;  %v924_v36 = vadd.f32 %v7207_v11, %v923_v24  ;;  %v7215_v53 = vpop.eup %6097  ;;  %v794_v30 = vmul.f32 1.442695, %v549_v2  ;;  %6123 = vpow2.f32 %v792_v45  ;;  %v8629_v45 = vld [vmem:[#allocation92_spill] sm:$0xff] }
 0x183   :  { %v7219_v4 = vpop.eup %6099  ;;  %v553_v2 = vsub.f32 %v8626_v39, %v7008_v40 }
 0x184   :  { %8618 = vst [vmem:[#allocation70_spill] sm:$0xff] %v7219_v4  ;;  %v875_v51 = vadd.f32 %v7211_v28, %v874_v0  ;;  %v925_v37 = vadd.f32 %v7215_v53, %v924_v36  ;;  %v7223_v47 = vpop.eup %6101  ;;  %v796_v28 = vmul.f32 1.442695, %v550_v23  ;;  %6125 = vpow2.f32 %v794_v30 }
 0x185   :  { %8619 = vst [vmem:[#allocation71_spill] sm:$0xff] %v7223_v47  ;;  %v7227_v6 = vpop.eup %6103  ;;  %v554_v23 = vsub.f32 %v8629_v45, %v7008_v40  ;;  %v8633_v45 = vld [vmem:[#allocation94_spill] sm:$0xff] }
 0x186   :  { %8621 = vst [vmem:[#allocation72_spill] sm:$0xff] %v7227_v6  ;;  %v876_v24 = vadd.f32 %v7219_v4, %v875_v51  ;;  %v926_v57 = vadd.f32 %v7223_v47, %v925_v37  ;;  %v7231_v8 = vpop.eup %6105  ;;  %v798_v4 = vmul.f32 1.442695, %v551_v54  ;;  %6127 = vpow2.f32 %v796_v28 }
 0x187   :  { %8622 = vst [vmem:[#allocation73_spill] sm:$0xff] %v7231_v8  ;;  %v7235_v0 = vpop.eup %6107  ;;  %v802_v54 = vmul.f32 1.442695, %v553_v2  ;;  %v804_v28 = vmul.f32 1.442695, %v554_v23 }
 0x188   :  { %8624 = vst [vmem:[#allocation74_spill] sm:$0xff] %v7235_v0  ;;  %v877_v36 = vadd.f32 %v7227_v6, %v876_v24  ;;  %v927_v12 = vadd.f32 %v7231_v8, %v926_v57  ;;  %v7239_v42 = vpop.eup %6109  ;;  %v800_v57 = vmul.f32 1.442695, %v552_v10  ;;  %6129 = vpow2.f32 %v798_v4 }
 0x189   :  { %8625 = vst [vmem:[#allocation75_spill] sm:$0xff] %v7239_v42  ;;  %v7243_v51 = vpop.eup %6111 }
 0x18a   :  { %8627 = vst [vmem:[#allocation76_spill] sm:$0xff] %v7243_v51  ;;  %v878_v37 = vadd.f32 %v7235_v0, %v877_v36  ;;  %v928_v26 = vadd.f32 %v7239_v42, %v927_v12  ;;  %v7247_v47 = vpop.eup %6113  ;;  %v8631_v36 = vld [vmem:[#allocation93_spill] sm:$0xff]  ;;  %v556_v42 = vsub.f32 %v8633_v45, %v7008_v40  ;;  %6131 = vpow2.f32 %v800_v57 }
 0x18b   :  { %8628 = vst [vmem:[#allocation107_spill] sm:$0xff] %v7247_v47  ;;  %v7253_v39 = vpop.eup %6115  ;;  %v555_v30 = vsub.f32 %v8631_v36, %v7008_v40  ;;  %6133 = vpow2.f32 %v802_v54 }
 0x18c   :  { %v879_v24 = vadd.f32 %v7243_v51, %v878_v37  ;;  %v929_v6 = vadd.f32 %v7247_v47, %v928_v26  ;;  %8630 = vst [vmem:[#allocation77_spill] sm:$0xff] %v7253_v39  ;;  %v7258_v0 = vpop.eup %6117  ;;  %v8635_v26 = vld [vmem:[#allocation95_spill] sm:$0xff]  ;;  %6135 = vpow2.f32 %v804_v28  ;;  %v808_v45 = vmul.f32 1.442695, %v556_v42  ;;  %v5651_v28 = vld [vmem:[#allocation5 + $0x58] sm:$0xff]   ;;  %v5695_v47 = vld [vmem:[#allocation5 + $0x140] sm:$0xff]  }
 0x18d   :  { %8632 = vst [vmem:[#allocation108_spill] sm:$0xff] %v7258_v0  ;;  %v7263_v37 = vpop.eup %6119  ;;  %v806_v36 = vmul.f32 1.442695, %v555_v30  ;;  %v5652_v42 = vld [vmem:[#allocation5 + $0x18] sm:$0xff]   ;;  %4993 = vmatprep.subr.bf16.mxu0 %v5651_v28 }
 0x18e   :  { %880 = vadd.xlane.f32.xlu1 %v879_v24  ;;  %v930_v12 = vadd.f32 %v7253_v39, %v929_v6  ;;  %8634 = vst [vmem:[#allocation78_spill] sm:$0xff] %v7263_v37  ;;  %v557_v24 = vsub.f32 %v8635_v26, %v7008_v40  ;;  %v7268_v2 = vpop.eup %6121  ;;  %v8637_v6 = vld [vmem:[#allocation96_spill] sm:$0xff]  ;;  %4994 = vmatpush3.bf16.msra.mxu0 %v5652_v42 }
 0x18f   :  { %8636 = vst [vmem:[#allocation109_spill] sm:$0xff] %v7268_v2  ;;  %v558_v51 = vsub.f32 %v8637_v6, %v7008_v40  ;;  %v7273_v57 = vpop.eup %6123  ;;  %6137 = vpow2.f32 %v806_v36  ;;  %v5650_v6 = vld [vmem:[#allocation5 + $0xa0] sm:$0xff]  }
 0x190   :  { %v931_v10 = vadd.f32 %v7258_v0, %v930_v12  ;;  %8638 = vst [vmem:[#allocation79_spill] sm:$0xff] %v7273_v57  ;;  %v8639_v12 = vld [vmem:[#allocation97_spill] sm:$0xff]  ;;  %v810_v26 = vmul.f32 1.442695, %v557_v24  ;;  %6139 = vpow2.f32 %v808_v45  ;;  %5032 = vmatpush3.bf16.msra.mxu1 %v5650_v6 }
 0x191   :  { %v559_v39 = vsub.f32 %v8639_v12, %v7008_v40  ;;  %v7278_v54 = vpop.eup %6125 }
 0x192   :  { %v932_v4 = vadd.f32 %v7263_v37, %v931_v10  ;;  %8640 = vst [vmem:[#allocation110_spill] sm:$0xff] %v7278_v54  ;;  %v812_v10 = vmul.f32 1.442695, %v558_v51  ;;  %6141 = vpow2.f32 %v810_v26 }
 0x193   :  { %v7281_v0 = vpop.eup %6127 }
 0x194   :  { %v933_v23 = vadd.f32 %v7268_v2, %v932_v4  ;;  %8641 = vst [vmem:[#allocation80_spill] sm:$0xff] %v7281_v0  ;;  %v5653_v4 = vld [vmem:[#allocation5 + $0xd8] sm:$0xff]   ;;  %v814_v2 = vmul.f32 1.442695, %v559_v39  ;;  %6143 = vpow2.f32 %v812_v10 }
 0x195   :  { %v7284_v24 = vpop.eup %6129  ;;  %5033 = vmatprep.subr.bf16.mxu1 %v5653_v4 }
 0x196   :  { %v934_v30 = vadd.f32 %v7273_v57, %v933_v23  ;;  %8642 = vst [vmem:[#allocation111_spill] sm:$0xff] %v7284_v24  ;;  %6145 = vpow2.f32 %v814_v2  ;;  %v5676_v57 = vld [vmem:[#allocation5 + $0x128] sm:$0xff]  }
 0x197   :  { %v7287_v36 = vpop.eup %6131 }
 0x198   :  { %v935_v37 = vadd.f32 %v7278_v54, %v934_v30  ;;  %8643 = vst [vmem:[#allocation81_spill] sm:$0xff] %v7287_v36  ;;  %v7290_v23 = vpop.eup %6133  ;;  %v5679_v54 = vld [vmem:[#allocation5 + $0x160] sm:$0xff]  }
 0x199   :  { %8644 = vst [vmem:[#allocation82_spill] sm:$0xff] %v7290_v23  ;;  %v7293_v12 = vpop.eup %6135 }
 0x19a   :  { %v936_v40 = vadd.f32 %v7281_v0, %v935_v37  ;;  %8645 = vst [vmem:[#allocation83_spill] sm:$0xff] %v7293_v12 }
 0x19c   :  { %v937_v51 = vadd.f32 %v7284_v24, %v936_v40  ;;  %v7296_v26 = vpop.eup %6137  ;;  %v5678_v24 = vld [vmem:[#allocation5 + $0x1a8] sm:$0xff]  }
 0x19d   :  { %8646 = vst [vmem:[#allocation84_spill] sm:$0xff] %v7296_v26  ;;  %v7299_v10 = vpop.eup %6139 }
 0x19e   :  { %v938_v45 = vadd.f32 %v7287_v36, %v937_v51  ;;  %8647 = vst [vmem:[#allocation85_spill] sm:$0xff] %v7299_v10  ;;  %v5659_v36 = vld [vmem:[#allocation5 + $0x48] sm:$0xff]  }
 0x19f   :  { %v7302_v28 = vpop.eup %6141 }
 0x1a0   :  { %v939_v39 = vadd.f32 %v7290_v23, %v938_v45  ;;  %8648 = vst [vmem:[#allocation86_spill] sm:$0xff] %v7302_v28  ;;  %v5654_v45 = vld [vmem:[#allocation5 + $0x98] sm:$0xff]   ;;  %v5677_v23 = vld [vmem:[#allocation5 + $0x1e8] sm:$0xff]  }
 0x1a1   :  { %v7305_v42 = vpop.eup %6143  ;;  %5034 = vmatpush3.bf16.msra.mxu1 %v5654_v45  ;;  %v5669_v45 = vld [vmem:[#allocation5 + $0x1f8] sm:$0xff]  }
 0x1a2   :  { %v940_v37 = vadd.f32 %v7293_v12, %v939_v39  ;;  %8649 = vst [vmem:[#allocation87_spill] sm:$0xff] %v7305_v42  ;;  %v5655_v39 = vld [vmem:[#allocation5 + $0x50] sm:$0xff]  }
 0x1a3   :  { %v7308_v40 = vpop.eup %6145  ;;  %v5657_v12 = vld [vmem:[#allocation5 + $0xd0] sm:$0xff]   ;;  %4995 = vmatprep.subr.bf16.mxu0 %v5655_v39 }
 0x1a4   :  { %v941_v30 = vadd.f32 %v7296_v26, %v940_v37  ;;  %8650 = vst [vmem:[#allocation88_spill] sm:$0xff] %v7308_v40  ;;  %v5656_v37 = vld [vmem:[#allocation5 + $0x10] sm:$0xff]   ;;  %5035 = vmatprep.subr.bf16.mxu1 %v5657_v12  ;;  %v5675_v26 = vld [vmem:[#allocation5 + $0x168] sm:$0xff]  }
 0x1a5   :  { %4996 = vmatpush3.bf16.msra.mxu0 %v5656_v37 }
 0x1a6   :  { %v942_v6 = vadd.f32 %v7299_v10, %v941_v30  ;;  %v5658_v30 = vld [vmem:[#allocation5 + $0x90] sm:$0xff]   ;;  %v5661_v10 = vld [vmem:[#allocation5 + $0xc8] sm:$0xff]   ;;  %4997 = vmatprep.subr.bf16.mxu0 %v5659_v36 }
 0x1a7   :  { %5036 = vmatpush3.bf16.msra.mxu1 %v5658_v30 }
 0x1a8   :  { %v943_v2 = vadd.f32 %v7302_v28, %v942_v6  ;;  %v5660_v6 = vld [vmem:[#allocation5 + $0x8] sm:$0xff]   ;;  %v5663_v28 = vld [vmem:[#allocation5 + $0x40] sm:$0xff]   ;;  %5037 = vmatprep.subr.bf16.mxu1 %v5661_v10 }
 0x1a9   :  { %4998 = vmatpush3.bf16.msra.mxu0 %v5660_v6  ;;  %v8651_v10 = vld [vmem:[#allocation58_spill] sm:$0xff] }
 0x1aa   :  { %v944_v4 = vadd.f32 %v7305_v42, %v943_v2  ;;  %v5662_v2 = vld [vmem:[#allocation5 + $0x88] sm:$0xff]   ;;  %4999 = vmatprep.subr.bf16.mxu0 %v5663_v28  ;;  %v5667_v42 = vld [vmem:[#allocation5 + $0x178] sm:$0xff]  }
 0x1ab   :  { %5038 = vmatpush3.bf16.msra.mxu1 %v5662_v2 }
 0x1ac   :  { %v945_v51 = vadd.f32 %v7308_v40, %v944_v4  ;;  %v5664_v4 = vld [vmem:[#allocation5] sm:$0xff]  }
 0x1ad   :  { %v5666_v40 = vld [vmem:[#allocation5 + $0x80] sm:$0xff]   ;;  %5000 = vmatpush3.bf16.msra.mxu0 %v5664_v4  ;;  %v8652_v4 = vld [vmem:[#allocation57_spill] sm:$0xff] }
 0x1ae   :  { %946 = vadd.xlane.f32.xlu1 %v945_v51  ;;  %v5665_v51 = vld [vmem:[#allocation5 + $0xc0] sm:$0xff]   ;;  %5065 = vmatprep.subr.bf16.mxu0 %v5667_v42 }
 0x1af   :  { %5039 = vmatprep.subr.bf16.mxu1 %v5665_v51 }
 0x1b0   :  { %5040 = vmatpush3.bf16.msra.mxu1 %v5666_v40 }
 0x1b1   :  { %5105 = vmatprep.subr.bf16.mxu1 %v5669_v45  ;;  %v5670_v45 = vld [vmem:[#allocation5 + $0x1b8] sm:$0xff]  }
 0x1dc   :  { %v848_v12 = vpop.xlane.xlu0 %847 }
 0x1dd   :  { %6147 = vrcp.f32 %v848_v12 }
 0x1ea   :  { %v7311_v39 = vpop.eup %6147 }
 0x1eb   :  { %v7317_v28 = vmul.f32 %v7311_v39, %v8651_v10  ;;  %v7321_v30 = vmul.f32 %v7311_v39, %v6708_v21  ;;  %v7341_v21 = vmul.f32 %v7311_v39, %v8652_v4  ;;  %v5673_v10 = vld [vmem:[#allocation5 + $0x1f0] sm:$0xff]  }
 0x1ec   :  { %v5674_v4 = vld [vmem:[#allocation5 + $0x1b0] sm:$0xff]  }
 0x1f4   :  { %v914_v0 = vpop.xlane.xlu0 %913 }
 0x217   :  { %v881_v36 = vpop.xlane.xlu1 %880 }
 0x218   :  { %6149 = vrcp.f32 %v881_v36  ;;  %v5671_v36 = vld [vmem:[#allocation5 + $0x170] sm:$0xff]  }
 0x219   :  { %6151 = vrcp.f32 %v914_v0  ;;  %v1081_v0 = vmax.f32 %v7317_v28, 0.2 }
 0x225   :  { %v7313_v37 = vpop.eup %6149 }
 0x226   :  { %v7325_v42 = vmul.f32 %v7313_v37, %v6970_v31  ;;  %v7329_v40 = vmul.f32 %v7313_v37, %v6990_v38  ;;  %v7333_v6 = vmul.f32 %v7313_v37, %v6965_v58  ;;  %v7337_v2 = vmul.f32 %v7313_v37, %v6980_v62  ;;  %v5668_v58 = vld [vmem:[#allocation5 + $0x138] sm:$0xff]  }
 0x227   :  { %v7345_v31 = vmul.f32 %v7311_v39, %v6703_v16  ;;  %v5672_v16 = vld [vmem:[#allocation5 + $0x130] sm:$0xff]  }
 0x228   :  { %v1465_v38 = vpack.c.bf16 %v7325_v42, %v7317_v28  ;;  %v1467_v51 = vpack.c.bf16 %v7329_v40, %v7321_v30  ;;  %v1464_v62 = vpack.c.bf16 %v7333_v6, %v7341_v21  ;;  %v5694_v28 = vld [vmem:[#allocation5 + $0x188] sm:$0xff]  }
 0x229   :  { %v1466_v12 = vpack.c.bf16 %v7337_v2, %v7345_v31 }
 0x22a   :  { %3672 = vmatprep.mubr.bf16.mxu0 %v1465_v38  ;;  %3737 = vmatprep.mubr.bf16.mxu1 %v1467_v51  ;;  %v5681_v38 = vld [vmem:[#allocation5 + $0x1e0] sm:$0xff]  }
 0x22b   :  { %3673 = vmatmul.mubr.bf16.vlgmr.msra.gmra.mxu0 %v1464_v62  ;;  %3738 = vmatmul.mubr.bf16.vlgmr.msra.gmra.mxu1 %v1466_v12  ;;  %v5680_v51 = vld [vmem:[#allocation5 + $0x120] sm:$0xff]   ;;  %v5685_v62 = vld [vmem:[#allocation5 + $0x1d8] sm:$0xff]  }
 0x22c   :  { %5066 = vmatpush3.bf16.msra.mxu0 %v5668_v58  ;;  %5106 = vmatpush3.bf16.msra.mxu1 %v5670_v45  ;;  %v5682_v58 = vld [vmem:[#allocation5 + $0x1a0] sm:$0xff]   ;;  %v5683_v45 = vld [vmem:[#allocation5 + $0x158] sm:$0xff]  }
 0x22d   :  { %5067 = vmatprep.subr.bf16.mxu0 %v5671_v36  ;;  %5107 = vmatprep.subr.bf16.mxu1 %v5673_v10  ;;  %v5684_v36 = vld [vmem:[#allocation5 + $0x118] sm:$0xff]  }
 0x22e   :  { %v5686_v10 = vld [vmem:[#allocation5 + $0x198] sm:$0xff]  }
 0x230   :  { %5068 = vmatpush3.bf16.msra.mxu0 %v5672_v16  ;;  %5108 = vmatpush3.bf16.msra.mxu1 %v5674_v4  ;;  %v5688_v16 = vld [vmem:[#allocation5 + $0x110] sm:$0xff]   ;;  %v1113_v4 = vmax.f32 %v7325_v42, 0.2  ;;  %v5697_v42 = vld [vmem:[#allocation5 + $0x1c0] sm:$0xff]  }
 0x231   :  { %5069 = vmatprep.subr.bf16.mxu0 %v5675_v26  ;;  %5109 = vmatprep.subr.bf16.mxu1 %v5677_v23  ;;  %v5687_v23 = vld [vmem:[#allocation5 + $0x150] sm:$0xff]  }
 0x232   :  { %v5689_v26 = vld [vmem:[#allocation5 + $0x1d0] sm:$0xff]  }
 0x234   :  { %5070 = vmatpush3.bf16.msra.mxu0 %v5676_v57  ;;  %5110 = vmatpush3.bf16.msra.mxu1 %v5678_v24  ;;  %v5690_v57 = vld [vmem:[#allocation5 + $0x190] sm:$0xff]   ;;  %v5693_v24 = vld [vmem:[#allocation5 + $0x1c8] sm:$0xff]  }
 0x235   :  { %5071 = vmatprep.subr.bf16.mxu0 %v5679_v54  ;;  %5111 = vmatprep.subr.bf16.mxu1 %v5681_v38  ;;  %v5691_v54 = vld [vmem:[#allocation5 + $0x148] sm:$0xff]   ;;  %v1083_v38 = vmax.f32 %v7321_v30, 0.2 }
 0x237   :  { %v947_v12 = vpop.xlane.xlu1 %946 }
 0x238   :  { %6153 = vrcp.f32 %v947_v12  ;;  %5072 = vmatpush3.bf16.msra.mxu0 %v5680_v51  ;;  %5112 = vmatpush3.bf16.msra.mxu1 %v5682_v58  ;;  %v1115_v51 = vmax.f32 %v7329_v40, 0.2  ;;  %v7359_v58 = vpop.eup %6151  ;;  %v1241_v12 = vmin.f32 %v1113_v4, 1.0 }
 0x239   :  { %5073 = vmatprep.subr.bf16.mxu0 %v5683_v45  ;;  %5113 = vmatprep.subr.bf16.mxu1 %v5685_v62  ;;  %8653 = vst [vmem:[#allocation89_spill] sm:$0xff] %v7359_v58  ;;  %v1209_v45 = vmin.f32 %v1081_v0, 1.0  ;;  %v5692_v62 = vld [vmem:[#allocation5 + $0x108] sm:$0xff]   ;;  %v1017_v30 = vmul.f32 %v7359_v58, %v6770_v22  ;;  %v1019_v40 = vmul.f32 %v7359_v58, %v6818_v46  ;;  %v1112_v0 = vmax.f32 %v7333_v6, 0.2  ;;  %v5698_v46 = vld [vmem:[#allocation5 + $0x180] sm:$0xff]  }
 0x23a   :  { %v1082_v22 = vmax.f32 %v7345_v31, 0.2  ;;  %v8655_v31 = vld [vmem:[#allocation42_spill] sm:$0xff] }
 0x23c   :  { %5074 = vmatpush3.bf16.msra.mxu0 %v5684_v36  ;;  %5114 = vmatpush3.bf16.msra.mxu1 %v5686_v10  ;;  %v1211_v36 = vmin.f32 %v1083_v38, 1.0  ;;  %v1243_v10 = vmin.f32 %v1115_v51, 1.0  ;;  %v5699_v51 = vld [vmem:[#allocation5 + $0x278] sm:$0xff]   ;;  %v1210_v3 = vmin.f32 %v1082_v22, 1.0 }
 0x23d   :  { %5075 = vmatprep.subr.bf16.mxu0 %v5687_v23  ;;  %5115 = vmatprep.subr.bf16.mxu1 %v5689_v26  ;;  %v5696_v23 = vld [vmem:[#allocation5 + $0x100] sm:$0xff]   ;;  %v1337_v26 = vmul.f32 %v1209_v45, %v1209_v45 }
 0x23e   :  { %v1339_v4 = vmul.f32 %v1211_v36, %v1211_v36  ;;  %v1371_v38 = vmul.f32 %v1243_v10, %v1243_v10 }
 0x240   :  { %5076 = vmatpush3.bf16.msra.mxu0 %v5688_v16  ;;  %5116 = vmatpush3.bf16.msra.mxu1 %v5690_v57  ;;  %v1080_v16 = vmax.f32 %v7341_v21, 0.2  ;;  %v1114_v57 = vmax.f32 %v7337_v2, 0.2  ;;  %v1531_v8 = vpack.c.bf16 %v1371_v38, %v1339_v4 }
 0x241   :  { %5077 = vmatprep.subr.bf16.mxu0 %v5691_v54  ;;  %5117 = vmatprep.subr.bf16.mxu1 %v5693_v24  ;;  %v1369_v24 = vmul.f32 %v1241_v12, %v1241_v12  ;;  %v1147_v12 = vmax.f32 %v1019_v40, 0.2 }
 0x244   :  { %5078 = vmatpush3.bf16.msra.mxu0 %v5692_v62  ;;  %5118 = vmatpush3.bf16.msra.mxu1 %v5694_v28  ;;  %v1016_v62 = vmul.f32 %v7359_v58, %v6761_v33  ;;  %v1145_v28 = vmax.f32 %v1017_v30, 0.2  ;;  %v1529_v33 = vpack.c.bf16 %v1369_v24, %v1337_v26  ;;  %v1338_v26 = vmul.f32 %v1210_v3, %v1210_v3 }
 0x245   :  { %v7368_v54 = vpop.eup %6153  ;;  %5079 = vmatprep.subr.bf16.mxu0 %v5695_v47  ;;  %5119 = vmatprep.subr.bf16.mxu1 %v5697_v42  ;;  %v1018_v47 = vmul.f32 %v7359_v58, %v8655_v31  ;;  %v1242_v42 = vmin.f32 %v1114_v57, 1.0  ;;  %v1208_v31 = vmin.f32 %v1080_v16, 1.0  ;;  %v989_v3 = vmul.f32 %v7313_v37, %v7012_v61 }
 0x246   :  { %8654 = vst [vmem:[#allocation90_spill] sm:$0xff] %v7368_v54  ;;  %v1049_v21 = vmul.f32 %v7368_v54, %v7128_v56  ;;  %v1051_v6 = vmul.f32 %v7368_v54, %v7139_v14  ;;  %v1048_v2 = vmul.f32 %v7368_v54, %v7123_v19  ;;  %v1050_v45 = vmul.f32 %v7368_v54, %v7134_v35  ;;  %v5701_v35 = vld [vmem:[#allocation5 + $0x2f8] sm:$0xff]  }
 0x247   :  { %v1240_v56 = vmin.f32 %v1112_v0, 1.0  ;;  %v1275_v0 = vmin.f32 %v1147_v12, 1.0  ;;  %v1144_v24 = vmax.f32 %v1016_v62, 0.2  ;;  %v1146_v4 = vmax.f32 %v1018_v47, 0.2 }
 0x248   :  { %v1497_v36 = vpack.c.bf16 %v1049_v21, %v1017_v30  ;;  %v1499_v10 = vpack.c.bf16 %v1051_v6, %v1019_v40  ;;  %5080 = vmatpush3.bf16.msra.mxu0 %v5696_v23  ;;  %v1496_v14 = vpack.c.bf16 %v1048_v2, %v1016_v62  ;;  %v1498_v60 = vpack.c.bf16 %v1050_v45, %v1018_v47 }
 0x249   :  { %v1177_v49 = vmax.f32 %v1049_v21, 0.2  ;;  %v1179_v19 = vmax.f32 %v1051_v6, 0.2  ;;  %5120 = vmatpush3.bf16.msra.mxu1 %v5698_v46  ;;  %5145 = vmatprep.subr.bf16.mxu0 %v5699_v51  ;;  %v1273_v23 = vmin.f32 %v1145_v28, 1.0  ;;  %v1368_v57 = vmul.f32 %v1240_v56, %v1240_v56 }
 0x24a   :  { %3680 = vmatprep.mubr.bf16.mxu0 %v1497_v36  ;;  %3745 = vmatprep.mubr.bf16.mxu1 %v1499_v10  ;;  %v1370_v21 = vmul.f32 %v1242_v42, %v1242_v42  ;;  %v1176_v6 = vmax.f32 %v1048_v2, 0.2  ;;  %v1178_v46 = vmax.f32 %v1050_v45, 0.2  ;;  %v1336_v10 = vmul.f32 %v1208_v31, %v1208_v31 }
 0x24b   :  { %3681 = vmatmul.mubr.bf16.gmra.mxu0 %v1496_v14  ;;  %3746 = vmatmul.mubr.bf16.gmra.mxu1 %v1498_v60  ;;  %v1305_v30 = vmin.f32 %v1177_v49, 1.0  ;;  %v1307_v40 = vmin.f32 %v1179_v19, 1.0  ;;  %v1401_v60 = vmul.f32 %v1273_v23, %v1273_v23  ;;  %v1403_v16 = vmul.f32 %v1275_v0, %v1275_v0  ;;  %v8656_v19 = vld [vmem:[#allocation60_spill] sm:$0xff] }
 0x24c   :  { %3688 = vmatprep.mubr.bf16.mxu0 %v1529_v33  ;;  %3753 = vmatprep.mubr.bf16.mxu1 %v1531_v8  ;;  %v1528_v38 = vpack.c.bf16 %v1368_v57, %v1336_v10  ;;  %v1530_v49 = vpack.c.bf16 %v1370_v21, %v1338_v26  ;;  %v1304_v22 = vmin.f32 %v1176_v6, 1.0  ;;  %v1306_v14 = vmin.f32 %v1178_v46, 1.0  ;;  %v8657_v33 = vld [vmem:[#allocation62_spill] sm:$0xff]  ;;  %v8658_v6 = vld [vmem:[#allocation59_spill] sm:$0xff]  ;;  %v5700_v26 = vld [vmem:[#allocation5 + $0x238] sm:$0xff]  }
 0x24d   :  { %5185 = vmatprep.subr.bf16.mxu1 %v5701_v35  ;;  %v1433_v51 = vmul.f32 %v1305_v30, %v1305_v30  ;;  %v1435_v36 = vmul.f32 %v1307_v40, %v1307_v40  ;;  %v1272_v12 = vmin.f32 %v1144_v24, 1.0  ;;  %v1274_v2 = vmin.f32 %v1146_v4, 1.0 }
 0x24e   :  { %v1432_v45 = vmul.f32 %v1304_v22, %v1304_v22  ;;  %v1434_v56 = vmul.f32 %v1306_v14, %v1306_v14  ;;  %v991_v62 = vmul.f32 %v7313_v37, %v7032_v17  ;;  %v957_v35 = vmul.f32 %v7311_v39, %v8656_v19  ;;  %v5705_v22 = vld [vmem:[#allocation5 + $0x2f0] sm:$0xff]  }
 0x24f   :  { %v1561_v8 = vpack.c.bf16 %v1433_v51, %v1401_v60  ;;  %v1563_v28 = vpack.c.bf16 %v1435_v36, %v1403_v16  ;;  %v1400_v47 = vmul.f32 %v1272_v12, %v1272_v12  ;;  %v1402_v42 = vmul.f32 %v1274_v2, %v1274_v2  ;;  %v8659_v51 = vld [vmem:[#allocation61_spill] sm:$0xff]  ;;  %v5706_v12 = vld [vmem:[#allocation5 + $0x2b0] sm:$0xff]  }
 0x250   :  { %v959_v31 = vmul.f32 %v7311_v39, %v8657_v33  ;;  %v1469_v23 = vpack.c.bf16 %v989_v3, %v957_v35  ;;  %v988_v61 = vmul.f32 %v7313_v37, %v7000_v25  ;;  %v990_v17 = vmul.f32 %v7313_v37, %v7022_v52 }
 0x251   :  { %v1560_v30 = vpack.c.bf16 %v1432_v45, %v1400_v47  ;;  %v1562_v40 = vpack.c.bf16 %v1434_v56, %v1402_v42  ;;  %v7397_v57 = vmul.f32 %v7368_v54, %v7159_v63  ;;  %v1117_v21 = vmax.f32 %v989_v3, 0.2 }
 0x252   :  { %v1471_v0 = vpack.c.bf16 %v991_v62, %v959_v31  ;;  %v956_v46 = vmul.f32 %v7311_v39, %v8658_v6  ;;  %v7403_v36 = vmul.f32 %v7311_v39, %v8659_v51  ;;  %v7407_v10 = vmul.f32 %v7368_v54, %v7183_v5  ;;  %v5703_v5 = vld [vmem:[#allocation5 + $0x270] sm:$0xff]  }
 0x253   :  { %3689 = vmatmul.mubr.bf16.gmra.mxu0 %v1528_v38  ;;  %3754 = vmatmul.mubr.bf16.gmra.mxu1 %v1530_v49  ;;  %v1119_v25 = vmax.f32 %v991_v62, 0.2  ;;  %v7411_v52 = vmul.f32 %v7359_v58, %v6828_v48  ;;  %v1085_v63 = vmax.f32 %v957_v35, 0.2  ;;  %v1087_v24 = vmax.f32 %v959_v31, 0.2 }
 0x254   :  { %3696 = vmatprep.mubr.bf16.mxu0 %v1561_v8  ;;  %3761 = vmatprep.mubr.bf16.mxu1 %v1563_v28  ;;  %v1468_v4 = vpack.c.bf16 %v988_v61, %v956_v46  ;;  %v1470_v60 = vpack.c.bf16 %v990_v17, %v7403_v36  ;;  %v1023_v16 = vmul.f32 %v7359_v58, %v6860_v43  ;;  %v5702_v38 = vld [vmem:[#allocation5 + $0x2b8] sm:$0xff]   ;;  %v1245_v14 = vmin.f32 %v1117_v21, 1.0  ;;  %v5704_v28 = vld [vmem:[#allocation5 + $0x230] sm:$0xff]   ;;  %v5707_v43 = vld [vmem:[#allocation5 + $0x268] sm:$0xff]  }
 0x255   :  { %v1501_v49 = vpack.c.bf16 %v7397_v57, %v7411_v52  ;;  %v1247_v8 = vmin.f32 %v1119_v25, 1.0  ;;  %v1213_v2 = vmin.f32 %v1085_v63, 1.0  ;;  %v1215_v45 = vmin.f32 %v1087_v24, 1.0  ;;  %v5709_v62 = vld [vmem:[#allocation5 + $0x2e8] sm:$0xff]  }
 0x256   :  { %v1503_v48 = vpack.c.bf16 %v7407_v10, %v1023_v16  ;;  %v7421_v56 = vmul.f32 %v7368_v54, %v7149_v59  ;;  %v7425_v3 = vmul.f32 %v7368_v54, %v7175_v7  ;;  %v1116_v47 = vmax.f32 %v988_v61, 0.2 }
 0x257   :  { %v1118_v42 = vmax.f32 %v990_v17, 0.2  ;;  %v1373_v19 = vmul.f32 %v1245_v14, %v1245_v14  ;;  %v1084_v35 = vmax.f32 %v956_v46, 0.2  ;;  %v1086_v33 = vmax.f32 %v7403_v36, 0.2 }
 0x258   :  { %v1181_v31 = vmax.f32 %v7397_v57, 0.2  ;;  %v7435_v59 = vmul.f32 %v7359_v58, %v6850_v44  ;;  %v1375_v7 = vmul.f32 %v1247_v8, %v1247_v8  ;;  %v1343_v61 = vmul.f32 %v1215_v45, %v1215_v45  ;;  %v5710_v44 = vld [vmem:[#allocation5 + $0x2a8] sm:$0xff]   ;;  %v5711_v36 = vld [vmem:[#allocation5 + $0x260] sm:$0xff]  }
 0x259   :  { %v1149_v17 = vmax.f32 %v7411_v52, 0.2  ;;  %v1151_v21 = vmax.f32 %v1023_v16, 0.2  ;;  %v1244_v6 = vmin.f32 %v1116_v47, 1.0  ;;  %v1246_v46 = vmin.f32 %v1118_v42, 1.0 }
 0x25a   :  { %v1502_v57 = vpack.c.bf16 %v7425_v3, %v7435_v59  ;;  %v1212_v25 = vmin.f32 %v1084_v35, 1.0  ;;  %v1535_v52 = vpack.c.bf16 %v1375_v7, %v1343_v61  ;;  %v1214_v63 = vmin.f32 %v1086_v33, 1.0  ;;  %v5716_v47 = vld [vmem:[#allocation5 + $0x218] sm:$0xff]   ;;  %v5720_v61 = vld [vmem:[#allocation5 + $0x210] sm:$0xff]  }
 0x25b   :  { %3697 = vmatmul.mubr.bf16.gmra.mxu0 %v1560_v30  ;;  %3762 = vmatmul.mubr.bf16.gmra.mxu1 %v1562_v40  ;;  %v7431_v30 = vmul.f32 %v7359_v58, %v6823_v50  ;;  %v1183_v40 = vmax.f32 %v7407_v10, 0.2  ;;  %v5713_v10 = vld [vmem:[#allocation5 + $0x2e0] sm:$0xff]   ;;  %v1279_v16 = vmin.f32 %v1151_v21, 1.0  ;;  %v1180_v14 = vmax.f32 %v7421_v56, 0.2 }
 0x25c   :  { %3802 = vmatprep.mubr.bf16.mxu0 %v1469_v23  ;;  %3867 = vmatprep.mubr.bf16.mxu1 %v1471_v0  ;;  %v5708_v23 = vld [vmem:[#allocation5 + $0x228] sm:$0xff]   ;;  %v1341_v0 = vmul.f32 %v1213_v2, %v1213_v2  ;;  %v1340_v8 = vmul.f32 %v1212_v25, %v1212_v25  ;;  %v1342_v2 = vmul.f32 %v1214_v63, %v1214_v63  ;;  %v8660_v25 = vld [vmem:[#allocation64_spill] sm:$0xff] }
 0x25d   :  { %v1500_v50 = vpack.c.bf16 %v7421_v56, %v7431_v30  ;;  %v1311_v24 = vmin.f32 %v1183_v40, 1.0  ;;  %v1308_v33 = vmin.f32 %v1180_v14, 1.0  ;;  %v5719_v40 = vld [vmem:[#allocation5 + $0x250] sm:$0xff]   ;;  %v5723_v21 = vld [vmem:[#allocation5 + $0x248] sm:$0xff]   ;;  %v992_v14 = vmul.f32 %v7313_v37, %v7042_v55 }
 0x25e   :  { %v1533_v51 = vpack.c.bf16 %v1373_v19, %v1341_v0  ;;  %v1407_v19 = vmul.f32 %v1279_v16, %v1279_v16  ;;  %v5727_v16 = vld [vmem:[#allocation5 + $0x240] sm:$0xff]  }
 0x25f   :  { %v1439_v45 = vmul.f32 %v1311_v24, %v1311_v24  ;;  %v5726_v24 = vld [vmem:[#allocation5 + $0x288] sm:$0xff]  }
 0x263   :  { %3803 = vmatmul.mubr.bf16.vlgmr.msra.gmra.mxu0 %v1468_v4  ;;  %3868 = vmatmul.mubr.bf16.vlgmr.msra.gmra.mxu1 %v1470_v60  ;;  %v5712_v4 = vld [vmem:[#allocation5 + $0x220] sm:$0xff]   ;;  %v1277_v60 = vmin.f32 %v1149_v17, 1.0  ;;  %v5722_v17 = vld [vmem:[#allocation5 + $0x290] sm:$0xff]  }
 0x264   :  { %5146 = vmatpush3.bf16.msra.mxu0 %v5700_v26  ;;  %3810 = vmatprep.mubr.bf16.mxu0 %v1501_v49  ;;  %v1309_v26 = vmin.f32 %v1181_v31, 1.0  ;;  %v5715_v49 = vld [vmem:[#allocation5 + $0x258] sm:$0xff]  }
 0x265   :  { %3875 = vmatprep.mubr.bf16.mxu1 %v1503_v48  ;;  %5186 = vmatpush3.bf16.msra.mxu1 %v5702_v38  ;;  %v5714_v38 = vld [vmem:[#allocation5 + $0x2a0] sm:$0xff]   ;;  %v1182_v48 = vmax.f32 %v7425_v3, 0.2  ;;  %v1405_v42 = vmul.f32 %v1277_v60, %v1277_v60  ;;  %v5718_v3 = vld [vmem:[#allocation5 + $0x298] sm:$0xff]  }
 0x266   :  { %5147 = vmatprep.subr.bf16.mxu0 %v5703_v5  ;;  %5187 = vmatprep.subr.bf16.mxu1 %v5705_v22  ;;  %v1372_v5 = vmul.f32 %v1244_v6, %v1244_v6  ;;  %v1374_v22 = vmul.f32 %v1246_v46, %v1246_v46  ;;  %v993_v6 = vmul.f32 %v7313_v37, %v7052_v1 }
 0x267   :  { %v1310_v31 = vmin.f32 %v1182_v48, 1.0  ;;  %v8662_v48 = vld [vmem:[#allocation63_spill] sm:$0xff] }
 0x268   :  { %5148 = vmatpush3.bf16.msra.mxu0 %v5704_v28  ;;  %v5717_v28 = vld [vmem:[#allocation5 + $0x2d8] sm:$0xff]   ;;  %v1532_v56 = vpack.c.bf16 %v1372_v5, %v1340_v8  ;;  %v1534_v35 = vpack.c.bf16 %v1374_v22, %v1342_v2  ;;  %v5730_v5 = vld [vmem:[#allocation5 + $0x280] sm:$0xff]   ;;  %v7459_v8 = vmul.f32 %v7311_v39, %v8662_v48  ;;  %v7467_v2 = vmul.f32 %v7368_v54, %v7199_v41 }
 0x269   :  { %5188 = vmatpush3.bf16.msra.mxu1 %v5706_v12  ;;  %5149 = vmatprep.subr.bf16.mxu0 %v5707_v43  ;;  %v1437_v12 = vmul.f32 %v1309_v26, %v1309_v26  ;;  %v1148_v43 = vmax.f32 %v7431_v30, 0.2  ;;  %v1567_v30 = vpack.c.bf16 %v1439_v45, %v1407_v19  ;;  %v961_v26 = vmul.f32 %v7311_v39, %v8660_v25  ;;  %v5731_v22 = vld [vmem:[#allocation5 + $0x378] sm:$0xff]   ;;  %v5740_v25 = vld [vmem:[#allocation5 + $0x328] sm:$0xff]  }
 0x26a   :  { %5189 = vmatprep.subr.bf16.mxu1 %v5709_v62  ;;  %v1150_v62 = vmax.f32 %v7435_v59, 0.2  ;;  %v7471_v45 = vmul.f32 %v7368_v54, %v7215_v53  ;;  %v1121_v55 = vmax.f32 %v993_v6, 0.2  ;;  %v7480_v41 = vmul.f32 %v7359_v58, %v6880_v20 }
 0x26b   :  { %3811 = vmatmul.mubr.bf16.gmra.mxu0 %v1500_v50  ;;  %3876 = vmatmul.mubr.bf16.gmra.mxu1 %v1502_v57  ;;  %v1565_v7 = vpack.c.bf16 %v1437_v12, %v1405_v42  ;;  %v1276_v0 = vmin.f32 %v1148_v43, 1.0  ;;  %v1436_v50 = vmul.f32 %v1308_v33, %v1308_v33  ;;  %v1438_v57 = vmul.f32 %v1310_v31, %v1310_v31  ;;  %v5733_v12 = vld [vmem:[#allocation5 + $0x3f8] sm:$0xff]   ;;  %v5735_v33 = vld [vmem:[#allocation5 + $0x370] sm:$0xff]  }
 0x26c   :  { %5150 = vmatpush3.bf16.msra.mxu0 %v5708_v23  ;;  %3818 = vmatprep.mubr.bf16.mxu0 %v1533_v51  ;;  %v5721_v23 = vld [vmem:[#allocation5 + $0x2d0] sm:$0xff]   ;;  %v1278_v59 = vmin.f32 %v1150_v62, 1.0  ;;  %v1473_v1 = vpack.c.bf16 %v993_v6, %v961_v26  ;;  %v8663_v62 = vld [vmem:[#allocation65_spill] sm:$0xff]  ;;  %v1089_v19 = vmax.f32 %v961_v26, 0.2  ;;  %v7484_v53 = vmul.f32 %v7359_v58, %v6900_v32 }
 0x26d   :  { %3883 = vmatprep.mubr.bf16.mxu1 %v1535_v52  ;;  %5190 = vmatpush3.bf16.msra.mxu1 %v5710_v44  ;;  %v5725_v44 = vld [vmem:[#allocation5 + $0x2c8] sm:$0xff]   ;;  %v1404_v46 = vmul.f32 %v1276_v0, %v1276_v0  ;;  %v5732_v42 = vld [vmem:[#allocation5 + $0x338] sm:$0xff]   ;;  %v1505_v31 = vpack.c.bf16 %v7467_v2, %v7480_v41  ;;  %v1249_v20 = vmin.f32 %v1121_v55, 1.0  ;;  %v5736_v32 = vld [vmem:[#allocation5 + $0x330] sm:$0xff]  }
 0x26e   :  { %5151 = vmatprep.subr.bf16.mxu0 %v5711_v36  ;;  %5191 = vmatprep.subr.bf16.mxu1 %v5713_v10  ;;  %v1406_v51 = vmul.f32 %v1278_v59, %v1278_v59  ;;  %v995_v36 = vmul.f32 %v7313_v37, %v7070_v29  ;;  %v5724_v10 = vld [vmem:[#allocation5 + $0x208] sm:$0xff]  }
 0x26f   :  { %v1564_v52 = vpack.c.bf16 %v1436_v50, %v1404_v46  ;;  %v5739_v59 = vld [vmem:[#allocation5 + $0x368] sm:$0xff]   ;;  %v7498_v50 = vmul.f32 %v7359_v58, %v6870_v9  ;;  %v7510_v9 = vmul.f32 %v7359_v58, %v6890_v13 }
 0x270   :  { %5152 = vmatpush3.bf16.msra.mxu0 %v5712_v4  ;;  %v1566_v63 = vpack.c.bf16 %v1438_v57, %v1406_v51  ;;  %v8661_v4 = vld [vmem:[#allocation105_spill] sm:$0xff]  ;;  %v1123_v43 = vmax.f32 %v995_v36, 0.2  ;;  %v7502_v57 = vmul.f32 %v7368_v54, %v7207_v11  ;;  %v5741_v46 = vld [vmem:[#allocation5 + $0x3e8] sm:$0xff]  }
 0x271   :  { %5192 = vmatpush3.bf16.msra.mxu1 %v5714_v38  ;;  %5153 = vmatprep.subr.bf16.mxu0 %v5715_v49  ;;  %v963_v60 = vmul.f32 %v7311_v39, %v8661_v4  ;;  %v5729_v38 = vld [vmem:[#allocation5 + $0x2c0] sm:$0xff]   ;;  %v1153_v4 = vmax.f32 %v7480_v41, 0.2  ;;  %v5742_v13 = vld [vmem:[#allocation5 + $0x3a8] sm:$0xff]  }
 0x272   :  { %5193 = vmatprep.subr.bf16.mxu1 %v5717_v28  ;;  %v5728_v49 = vld [vmem:[#allocation5 + $0x200] sm:$0xff]   ;;  %v7463_v28 = vmul.f32 %v7313_v37, %v7062_v27 }
 0x273   :  { %3819 = vmatmul.mubr.bf16.gmra.mxu0 %v1532_v56  ;;  %3884 = vmatmul.mubr.bf16.gmra.mxu1 %v1534_v35  ;;  %v1475_v29 = vpack.c.bf16 %v995_v36, %v963_v60  ;;  %v1091_v27 = vmax.f32 %v963_v60, 0.2  ;;  %v1472_v56 = vpack.c.bf16 %v992_v14, %v7459_v8  ;;  %v1185_v36 = vmax.f32 %v7467_v2, 0.2 }
 0x274   :  { %5154 = vmatpush3.bf16.msra.mxu0 %v5716_v47  ;;  %3826 = vmatprep.mubr.bf16.mxu0 %v1565_v7  ;;  %v7475_v47 = vmul.f32 %v7311_v39, %v8663_v62  ;;  %v1507_v7 = vpack.c.bf16 %v7471_v45, %v7484_v53  ;;  %v1122_v6 = vmax.f32 %v7463_v28, 0.2  ;;  %v1155_v60 = vmax.f32 %v7484_v53, 0.2  ;;  %v5746_v62 = vld [vmem:[#allocation5 + $0x3a0] sm:$0xff]  }
 0x275   :  { %3891 = vmatprep.mubr.bf16.mxu1 %v1567_v30  ;;  %5194 = vmatpush3.bf16.msra.mxu1 %v5718_v3  ;;  %v5734_v3 = vld [vmem:[#allocation5 + $0x3b8] sm:$0xff]   ;;  %v1217_v30 = vmin.f32 %v1089_v19, 1.0  ;;  %v1219_v0 = vmin.f32 %v1091_v27, 1.0  ;;  %v1152_v53 = vmax.f32 %v7498_v50, 0.2 }
 0x276   :  { %5155 = vmatprep.subr.bf16.mxu0 %v5719_v40  ;;  %5195 = vmatprep.subr.bf16.mxu1 %v5721_v23  ;;  %v1474_v35 = vpack.c.bf16 %v7463_v28, %v7475_v47  ;;  %v5737_v40 = vld [vmem:[#allocation5 + $0x3f0] sm:$0xff]   ;;  %v1251_v23 = vmin.f32 %v1123_v43, 1.0  ;;  %v1283_v55 = vmin.f32 %v1155_v60, 1.0  ;;  %v5749_v27 = vld [vmem:[#allocation5 + $0x3d8] sm:$0xff]  }
 0x277   :  { %v1345_v11 = vmul.f32 %v1217_v30, %v1217_v30  ;;  %v1347_v26 = vmul.f32 %v1219_v0, %v1219_v0  ;;  %v5751_v30 = vld [vmem:[#allocation5 + $0x350] sm:$0xff]  }
 0x278   :  { %5156 = vmatpush3.bf16.msra.mxu0 %v5720_v61  ;;  %v7494_v61 = vmul.f32 %v7368_v54, %v7191_v18  ;;  %v1377_v18 = vmul.f32 %v1249_v20, %v1249_v20  ;;  %v1379_v51 = vmul.f32 %v1251_v23, %v1251_v23 }
 0x279   :  { %5196 = vmatpush3.bf16.msra.mxu1 %v5722_v17  ;;  %5157 = vmatprep.subr.bf16.mxu0 %v5723_v21  ;;  %v1120_v17 = vmax.f32 %v992_v14, 0.2  ;;  %v5738_v21 = vld [vmem:[#allocation5 + $0x3b0] sm:$0xff]   ;;  %v1313_v14 = vmin.f32 %v1185_v36, 1.0  ;;  %v5757_v36 = vld [vmem:[#allocation5 + $0x3c8] sm:$0xff]  }
 0x27a   :  { %5197 = vmatprep.subr.bf16.mxu1 %v5725_v44  ;;  %v1088_v44 = vmax.f32 %v7459_v8, 0.2  ;;  %v5744_v8 = vld [vmem:[#allocation5 + $0x320] sm:$0xff]   ;;  %v1184_v43 = vmax.f32 %v7494_v61, 0.2 }
 0x27b   :  { %3827 = vmatmul.mubr.bf16.gmra.mxu0 %v1564_v52  ;;  %3892 = vmatmul.mubr.bf16.gmra.mxu1 %v1566_v63  ;;  %v1090_v52 = vmax.f32 %v7475_v47, 0.2  ;;  %v1504_v63 = vpack.c.bf16 %v7494_v61, %v7498_v50  ;;  %v5752_v50 = vld [vmem:[#allocation5 + $0x310] sm:$0xff]  }
 0x27c   :  { %5158 = vmatpush3.bf16.msra.mxu0 %v5724_v10  ;;  %3932 = vmatprep.mubr.bf16.mxu0 %v1473_v1  ;;  %v1187_v10 = vmax.f32 %v7471_v45, 0.2  ;;  %v1506_v1 = vpack.c.bf16 %v7502_v57, %v7510_v9  ;;  %v1281_v45 = vmin.f32 %v1153_v4, 1.0  ;;  %v1312_v20 = vmin.f32 %v1184_v43, 1.0  ;;  %v5764_v43 = vld [vmem:[#allocation5 + $0x438] sm:$0xff]  }
 0x27d   :  { %5198 = vmatpush3.bf16.msra.mxu1 %v5726_v24  ;;  %3997 = vmatprep.mubr.bf16.mxu1 %v1475_v29  ;;  %v1248_v24 = vmin.f32 %v1120_v17, 1.0  ;;  %v1250_v29 = vmin.f32 %v1122_v6, 1.0  ;;  %v1218_v28 = vmin.f32 %v1090_v52, 1.0  ;;  %v5753_v17 = vld [vmem:[#allocation5 + $0x3d0] sm:$0xff]   ;;  %v8664_v52 = vld [vmem:[#allocation41_spill] sm:$0xff] }
 0x27e   :  { %5159 = vmatprep.subr.bf16.mxu0 %v5727_v16  ;;  %5199 = vmatprep.subr.bf16.mxu1 %v5729_v38  ;;  %v5743_v16 = vld [vmem:[#allocation5 + $0x360] sm:$0xff]   ;;  %v1216_v38 = vmin.f32 %v1088_v44, 1.0  ;;  %v1315_v48 = vmin.f32 %v1187_v10, 1.0  ;;  %v5755_v44 = vld [vmem:[#allocation5 + $0x348] sm:$0xff]   ;;  %v1440_v6 = vmul.f32 %v1312_v20, %v1312_v20  ;;  %v997_v10 = vmul.f32 %v7313_v37, %v7090_v15 }
 0x27f   :  { %v1376_v2 = vmul.f32 %v1248_v24, %v1248_v24  ;;  %v1378_v47 = vmul.f32 %v1250_v29, %v1250_v29  ;;  %v8665_v24 = vld [vmem:[#allocation44_spill] sm:$0xff]  ;;  %v5763_v29 = vld [vmem:[#allocation5 + $0x478] sm:$0xff]  }
 0x280   :  { %5160 = vmatpush3.bf16.msra.mxu0 %v5728_v49  ;;  %v1537_v49 = vpack.c.bf16 %v1377_v18, %v1345_v11  ;;  %v1344_v19 = vmul.f32 %v1216_v38, %v1216_v38  ;;  %v1443_v41 = vmul.f32 %v1315_v48, %v1315_v48  ;;  %v5756_v11 = vld [vmem:[#allocation5 + $0x308] sm:$0xff]   ;;  %v967_v4 = vmul.f32 %v7311_v39, %v8665_v24  ;;  %v5760_v38 = vld [vmem:[#allocation5 + $0x300] sm:$0xff]  }
 0x281   :  { %5200 = vmatpush3.bf16.msra.mxu1 %v5730_v5  ;;  %5225 = vmatprep.subr.bf16.mxu0 %v5731_v22  ;;  %v1539_v5 = vpack.c.bf16 %v1379_v51, %v1347_v26  ;;  %v5745_v22 = vld [vmem:[#allocation5 + $0x3e0] sm:$0xff]  }
 0x282   :  { %5265 = vmatprep.subr.bf16.mxu1 %v5733_v12  ;;  %v5747_v12 = vld [vmem:[#allocation5 + $0x358] sm:$0xff]  }
 0x283   :  { %3933 = vmatmul.mubr.bf16.vlgmr.msra.gmra.mxu0 %v1472_v56  ;;  %v1441_v56 = vmul.f32 %v1313_v14, %v1313_v14  ;;  %v8667_v14 = vld [vmem:[#allocation73_spill] sm:$0xff] }
 0x284   :  { %3998 = vmatmul.mubr.bf16.vlgmr.msra.gmra.mxu1 %v1474_v35  ;;  %5226 = vmatpush3.bf16.msra.mxu0 %v5732_v42  ;;  %v1186_v42 = vmax.f32 %v7502_v57, 0.2  ;;  %v1346_v35 = vmul.f32 %v1218_v28, %v1218_v28  ;;  %v7537_v48 = vmul.f32 %v7368_v54, %v8667_v14  ;;  %v8668_v28 = vld [vmem:[#allocation106_spill] sm:$0xff] }
 0x285   :  { %3940 = vmatprep.mubr.bf16.mxu0 %v1505_v31  ;;  %4005 = vmatprep.mubr.bf16.mxu1 %v1507_v7  ;;  %v1536_v31 = vpack.c.bf16 %v1376_v2, %v1344_v19  ;;  %v1409_v7 = vmul.f32 %v1281_v45, %v1281_v45  ;;  %v8669_v2 = vld [vmem:[#allocation37_spill] sm:$0xff] }
 0x286   :  { %5266 = vmatpush3.bf16.msra.mxu1 %v5734_v3  ;;  %5227 = vmatprep.subr.bf16.mxu0 %v5735_v33  ;;  %v5748_v3 = vld [vmem:[#allocation5 + $0x318] sm:$0xff]   ;;  %v1154_v33 = vmax.f32 %v7510_v9, 0.2  ;;  %v1538_v23 = vpack.c.bf16 %v1378_v47, %v1346_v35  ;;  %v1314_v0 = vmin.f32 %v1186_v42, 1.0  ;;  %v999_v9 = vmul.f32 %v7313_v37, %v7106_v34  ;;  %v5761_v34 = vld [vmem:[#allocation5 + $0x3c0] sm:$0xff]   ;;  %v8671_v42 = vld [vmem:[#allocation107_spill] sm:$0xff] }
 0x287   :  { %5267 = vmatprep.subr.bf16.mxu1 %v5737_v40  ;;  %v1411_v40 = vmul.f32 %v1283_v55, %v1283_v55  ;;  %v7545_v45 = vmul.f32 %v7313_v37, %v8669_v2  ;;  %v5765_v55 = vld [vmem:[#allocation5 + $0x4f8] sm:$0xff]   ;;  %v7553_v19 = vmul.f32 %v7368_v54, %v8671_v42 }
 0x288   :  { %5228 = vmatpush3.bf16.msra.mxu0 %v5736_v32  ;;  %v5750_v32 = vld [vmem:[#allocation5 + $0x398] sm:$0xff]   ;;  %v1282_v57 = vmin.f32 %v1154_v33, 1.0  ;;  %v1442_v18 = vmul.f32 %v1314_v0, %v1314_v0 }
 0x289   :  { %5229 = vmatprep.subr.bf16.mxu0 %v5739_v59  ;;  %v1569_v59 = vpack.c.bf16 %v1441_v56, %v1409_v7  ;;  %v1571_v61 = vpack.c.bf16 %v1443_v41, %v1411_v40  ;;  %v1127_v56 = vmax.f32 %v999_v9, 0.2  ;;  %v5766_v40 = vld [vmem:[#allocation5 + $0x4b8] sm:$0xff]  }
 0x28a   :  { %5268 = vmatpush3.bf16.msra.mxu1 %v5738_v21  ;;  %v1280_v21 = vmin.f32 %v1152_v53, 1.0  ;;  %v8672_v53 = vld [vmem:[#allocation43_spill] sm:$0xff] }
 0x28b   :  { %3941 = vmatmul.mubr.bf16.gmra.mxu0 %v1504_v63  ;;  %5269 = vmatprep.subr.bf16.mxu1 %v5741_v46  ;;  %v5754_v46 = vld [vmem:[#allocation5 + $0x390] sm:$0xff]   ;;  %v965_v63 = vmul.f32 %v7311_v39, %v8664_v52  ;;  %v7559_v35 = vmul.f32 %v7311_v39, %v8672_v53  ;;  %v1126_v52 = vmax.f32 %v7545_v45, 0.2 }
 0x28c   :  { %4006 = vmatmul.mubr.bf16.gmra.mxu1 %v1506_v1  ;;  %5230 = vmatpush3.bf16.msra.mxu0 %v5740_v25  ;;  %v1408_v51 = vmul.f32 %v1280_v21, %v1280_v21  ;;  %v1410_v25 = vmul.f32 %v1282_v57, %v1282_v57  ;;  %v5758_v1 = vld [vmem:[#allocation5 + $0x388] sm:$0xff]  }
 0x28d   :  { %3948 = vmatprep.mubr.bf16.mxu0 %v1537_v49  ;;  %4013 = vmatprep.mubr.bf16.mxu1 %v1539_v5  ;;  %v1477_v15 = vpack.c.bf16 %v997_v10, %v965_v63  ;;  %v8666_v49 = vld [vmem:[#allocation98_spill] sm:$0xff]  ;;  %v5771_v21 = vld [vmem:[#allocation5 + $0x468] sm:$0xff]   ;;  %v1254_v2 = vmin.f32 %v1126_v52, 1.0 }
 0x28e   :  { %5270 = vmatpush3.bf16.msra.mxu1 %v5742_v13  ;;  %5231 = vmatprep.subr.bf16.mxu0 %v5743_v16  ;;  %v1568_v26 = vpack.c.bf16 %v1440_v6, %v1408_v51  ;;  %v1570_v60 = vpack.c.bf16 %v1442_v18, %v1410_v25  ;;  %v5759_v13 = vld [vmem:[#allocation5 + $0x340] sm:$0xff]   ;;  %v1479_v16 = vpack.c.bf16 %v999_v9, %v967_v4  ;;  %v5770_v6 = vld [vmem:[#allocation5 + $0x4b0] sm:$0xff]   ;;  %v1189_v51 = vmax.f32 %v7537_v48, 0.2  ;;  %v8676_v9 = vld [vmem:[#allocation75_spill] sm:$0xff] }
 0x28f   :  { %5271 = vmatprep.subr.bf16.mxu1 %v5745_v22  ;;  %v7533_v5 = vmul.f32 %v7313_v37, %v8666_v49  ;;  %v5762_v22 = vld [vmem:[#allocation5 + $0x380] sm:$0xff]   ;;  %v7583_v25 = vmul.f32 %v7368_v54, %v8676_v9 }
 0x290   :  { %5232 = vmatpush3.bf16.msra.mxu0 %v5744_v8  ;;  %v1125_v8 = vmax.f32 %v997_v10, 0.2  ;;  %v1317_v14 = vmin.f32 %v1189_v51, 1.0  ;;  %v5784_v51 = vld [vmem:[#allocation5 + $0x410] sm:$0xff]  }
 0x291   :  { %5233 = vmatprep.subr.bf16.mxu0 %v5747_v12  ;;  %v7541_v12 = vmul.f32 %v7311_v39, %v8668_v28  ;;  %v5777_v28 = vld [vmem:[#allocation5 + $0x4e0] sm:$0xff]  }
 0x292   :  { %5272 = vmatpush3.bf16.msra.mxu1 %v5746_v62  ;;  %v8670_v62 = vld [vmem:[#allocation56_spill] sm:$0xff]  ;;  %v1253_v20 = vmin.f32 %v1125_v8, 1.0 }
 0x293   :  { %3949 = vmatmul.mubr.bf16.gmra.mxu0 %v1536_v31  ;;  %5273 = vmatprep.subr.bf16.mxu1 %v5749_v27  ;;  %v7549_v47 = vmul.f32 %v7359_v58, %v8670_v62  ;;  %v1093_v27 = vmax.f32 %v965_v63, 0.2  ;;  %v1476_v41 = vpack.c.bf16 %v7533_v5, %v7541_v12  ;;  %v8673_v31 = vld [vmem:[#allocation20_spill] sm:$0xff]  ;;  %v5772_v63 = vld [vmem:[#allocation5 + $0x428] sm:$0xff]  }
 0x294   :  { %4014 = vmatmul.mubr.bf16.gmra.mxu1 %v1538_v23  ;;  %5234 = vmatpush3.bf16.msra.mxu0 %v5748_v3  ;;  %v5767_v3 = vld [vmem:[#allocation5 + $0x470] sm:$0xff]   ;;  %v7565_v7 = vmul.f32 %v7359_v58, %v8673_v31  ;;  %v1095_v23 = vmax.f32 %v967_v4, 0.2 }
 0x295   :  { %3956 = vmatprep.mubr.bf16.mxu0 %v1569_v59  ;;  %4021 = vmatprep.mubr.bf16.mxu1 %v1571_v61  ;;  %v1509_v33 = vpack.c.bf16 %v7537_v48, %v7549_v47  ;;  %v5768_v59 = vld [vmem:[#allocation5 + $0x430] sm:$0xff]   ;;  %v1221_v61 = vmin.f32 %v1093_v27, 1.0 }
 0x296   :  { %5274 = vmatpush3.bf16.msra.mxu1 %v5750_v32  ;;  %5235 = vmatprep.subr.bf16.mxu0 %v5751_v30  ;;  %v1478_v32 = vpack.c.bf16 %v7545_v45, %v7559_v35  ;;  %v5769_v30 = vld [vmem:[#allocation5 + $0x4f0] sm:$0xff]   ;;  %v1511_v0 = vpack.c.bf16 %v7553_v19, %v7565_v7  ;;  %v1223_v18 = vmin.f32 %v1095_v23, 1.0  ;;  %v1159_v48 = vmax.f32 %v7565_v7, 0.2 }
 0x297   :  { %5275 = vmatprep.subr.bf16.mxu1 %v5753_v17  ;;  %v1255_v17 = vmin.f32 %v1127_v56, 1.0  ;;  %v1349_v24 = vmul.f32 %v1221_v61, %v1221_v61  ;;  %v5778_v56 = vld [vmem:[#allocation5 + $0x4a0] sm:$0xff]   ;;  %v1190_v7 = vmax.f32 %v7583_v25, 0.2 }
 0x298   :  { %5236 = vmatpush3.bf16.msra.mxu0 %v5752_v50  ;;  %v8674_v50 = vld [vmem:[#allocation71_spill] sm:$0xff]  ;;  %v1287_v53 = vmin.f32 %v1159_v48, 1.0  ;;  %v5793_v48 = vld [vmem:[#allocation5 + $0x4c0] sm:$0xff]  }
 0x299   :  { %5237 = vmatprep.subr.bf16.mxu0 %v5755_v44  ;;  %v7573_v57 = vmul.f32 %v7368_v54, %v8674_v50  ;;  %v1124_v44 = vmax.f32 %v7533_v5, 0.2  ;;  %v1383_v4 = vmul.f32 %v1255_v17, %v1255_v17  ;;  %v1351_v5 = vmul.f32 %v1223_v18, %v1223_v18  ;;  %v5782_v50 = vld [vmem:[#allocation5 + $0x498] sm:$0xff]  }
 0x29a   :  { %5276 = vmatpush3.bf16.msra.mxu1 %v5754_v46  ;;  %v1381_v46 = vmul.f32 %v1253_v20, %v1253_v20 }
 0x29b   :  { %3957 = vmatmul.mubr.bf16.gmra.mxu0 %v1568_v26  ;;  %5277 = vmatprep.subr.bf16.mxu1 %v5757_v36  ;;  %v8675_v36 = vld [vmem:[#allocation16_spill] sm:$0xff]  ;;  %v1092_v26 = vmax.f32 %v7541_v12, 0.2  ;;  %v1543_v45 = vpack.c.bf16 %v1383_v4, %v1351_v5  ;;  %v1188_v27 = vmax.f32 %v7573_v57, 0.2  ;;  %v5788_v4 = vld [vmem:[#allocation5 + $0x408] sm:$0xff]  }
 0x29c   :  { %4022 = vmatmul.mubr.bf16.gmra.mxu1 %v1570_v60  ;;  %5238 = vmatpush3.bf16.msra.mxu0 %v5756_v11  ;;  %v7579_v10 = vmul.f32 %v7359_v58, %v8675_v36  ;;  %v5773_v11 = vld [vmem:[#allocation5 + $0x4e8] sm:$0xff]   ;;  %v1157_v60 = vmax.f32 %v7549_v47, 0.2  ;;  %v1541_v49 = vpack.c.bf16 %v1381_v46, %v1349_v24  ;;  %v5779_v47 = vld [vmem:[#allocation5 + $0x458] sm:$0xff]   ;;  %v1318_v46 = vmin.f32 %v1190_v7, 1.0  ;;  %v8681_v5 = vld [vmem:[#allocation48_spill] sm:$0xff] }
 0x29d   :  { %4062 = vmatprep.mubr.bf16.mxu0 %v1477_v15  ;;  %4127 = vmatprep.mubr.bf16.mxu1 %v1479_v16  ;;  %v8677_v15 = vld [vmem:[#allocation18_spill] sm:$0xff]  ;;  %v1220_v12 = vmin.f32 %v1092_v26, 1.0  ;;  %v5787_v36 = vld [vmem:[#allocation5 + $0x448] sm:$0xff]  }
 0x29e   :  { %5278 = vmatpush3.bf16.msra.mxu1 %v5758_v1  ;;  %5239 = vmatprep.subr.bf16.mxu0 %v5759_v13  ;;  %v1191_v1 = vmax.f32 %v7553_v19, 0.2  ;;  %v1508_v13 = vpack.c.bf16 %v7573_v57, %v7579_v10  ;;  %v7593_v16 = vmul.f32 %v7359_v58, %v8677_v15  ;;  %v1156_v31 = vmax.f32 %v7579_v10, 0.2  ;;  %v5789_v24 = vld [vmem:[#allocation5 + $0x4c8] sm:$0xff]  }
 0x29f   :  { %5279 = vmatprep.subr.bf16.mxu1 %v5761_v34  ;;  %v5775_v34 = vld [vmem:[#allocation5 + $0x460] sm:$0xff]  }
 0x2a0   :  { %5240 = vmatpush3.bf16.msra.mxu0 %v5760_v38  ;;  %v1252_v38 = vmin.f32 %v1124_v44, 1.0  ;;  %v1510_v8 = vpack.c.bf16 %v7583_v25, %v7593_v16  ;;  %v1319_v62 = vmin.f32 %v1191_v1, 1.0  ;;  %v1158_v61 = vmax.f32 %v7593_v16, 0.2  ;;  %v5785_v44 = vld [vmem:[#allocation5 + $0x4d0] sm:$0xff]  }
 0x2a1   :  { %5305 = vmatprep.subr.bf16.mxu0 %v5763_v29  ;;  %v1094_v29 = vmax.f32 %v7559_v35, 0.2  ;;  %v1348_v35 = vmul.f32 %v1220_v12, %v1220_v12  ;;  %v5786_v25 = vld [vmem:[#allocation5 + $0x490] sm:$0xff]   ;;  %v5795_v12 = vld [vmem:[#allocation5 + $0x578] sm:$0xff]  }
 0x2a2   :  { %5280 = vmatpush3.bf16.msra.mxu1 %v5762_v22  ;;  %v5774_v22 = vld [vmem:[#allocation5 + $0x4a8] sm:$0xff]   ;;  %v1380_v42 = vmul.f32 %v1252_v38, %v1252_v38  ;;  %v1447_v23 = vmul.f32 %v1319_v62, %v1319_v62  ;;  %v1286_v9 = vmin.f32 %v1158_v61, 1.0  ;;  %v5791_v38 = vld [vmem:[#allocation5 + $0x440] sm:$0xff]  }
 0x2a3   :  { %4063 = vmatmul.mubr.bf16.vlgmr.msra.gmra.mxu0 %v1476_v41  ;;  %5345 = vmatprep.subr.bf16.mxu1 %v5765_v55  ;;  %v5776_v55 = vld [vmem:[#allocation5 + $0x420] sm:$0xff]   ;;  %v1222_v19 = vmin.f32 %v1094_v29, 1.0  ;;  %v1445_v41 = vmul.f32 %v1317_v14, %v1317_v14 }
 0x2a4   :  { %5306 = vmatpush3.bf16.msra.mxu0 %v5764_v43  ;;  %4070 = vmatprep.mubr.bf16.mxu0 %v1509_v33  ;;  %v1285_v43 = vmin.f32 %v1157_v60, 1.0  ;;  %v5781_v33 = vld [vmem:[#allocation5 + $0x4d8] sm:$0xff]   ;;  %v8679_v60 = vld [vmem:[#allocation46_spill] sm:$0xff] }
 0x2a5   :  { %4128 = vmatmul.mubr.bf16.vlgmr.msra.gmra.mxu1 %v1478_v32  ;;  %5307 = vmatprep.subr.bf16.mxu0 %v5767_v3  ;;  %v1382_v3 = vmul.f32 %v1254_v2, %v1254_v2  ;;  %v1540_v32 = vpack.c.bf16 %v1380_v42, %v1348_v35  ;;  %v969_v1 = vmul.f32 %v7311_v39, %v8679_v60  ;;  %v8682_v2 = vld [vmem:[#allocation100_spill] sm:$0xff]  ;;  %v8684_v42 = vld [vmem:[#allocation45_spill] sm:$0xff]  ;;  %v8686_v35 = vld [vmem:[#allocation23_spill] sm:$0xff] }
 0x2a6   :  { %4135 = vmatprep.mubr.bf16.mxu1 %v1511_v0  ;;  %5346 = vmatpush3.bf16.msra.mxu1 %v5766_v40  ;;  %v5780_v40 = vld [vmem:[#allocation5 + $0x418] sm:$0xff]   ;;  %v1413_v20 = vmul.f32 %v1285_v43, %v1285_v43  ;;  %v5783_v0 = vld [vmem:[#allocation5 + $0x450] sm:$0xff]   ;;  %v8692_v60 = vld [vmem:[#allocation78_spill] sm:$0xff] }
 0x2a7   :  { %5347 = vmatprep.subr.bf16.mxu1 %v5769_v30  ;;  %v1350_v30 = vmul.f32 %v1222_v19, %v1222_v19  ;;  %v8683_v43 = vld [vmem:[#allocation108_spill] sm:$0xff]  ;;  %v7621_v19 = vmul.f32 %v7311_v39, %v8684_v42  ;;  %v1097_v7 = vmax.f32 %v969_v1, 0.2  ;;  %v5809_v42 = vld [vmem:[#allocation5 + $0x5e0] sm:$0xff]  }
 0x2a8   :  { %5308 = vmatpush3.bf16.msra.mxu0 %v5768_v59  ;;  %v1316_v59 = vmin.f32 %v1188_v27, 1.0  ;;  %v1573_v17 = vpack.c.bf16 %v1445_v41, %v1413_v20  ;;  %v7617_v62 = vmul.f32 %v7368_v54, %v8683_v43  ;;  %v8685_v27 = vld [vmem:[#allocation101_spill] sm:$0xff] }
 0x2a9   :  { %5309 = vmatprep.subr.bf16.mxu0 %v5771_v21  ;;  %v1415_v21 = vmul.f32 %v1287_v53, %v1287_v53  ;;  %v1542_v57 = vpack.c.bf16 %v1382_v3, %v1350_v30  ;;  %v5797_v41 = vld [vmem:[#allocation5 + $0x5f8] sm:$0xff]   ;;  %v7629_v3 = vmul.f32 %v7359_v58, %v8686_v35  ;;  %v5799_v30 = vld [vmem:[#allocation5 + $0x570] sm:$0xff]  }
 0x2aa   :  { %5348 = vmatpush3.bf16.msra.mxu1 %v5770_v6  ;;  %v1284_v6 = vmin.f32 %v1156_v31, 1.0  ;;  %v1444_v10 = vmul.f32 %v1316_v59, %v1316_v59  ;;  %v5796_v53 = vld [vmem:[#allocation5 + $0x538] sm:$0xff]  }
 0x2ab   :  { %4071 = vmatmul.mubr.bf16.gmra.mxu0 %v1508_v13  ;;  %5349 = vmatprep.subr.bf16.mxu1 %v5773_v11  ;;  %v1575_v18 = vpack.c.bf16 %v1447_v23, %v1415_v21  ;;  %v8678_v11 = vld [vmem:[#allocation38_spill] sm:$0xff]  ;;  %v8688_v23 = vld [vmem:[#allocation47_spill] sm:$0xff]  ;;  %v8689_v59 = vld [vmem:[#allocation25_spill] sm:$0xff] }
 0x2ac   :  { %5310 = vmatpush3.bf16.msra.mxu0 %v5772_v63  ;;  %4078 = vmatprep.mubr.bf16.mxu0 %v1541_v49  ;;  %v1001_v26 = vmul.f32 %v7313_v37, %v8678_v11  ;;  %v1412_v52 = vmul.f32 %v1284_v6, %v1284_v6  ;;  %v1446_v63 = vmul.f32 %v1318_v46, %v1318_v46  ;;  %v8680_v13 = vld [vmem:[#allocation102_spill] sm:$0xff]  ;;  %v5790_v49 = vld [vmem:[#allocation5 + $0x488] sm:$0xff]   ;;  %v5800_v46 = vld [vmem:[#allocation5 + $0x530] sm:$0xff]  }
 0x2ad   :  { %4136 = vmatmul.mubr.bf16.gmra.mxu1 %v1510_v8  ;;  %5311 = vmatprep.subr.bf16.mxu0 %v5775_v34  ;;  %v1003_v15 = vmul.f32 %v7313_v37, %v8680_v13  ;;  %v1414_v34 = vmul.f32 %v1286_v9, %v1286_v9  ;;  %v7645_v61 = vmul.f32 %v7359_v58, %v8689_v59  ;;  %v5802_v11 = vld [vmem:[#allocation5 + $0x5b0] sm:$0xff]   ;;  %v5805_v13 = vld [vmem:[#allocation5 + $0x5e8] sm:$0xff]  }
 0x2ae   :  { %4143 = vmatprep.mubr.bf16.mxu1 %v1543_v45  ;;  %5350 = vmatpush3.bf16.msra.mxu1 %v5774_v22  ;;  %v1572_v16 = vpack.c.bf16 %v1444_v10, %v1412_v52  ;;  %v1481_v29 = vpack.c.bf16 %v1001_v26, %v969_v1  ;;  %v971_v22 = vmul.f32 %v7311_v39, %v8681_v5  ;;  %v8690_v10 = vld [vmem:[#allocation77_spill] sm:$0xff] }
 0x2af   :  { %5351 = vmatprep.subr.bf16.mxu1 %v5777_v28  ;;  %v1574_v14 = vpack.c.bf16 %v1446_v63, %v1414_v34  ;;  %v5792_v28 = vld [vmem:[#allocation5 + $0x400] sm:$0xff]   ;;  %v7613_v45 = vmul.f32 %v7313_v37, %v8682_v2  ;;  %v7653_v9 = vmul.f32 %v7368_v54, %v8690_v10  ;;  %v1193_v63 = vmax.f32 %v7617_v62, 0.2  ;;  %v5804_v34 = vld [vmem:[#allocation5 + $0x528] sm:$0xff]   ;;  %v5814_v10 = vld [vmem:[#allocation5 + $0x598] sm:$0xff]  }
 0x2b0   :  { %5312 = vmatpush3.bf16.msra.mxu0 %v5776_v55  ;;  %v1483_v8 = vpack.c.bf16 %v1003_v15, %v971_v22  ;;  %v5794_v55 = vld [vmem:[#allocation5 + $0x480] sm:$0xff]   ;;  %v7663_v1 = vmul.f32 %v7368_v54, %v8692_v60 }
 0x2b1   :  { %5313 = vmatprep.subr.bf16.mxu0 %v5779_v47  ;;  %v1129_v47 = vmax.f32 %v1001_v26, 0.2  ;;  %v1480_v20 = vpack.c.bf16 %v7613_v45, %v7621_v19  ;;  %v1321_v43 = vmin.f32 %v1193_v63, 1.0  ;;  %v5816_v63 = vld [vmem:[#allocation5 + $0x510] sm:$0xff]  }
 0x2b2   :  { %5352 = vmatpush3.bf16.msra.mxu1 %v5778_v56  ;;  %v7625_v56 = vmul.f32 %v7313_v37, %v8685_v27 }
 0x2b3   :  { %4079 = vmatmul.mubr.bf16.gmra.mxu0 %v1540_v32  ;;  %5353 = vmatprep.subr.bf16.mxu1 %v5781_v33  ;;  %v8687_v33 = vld [vmem:[#allocation109_spill] sm:$0xff]  ;;  %v7639_v32 = vmul.f32 %v7311_v39, %v8688_v23  ;;  %v1257_v21 = vmin.f32 %v1129_v47, 1.0 }
 0x2b4   :  { %5314 = vmatpush3.bf16.msra.mxu0 %v5780_v40  ;;  %4086 = vmatprep.mubr.bf16.mxu0 %v1573_v17  ;;  %v7633_v31 = vmul.f32 %v7368_v54, %v8687_v33  ;;  %v1131_v40 = vmax.f32 %v1003_v15, 0.2  ;;  %v5798_v17 = vld [vmem:[#allocation5 + $0x5b8] sm:$0xff]   ;;  %v1096_v15 = vmax.f32 %v7621_v19, 0.2 }
 0x2b5   :  { %4144 = vmatmul.mubr.bf16.gmra.mxu1 %v1542_v57  ;;  %5315 = vmatprep.subr.bf16.mxu0 %v5783_v0  ;;  %v1513_v0 = vpack.c.bf16 %v7617_v62, %v7629_v3  ;;  %v1482_v57 = vpack.c.bf16 %v7625_v56, %v7639_v32  ;;  %v1385_v26 = vmul.f32 %v1257_v21, %v1257_v21  ;;  %v1163_v62 = vmax.f32 %v7645_v61, 0.2 }
 0x2b6   :  { %4151 = vmatprep.mubr.bf16.mxu1 %v1575_v18  ;;  %5354 = vmatpush3.bf16.msra.mxu1 %v5782_v50  ;;  %v1099_v50 = vmax.f32 %v971_v22, 0.2  ;;  %v1515_v6 = vpack.c.bf16 %v7633_v31, %v7645_v61  ;;  %v1225_v18 = vmin.f32 %v1097_v7, 1.0  ;;  %v1195_v5 = vmax.f32 %v7633_v31, 0.2 }
 0x2b7   :  { %5355 = vmatprep.subr.bf16.mxu1 %v5785_v44  ;;  %v5801_v44 = vld [vmem:[#allocation5 + $0x5f0] sm:$0xff]   ;;  %v1224_v19 = vmin.f32 %v1096_v15, 1.0  ;;  %v1192_v7 = vmax.f32 %v7653_v9, 0.2  ;;  %v1291_v23 = vmin.f32 %v1163_v62, 1.0  ;;  %v5825_v62 = vld [vmem:[#allocation5 + $0x5c0] sm:$0xff]  }
 0x2b8   :  { %5316 = vmatpush3.bf16.msra.mxu0 %v5784_v51  ;;  %v1259_v51 = vmin.f32 %v1131_v40, 1.0  ;;  %v1227_v52 = vmin.f32 %v1099_v50, 1.0  ;;  %v1323_v35 = vmin.f32 %v1195_v5, 1.0  ;;  %v5810_v40 = vld [vmem:[#allocation5 + $0x5a0] sm:$0xff]   ;;  %v1194_v61 = vmax.f32 %v7663_v1, 0.2 }
 0x2b9   :  { %5317 = vmatprep.subr.bf16.mxu0 %v5787_v36  ;;  %v5803_v36 = vld [vmem:[#allocation5 + $0x568] sm:$0xff]  }
 0x2ba   :  { %5356 = vmatpush3.bf16.msra.mxu1 %v5786_v25  ;;  %v1128_v25 = vmax.f32 %v7613_v45, 0.2  ;;  %v1355_v45 = vmul.f32 %v1227_v52, %v1227_v52  ;;  %v1451_v50 = vmul.f32 %v1323_v35, %v1323_v35 }
 0x2bb   :  { %4087 = vmatmul.mubr.bf16.gmra.mxu0 %v1572_v16  ;;  %5357 = vmatprep.subr.bf16.mxu1 %v5789_v24  ;;  %v8691_v24 = vld [vmem:[#allocation22_spill] sm:$0xff]  ;;  %v1130_v16 = vmax.f32 %v7625_v56, 0.2 }
 0x2bc   :  { %5318 = vmatpush3.bf16.msra.mxu0 %v5788_v4  ;;  %4192 = vmatprep.mubr.bf16.mxu0 %v1481_v29  ;;  %v7659_v4 = vmul.f32 %v7359_v58, %v8691_v24  ;;  %v1387_v29 = vmul.f32 %v1259_v51, %v1259_v51  ;;  %v5819_v24 = vld [vmem:[#allocation5 + $0x548] sm:$0xff]  }
 0x2bd   :  { %4152 = vmatmul.mubr.bf16.gmra.mxu1 %v1574_v14  ;;  %5319 = vmatprep.subr.bf16.mxu0 %v5791_v38  ;;  %v1353_v38 = vmul.f32 %v1225_v18, %v1225_v18  ;;  %v8693_v14 = vld [vmem:[#allocation24_spill] sm:$0xff]  ;;  %v1258_v27 = vmin.f32 %v1130_v16, 1.0 }
 0x2be   :  { %5358 = vmatpush3.bf16.msra.mxu1 %v5790_v49  ;;  %4257 = vmatprep.mubr.bf16.mxu1 %v1483_v8  ;;  %v1161_v49 = vmax.f32 %v7629_v3, 0.2  ;;  %v1512_v22 = vpack.c.bf16 %v7653_v9, %v7659_v4  ;;  %v5807_v8 = vld [vmem:[#allocation5 + $0x560] sm:$0xff]   ;;  %v1547_v56 = vpack.c.bf16 %v1387_v29, %v1355_v45  ;;  %v5811_v3 = vld [vmem:[#allocation5 + $0x558] sm:$0xff]   ;;  %v1160_v59 = vmax.f32 %v7659_v4, 0.2 }
 0x2bf   :  { %5359 = vmatprep.subr.bf16.mxu1 %v5793_v48  ;;  %v7673_v48 = vmul.f32 %v7359_v58, %v8693_v14  ;;  %v1545_v2 = vpack.c.bf16 %v1385_v26, %v1353_v38  ;;  %v1322_v26 = vmin.f32 %v1194_v61, 1.0  ;;  %v5821_v38 = vld [vmem:[#allocation5 + $0x5c8] sm:$0xff]   ;;  %v8697_v45 = vld [vmem:[#allocation14_spill] sm:$0xff] }
 0x2c0   :  { %5320 = vmatpush3.bf16.msra.mxu0 %v5792_v28  ;;  %v1256_v28 = vmin.f32 %v1128_v25, 1.0  ;;  %v5817_v25 = vld [vmem:[#allocation5 + $0x5d0] sm:$0xff]   ;;  %v5820_v29 = vld [vmem:[#allocation5 + $0x508] sm:$0xff]  }
 0x2c1   :  { %5385 = vmatprep.subr.bf16.mxu0 %v5795_v12  ;;  %v1098_v12 = vmax.f32 %v7639_v32, 0.2  ;;  %v1514_v47 = vpack.c.bf16 %v7663_v1, %v7673_v48  ;;  %v1352_v32 = vmul.f32 %v1224_v19, %v1224_v19  ;;  %v1162_v18 = vmax.f32 %v7673_v48, 0.2  ;;  %v5818_v1 = vld [vmem:[#allocation5 + $0x590] sm:$0xff]   ;;  %v5827_v19 = vld [vmem:[#allocation5 + $0x678] sm:$0xff]  }
 0x2c2   :  { %5360 = vmatpush3.bf16.msra.mxu1 %v5794_v55  ;;  %v5806_v55 = vld [vmem:[#allocation5 + $0x5a8] sm:$0xff]   ;;  %v1384_v33 = vmul.f32 %v1256_v28, %v1256_v28  ;;  %v5823_v28 = vld [vmem:[#allocation5 + $0x540] sm:$0xff]  }
 0x2c3   :  { %4193 = vmatmul.mubr.bf16.vlgmr.msra.gmra.mxu0 %v1480_v20  ;;  %5425 = vmatprep.subr.bf16.mxu1 %v5797_v41  ;;  %v5808_v41 = vld [vmem:[#allocation5 + $0x520] sm:$0xff]   ;;  %v1226_v31 = vmin.f32 %v1098_v12, 1.0  ;;  %v1449_v20 = vmul.f32 %v1321_v43, %v1321_v43  ;;  %v1290_v60 = vmin.f32 %v1162_v18, 1.0 }
 0x2c4   :  { %5386 = vmatpush3.bf16.msra.mxu0 %v5796_v53  ;;  %4200 = vmatprep.mubr.bf16.mxu0 %v1513_v0  ;;  %v1289_v53 = vmin.f32 %v1161_v49, 1.0  ;;  %v5813_v0 = vld [vmem:[#allocation5 + $0x5d8] sm:$0xff]   ;;  %v8695_v49 = vld [vmem:[#allocation50_spill] sm:$0xff] }
 0x2c5   :  { %4258 = vmatmul.mubr.bf16.vlgmr.msra.gmra.mxu1 %v1482_v57  ;;  %5387 = vmatprep.subr.bf16.mxu0 %v5799_v30  ;;  %v1386_v30 = vmul.f32 %v1258_v27, %v1258_v27  ;;  %v1544_v57 = vpack.c.bf16 %v1384_v33, %v1352_v32  ;;  %v973_v5 = vmul.f32 %v7311_v39, %v8695_v49  ;;  %v8698_v27 = vld [vmem:[#allocation39_spill] sm:$0xff]  ;;  %v8700_v33 = vld [vmem:[#allocation49_spill] sm:$0xff]  ;;  %v8708_v49 = vld [vmem:[#allocation80_spill] sm:$0xff] }
 0x2c6   :  { %4265 = vmatprep.mubr.bf16.mxu1 %v1515_v6  ;;  %5426 = vmatpush3.bf16.msra.mxu1 %v5798_v17  ;;  %v5812_v17 = vld [vmem:[#allocation5 + $0x518] sm:$0xff]   ;;  %v1417_v21 = vmul.f32 %v1289_v53, %v1289_v53  ;;  %v5815_v6 = vld [vmem:[#allocation5 + $0x550] sm:$0xff]   ;;  %v8699_v53 = vld [vmem:[#allocation110_spill] sm:$0xff] }
 0x2c7   :  { %5427 = vmatprep.subr.bf16.mxu1 %v5801_v44  ;;  %v1354_v44 = vmul.f32 %v1226_v31, %v1226_v31  ;;  %v7697_v35 = vmul.f32 %v7368_v54, %v8699_v53  ;;  %v7701_v31 = vmul.f32 %v7311_v39, %v8700_v33  ;;  %v8702_v32 = vld [vmem:[#allocation27_spill] sm:$0xff]  ;;  %v1101_v61 = vmax.f32 %v973_v5, 0.2  ;;  %v5841_v33 = vld [vmem:[#allocation5 + $0x6e0] sm:$0xff]  }
 0x2c8   :  { %5388 = vmatpush3.bf16.msra.mxu0 %v5800_v46  ;;  %v1320_v46 = vmin.f32 %v1192_v7, 1.0  ;;  %v1577_v51 = vpack.c.bf16 %v1449_v20, %v1417_v21  ;;  %v8701_v7 = vld [vmem:[#allocation40_spill] sm:$0xff]  ;;  %v5829_v20 = vld [vmem:[#allocation5 + $0x6f8] sm:$0xff]  }
 0x2c9   :  { %5389 = vmatprep.subr.bf16.mxu0 %v5803_v36  ;;  %v1419_v36 = vmul.f32 %v1291_v23, %v1291_v23  ;;  %v1546_v9 = vpack.c.bf16 %v1386_v30, %v1354_v44  ;;  %v5828_v23 = vld [vmem:[#allocation5 + $0x638] sm:$0xff]   ;;  %v7709_v30 = vmul.f32 %v7359_v58, %v8702_v32  ;;  %v5831_v44 = vld [vmem:[#allocation5 + $0x670] sm:$0xff]   ;;  %v5840_v32 = vld [vmem:[#allocation5 + $0x620] sm:$0xff]  }
 0x2ca   :  { %5428 = vmatpush3.bf16.msra.mxu1 %v5802_v11  ;;  %v1288_v11 = vmin.f32 %v1160_v59, 1.0  ;;  %v1448_v4 = vmul.f32 %v1320_v46, %v1320_v46  ;;  %v8705_v46 = vld [vmem:[#allocation29_spill] sm:$0xff] }
 0x2cb   :  { %4201 = vmatmul.mubr.bf16.gmra.mxu0 %v1512_v22  ;;  %5429 = vmatprep.subr.bf16.mxu1 %v5805_v13  ;;  %v1579_v52 = vpack.c.bf16 %v1451_v50, %v1419_v36  ;;  %v8694_v13 = vld [vmem:[#allocation103_spill] sm:$0xff]  ;;  %v8696_v22 = vld [vmem:[#allocation104_spill] sm:$0xff]  ;;  %v7725_v18 = vmul.f32 %v7359_v58, %v8705_v46 }
 0x2cc   :  { %5390 = vmatpush3.bf16.msra.mxu0 %v5804_v34  ;;  %4208 = vmatprep.mubr.bf16.mxu0 %v1545_v2  ;;  %v1005_v15 = vmul.f32 %v7313_v37, %v8694_v13  ;;  %v1416_v16 = vmul.f32 %v1288_v11, %v1288_v11  ;;  %v1450_v34 = vmul.f32 %v1322_v26, %v1322_v26  ;;  %v5822_v2 = vld [vmem:[#allocation5 + $0x588] sm:$0xff]   ;;  %v5832_v26 = vld [vmem:[#allocation5 + $0x630] sm:$0xff]  }
 0x2cd   :  { %4266 = vmatmul.mubr.bf16.gmra.mxu1 %v1514_v47  ;;  %5391 = vmatprep.subr.bf16.mxu0 %v5807_v8  ;;  %v1007_v14 = vmul.f32 %v7313_v37, %v8696_v22  ;;  %v1418_v8 = vmul.f32 %v1290_v60, %v1290_v60  ;;  %v8704_v50 = vld [vmem:[#allocation51_spill] sm:$0xff]  ;;  %v5834_v13 = vld [vmem:[#allocation5 + $0x6b0] sm:$0xff]  }
 0x2ce   :  { %4273 = vmatprep.mubr.bf16.mxu1 %v1547_v56  ;;  %5430 = vmatpush3.bf16.msra.mxu1 %v5806_v55  ;;  %v1576_v48 = vpack.c.bf16 %v1448_v4, %v1416_v16  ;;  %v1485_v12 = vpack.c.bf16 %v1005_v15, %v973_v5  ;;  %v975_v55 = vmul.f32 %v7311_v39, %v8697_v45  ;;  %v8706_v4 = vld [vmem:[#allocation79_spill] sm:$0xff] }
 0x2cf   :  { %5431 = vmatprep.subr.bf16.mxu1 %v5809_v42  ;;  %v1578_v43 = vpack.c.bf16 %v1450_v34, %v1418_v8  ;;  %v5824_v42 = vld [vmem:[#allocation5 + $0x500] sm:$0xff]   ;;  %v7693_v56 = vmul.f32 %v7313_v37, %v8698_v27  ;;  %v7733_v60 = vmul.f32 %v7368_v54, %v8706_v4  ;;  %v1197_v34 = vmax.f32 %v7697_v35, 0.2  ;;  %v5837_v22 = vld [vmem:[#allocation5 + $0x6e8] sm:$0xff]  }
 0x2d0   :  { %5392 = vmatpush3.bf16.msra.mxu0 %v5808_v41  ;;  %v1487_v47 = vpack.c.bf16 %v1007_v14, %v975_v55  ;;  %v5826_v41 = vld [vmem:[#allocation5 + $0x580] sm:$0xff]   ;;  %v7743_v5 = vmul.f32 %v7368_v54, %v8708_v49  ;;  %v5836_v8 = vld [vmem:[#allocation5 + $0x628] sm:$0xff]  }
 0x2d1   :  { %5393 = vmatprep.subr.bf16.mxu0 %v5811_v3  ;;  %v1133_v3 = vmax.f32 %v1005_v15, 0.2  ;;  %v1484_v21 = vpack.c.bf16 %v7693_v56, %v7701_v31  ;;  %v1325_v53 = vmin.f32 %v1197_v34, 1.0 }
 0x2d2   :  { %5432 = vmatpush3.bf16.msra.mxu1 %v5810_v40  ;;  %v7705_v40 = vmul.f32 %v7313_v37, %v8701_v7 }
 0x2d3   :  { %4209 = vmatmul.mubr.bf16.gmra.mxu0 %v1544_v57  ;;  %5433 = vmatprep.subr.bf16.mxu1 %v5813_v0  ;;  %v8703_v0 = vld [vmem:[#allocation111_spill] sm:$0xff]  ;;  %v7719_v57 = vmul.f32 %v7311_v39, %v8704_v50  ;;  %v1261_v36 = vmin.f32 %v1133_v3, 1.0 }
 0x2d4   :  { %5394 = vmatpush3.bf16.msra.mxu0 %v5812_v17  ;;  %4216 = vmatprep.mubr.bf16.mxu0 %v1577_v51  ;;  %v7713_v59 = vmul.f32 %v7368_v54, %v8703_v0  ;;  %v1135_v17 = vmax.f32 %v1007_v14, 0.2  ;;  %v5830_v51 = vld [vmem:[#allocation5 + $0x6b8] sm:$0xff]   ;;  %v1100_v14 = vmax.f32 %v7701_v31, 0.2 }
 0x2d5   :  { %4274 = vmatmul.mubr.bf16.gmra.mxu1 %v1546_v9  ;;  %5395 = vmatprep.subr.bf16.mxu0 %v5815_v6  ;;  %v1517_v6 = vpack.c.bf16 %v7697_v35, %v7709_v30  ;;  %v1486_v9 = vpack.c.bf16 %v7705_v40, %v7719_v57  ;;  %v1389_v15 = vmul.f32 %v1261_v36, %v1261_v36  ;;  %v1167_v35 = vmax.f32 %v7725_v18, 0.2 }
 0x2d6   :  { %4281 = vmatprep.mubr.bf16.mxu1 %v1579_v52  ;;  %5434 = vmatpush3.bf16.msra.mxu1 %v5814_v10  ;;  %v1103_v10 = vmax.f32 %v975_v55, 0.2  ;;  %v1519_v11 = vpack.c.bf16 %v7713_v59, %v7725_v18  ;;  %v1229_v52 = vmin.f32 %v1101_v61, 1.0  ;;  %v1199_v45 = vmax.f32 %v7713_v59, 0.2  ;;  %v5843_v59 = vld [vmem:[#allocation5 + $0x658] sm:$0xff]  }
 0x2d7   :  { %5435 = vmatprep.subr.bf16.mxu1 %v5817_v25  ;;  %v5833_v25 = vld [vmem:[#allocation5 + $0x6f0] sm:$0xff]   ;;  %v1228_v31 = vmin.f32 %v1100_v14, 1.0  ;;  %v1295_v46 = vmin.f32 %v1167_v35, 1.0  ;;  %v5853_v35 = vld [vmem:[#allocation5 + $0x6c8] sm:$0xff]  }
 0x2d8   :  { %5396 = vmatpush3.bf16.msra.mxu0 %v5816_v63  ;;  %v1263_v63 = vmin.f32 %v1135_v17, 1.0  ;;  %v1231_v16 = vmin.f32 %v1103_v10, 1.0  ;;  %v1327_v0 = vmin.f32 %v1199_v45, 1.0 }
 0x2d9   :  { %5397 = vmatprep.subr.bf16.mxu0 %v5819_v24  ;;  %v5835_v24 = vld [vmem:[#allocation5 + $0x668] sm:$0xff]   ;;  %v1356_v36 = vmul.f32 %v1228_v31, %v1228_v31 }
 0x2da   :  { %5436 = vmatpush3.bf16.msra.mxu1 %v5818_v1  ;;  %v1132_v1 = vmax.f32 %v7693_v56, 0.2  ;;  %v1359_v56 = vmul.f32 %v1231_v16, %v1231_v16  ;;  %v1455_v4 = vmul.f32 %v1327_v0, %v1327_v0  ;;  %v5854_v0 = vld [vmem:[#allocation5 + $0x688] sm:$0xff]  }
 0x2db   :  { %4217 = vmatmul.mubr.bf16.gmra.mxu0 %v1576_v48  ;;  %5437 = vmatprep.subr.bf16.mxu1 %v5821_v38  ;;  %v8707_v38 = vld [vmem:[#allocation26_spill] sm:$0xff]  ;;  %v1134_v48 = vmax.f32 %v7705_v40, 0.2 }
 0x2dc   :  { %5398 = vmatpush3.bf16.msra.mxu0 %v5820_v29  ;;  %4322 = vmatprep.mubr.bf16.mxu0 %v1485_v12  ;;  %v7739_v29 = vmul.f32 %v7359_v58, %v8707_v38  ;;  %v1391_v12 = vmul.f32 %v1263_v63, %v1263_v63  ;;  %v5844_v63 = vld [vmem:[#allocation5 + $0x618] sm:$0xff]  }
 0x2dd   :  { %4282 = vmatmul.mubr.bf16.gmra.mxu1 %v1578_v43  ;;  %5399 = vmatprep.subr.bf16.mxu0 %v5823_v28  ;;  %v1357_v28 = vmul.f32 %v1229_v52, %v1229_v52  ;;  %v8709_v43 = vld [vmem:[#allocation28_spill] sm:$0xff]  ;;  %v1262_v7 = vmin.f32 %v1134_v48, 1.0 }
 0x2de   :  { %5438 = vmatpush3.bf16.msra.mxu1 %v5822_v2  ;;  %4387 = vmatprep.mubr.bf16.mxu1 %v1487_v47  ;;  %v1165_v2 = vmax.f32 %v7709_v30, 0.2  ;;  %v1516_v55 = vpack.c.bf16 %v7733_v60, %v7739_v29  ;;  %v5839_v47 = vld [vmem:[#allocation5 + $0x660] sm:$0xff]  }
 0x2df   :  { %5439 = vmatprep.subr.bf16.mxu1 %v5825_v62  ;;  %v7753_v62 = vmul.f32 %v7359_v58, %v8709_v43  ;;  %v1549_v27 = vpack.c.bf16 %v1389_v15, %v1357_v28  ;;  %v1390_v10 = vmul.f32 %v1262_v7, %v1262_v7  ;;  %v5847_v15 = vld [vmem:[#allocation5 + $0x650] sm:$0xff]   ;;  %v8712_v7 = vld [vmem:[#allocation69_spill] sm:$0xff] }
 0x2e0   :  { %5400 = vmatpush3.bf16.msra.mxu0 %v5824_v42  ;;  %v1260_v42 = vmin.f32 %v1132_v1, 1.0  ;;  %v1293_v30 = vmin.f32 %v1165_v2, 1.0  ;;  %v5849_v28 = vld [vmem:[#allocation5 + $0x6d0] sm:$0xff]  }
 0x2e1   :  { %5465 = vmatprep.subr.bf16.mxu0 %v5827_v19  ;;  %v1102_v19 = vmax.f32 %v7719_v57, 0.2  ;;  %v1518_v3 = vpack.c.bf16 %v7743_v5, %v7753_v62  ;;  %v1166_v34 = vmax.f32 %v7753_v62, 0.2  ;;  %v5851_v62 = vld [vmem:[#allocation5 + $0x648] sm:$0xff]  }
 0x2e2   :  { %5440 = vmatpush3.bf16.msra.mxu1 %v5826_v41  ;;  %v5838_v41 = vld [vmem:[#allocation5 + $0x6a8] sm:$0xff]   ;;  %v1388_v61 = vmul.f32 %v1260_v42, %v1260_v42 }
 0x2e3   :  { %4323 = vmatmul.mubr.bf16.vlgmr.msra.gmra.mxu0 %v1484_v21  ;;  %5505 = vmatprep.subr.bf16.mxu1 %v5829_v20  ;;  %v1230_v17 = vmin.f32 %v1102_v19, 1.0  ;;  %v1196_v21 = vmax.f32 %v7733_v60, 0.2  ;;  %v1294_v42 = vmin.f32 %v1166_v34, 1.0  ;;  %v5850_v19 = vld [vmem:[#allocation5 + $0x690] sm:$0xff]  }
 0x2e4   :  { %5466 = vmatpush3.bf16.msra.mxu0 %v5828_v23  ;;  %4330 = vmatprep.mubr.bf16.mxu0 %v1517_v6  ;;  %v1551_v23 = vpack.c.bf16 %v1391_v12, %v1359_v56  ;;  %v1453_v6 = vmul.f32 %v1325_v53, %v1325_v53  ;;  %v1548_v1 = vpack.c.bf16 %v1388_v61, %v1356_v36 }
 0x2e5   :  { %4388 = vmatmul.mubr.bf16.vlgmr.msra.gmra.mxu1 %v1486_v9  ;;  %5467 = vmatprep.subr.bf16.mxu0 %v5831_v44  ;;  %v5842_v44 = vld [vmem:[#allocation5 + $0x6a0] sm:$0xff]   ;;  %v5845_v9 = vld [vmem:[#allocation5 + $0x6d8] sm:$0xff]   ;;  %v1324_v16 = vmin.f32 %v1196_v21, 1.0 }
 0x2e6   :  { %4395 = vmatprep.mubr.bf16.mxu1 %v1519_v11  ;;  %5506 = vmatpush3.bf16.msra.mxu1 %v5830_v51  ;;  %v1198_v11 = vmax.f32 %v7743_v5, 0.2  ;;  %v1423_v5 = vmul.f32 %v1295_v46, %v1295_v46  ;;  %v5857_v21 = vld [vmem:[#allocation5 + $0x6c0] sm:$0xff]  }
 0x2e7   :  { %5507 = vmatprep.subr.bf16.mxu1 %v5833_v25  ;;  %v1164_v25 = vmax.f32 %v7739_v29, 0.2 }
 0x2e8   :  { %5468 = vmatpush3.bf16.msra.mxu0 %v5832_v26  ;;  %v1326_v2 = vmin.f32 %v1198_v11, 1.0  ;;  %v1583_v45 = vpack.c.bf16 %v1455_v4, %v1423_v5  ;;  %v8717_v11 = vld [vmem:[#allocation68_spill] sm:$0xff] }
 0x2e9   :  { %5469 = vmatprep.subr.bf16.mxu0 %v5835_v24  ;;  %v1421_v24 = vmul.f32 %v1293_v30, %v1293_v30  ;;  %v1292_v12 = vmin.f32 %v1164_v25, 1.0 }
 0x2ea   :  { %5508 = vmatpush3.bf16.msra.mxu1 %v5834_v13  ;;  %v1358_v13 = vmul.f32 %v1230_v17, %v1230_v17  ;;  %v1454_v53 = vmul.f32 %v1326_v2, %v1326_v2  ;;  %v5865_v2 = vld [vmem:[#allocation5 + $0x7f0] sm:$0xff]  }
 0x2eb   :  { %4331 = vmatmul.mubr.bf16.gmra.mxu0 %v1516_v55  ;;  %5509 = vmatprep.subr.bf16.mxu1 %v5837_v22  ;;  %v5001_v40 = vpop.f32.mrf.mxu0  ;;  %v5041_v20 = vpop.f32.mrf.mxu1  ;;  %v1581_v29 = vpack.c.bf16 %v1453_v6, %v1421_v24  ;;  %v5846_v22 = vld [vmem:[#allocation5 + $0x698] sm:$0xff]   ;;  %v5848_v55 = vld [vmem:[#allocation5 + $0x610] sm:$0xff]   ;;  %v8714_v6 = vld [vmem:[#allocation66_spill] sm:$0xff] }
 0x2ec   :  { %5470 = vmatpush3.bf16.msra.mxu0 %v5836_v8  ;;  %4338 = vmatprep.mubr.bf16.mxu0 %v1549_v27  ;;  %v1550_v8 = vpack.c.bf16 %v1390_v10, %v1358_v13  ;;  %v8710_v27 = vld [vmem:[#allocation67_spill] sm:$0xff]  ;;  %v7777_v46 = vmul.f32 %v7313_v37, %v8714_v6 }
 0x2ed   :  { %4396 = vmatmul.mubr.bf16.gmra.mxu1 %v1518_v3  ;;  %5471 = vmatprep.subr.bf16.mxu0 %v5839_v47  ;;  %v5002_v50 = vpop.f32.mrf.mxu0  ;;  %v5042_v57 = vpop.f32.mrf.mxu1  ;;  %v1452_v47 = vmul.f32 %v1324_v16, %v1324_v16  ;;  %v1009_v56 = vmul.f32 %v7313_v37, %v8710_v27  ;;  %v5852_v3 = vld [vmem:[#allocation5 + $0x608] sm:$0xff]  }
 0x2ee   :  { %4403 = vmatprep.mubr.bf16.mxu1 %v1551_v23  ;;  %5510 = vmatpush3.bf16.msra.mxu1 %v5838_v41  ;;  %v5003_v18 = vadd.f32 %v5002_v50, %v5001_v40  ;;  %v5043_v51 = vadd.f32 %v5042_v57, %v5041_v20  ;;  %v1420_v41 = vmul.f32 %v1292_v12, %v1292_v12  ;;  %v5856_v57 = vld [vmem:[#allocation5 + $0x600] sm:$0xff]   ;;  %v8718_v24 = vld [vmem:[#allocation31_spill] sm:$0xff] }
 0x2ef   :  { %5511 = vmatprep.subr.bf16.mxu1 %v5841_v33  ;;  %v5004_v26 = vpop.f32.mrf.mxu0  ;;  %v5044_v52 = vpop.f32.mrf.mxu1  ;;  %v8711_v33 = vld [vmem:[#allocation15_spill] sm:$0xff]  ;;  %v1011_v40 = vmul.f32 %v7313_v37, %v8712_v7  ;;  %v1422_v23 = vmul.f32 %v1294_v42, %v1294_v42  ;;  %v1137_v10 = vmax.f32 %v1009_v56, 0.2  ;;  %v7793_v4 = vmul.f32 %v7359_v58, %v8718_v24 }
 0x2f0   :  { %5472 = vmatpush3.bf16.msra.mxu0 %v5840_v32  ;;  %v7762_v60 = vadd.f32 %v5043_v51, %v5003_v18  ;;  %v977_v31 = vmul.f32 %v7311_v39, %v8711_v33  ;;  %v1580_v20 = vpack.c.bf16 %v1452_v47, %v1420_v41  ;;  %v5855_v32 = vld [vmem:[#allocation5 + $0x640] sm:$0xff]   ;;  %v5867_v42 = vld [vmem:[#allocation5 + $0x768] sm:$0xff]   ;;  %v5866_v41 = vld [vmem:[#allocation5 + $0x7b0] sm:$0xff]  }
 0x2f1   :  { %5473 = vmatprep.subr.bf16.mxu0 %v5843_v59  ;;  %v5005_v38 = vpop.f32.mrf.mxu0  ;;  %v5045_v49 = vpop.f32.mrf.mxu1  ;;  %v8713_v59 = vld [vmem:[#allocation54_spill] sm:$0xff]  ;;  %v1582_v17 = vpack.c.bf16 %v1454_v53, %v1422_v23  ;;  %v1139_v16 = vmax.f32 %v1011_v40, 0.2  ;;  %v8724_v7 = vld [vmem:[#allocation83_spill] sm:$0xff] }
 0x2f2   :  { %5512 = vmatpush3.bf16.msra.mxu1 %v5842_v44  ;;  %v5006_v14 = vadd.f32 %v5005_v38, %v5004_v26  ;;  %v5046_v48 = vadd.f32 %v5045_v49, %v5044_v52  ;;  %v1489_v30 = vpack.c.bf16 %v1009_v56, %v977_v31  ;;  %v979_v61 = vmul.f32 %v7311_v39, %v8713_v59  ;;  %v5859_v44 = vld [vmem:[#allocation5 + $0x778] sm:$0xff]   ;;  %v5858_v18 = vld [vmem:[#allocation5 + $0x680] sm:$0xff]  }
 0x2f3   :  { %4339 = vmatmul.mubr.bf16.gmra.mxu0 %v1548_v1  ;;  %5513 = vmatprep.subr.bf16.mxu1 %v5845_v9  ;;  %v8715_v51 = vld [vmem:[#allocation82_spill] sm:$0xff]  ;;  %v8716_v9 = vld [vmem:[#allocation52_spill] sm:$0xff]  ;;  %v7789_v26 = vmul.f32 %v7313_v37, %v8717_v11  ;;  %v5861_v52 = vld [vmem:[#allocation5 + $0x7f8] sm:$0xff]   ;;  %v1267_v47 = vmin.f32 %v1139_v16, 1.0  ;;  %v1136_v56 = vmax.f32 %v7777_v46, 0.2 }
 0x2f4   :  { %5474 = vmatpush3.bf16.msra.mxu0 %v5844_v63  ;;  %4346 = vmatprep.mubr.bf16.mxu0 %v1581_v29  ;;  %v7765_v43 = vadd.f32 %v5046_v48, %v5006_v14  ;;  %v1491_v50 = vpack.c.bf16 %v1011_v40, %v979_v61  ;;  %v7781_v36 = vmul.f32 %v7368_v54, %v8715_v51  ;;  %v5860_v63 = vld [vmem:[#allocation5 + $0x738] sm:$0xff]   ;;  %v8719_v1 = vld [vmem:[#allocation84_spill] sm:$0xff]  ;;  %v8723_v33 = vld [vmem:[#allocation30_spill] sm:$0xff] }
 0x2f5   :  { %4404 = vmatmul.mubr.bf16.gmra.mxu1 %v1550_v8  ;;  %5475 = vmatprep.subr.bf16.mxu0 %v5847_v15  ;;  %v7785_v25 = vmul.f32 %v7311_v39, %v8716_v9  ;;  %v7797_v13 = vmul.f32 %v7368_v54, %v8719_v1  ;;  %v1105_v15 = vmax.f32 %v977_v31, 0.2  ;;  %v8720_v38 = vld [vmem:[#allocation53_spill] sm:$0xff]  ;;  %v5863_v29 = vld [vmem:[#allocation5 + $0x770] sm:$0xff]   ;;  %v1265_v8 = vmin.f32 %v1137_v10, 1.0  ;;  %v5872_v1 = vld [vmem:[#allocation5 + $0x720] sm:$0xff]  }
 0x2f6   :  { %4411 = vmatprep.mubr.bf16.mxu1 %v1583_v45  ;;  %5514 = vmatpush3.bf16.msra.mxu1 %v5846_v22  ;;  %v7803_v49 = vmul.f32 %v7311_v39, %v8720_v38  ;;  %v1521_v5 = vpack.c.bf16 %v7781_v36, %v7793_v4  ;;  %v8721_v22 = vld [vmem:[#allocation33_spill] sm:$0xff]  ;;  %v7823_v31 = vmul.f32 %v7359_v58, %v8723_v33  ;;  %v1264_v6 = vmin.f32 %v1136_v56, 1.0 }
 0x2f7   :  { %5515 = vmatprep.subr.bf16.mxu1 %v5849_v28  ;;  %v1488_v34 = vpack.c.bf16 %v7777_v46, %v7785_v25  ;;  %v7809_v14 = vmul.f32 %v7359_v58, %v8721_v22  ;;  %v5862_v48 = vld [vmem:[#allocation5 + $0x7b8] sm:$0xff]   ;;  %v1107_v28 = vmax.f32 %v979_v61, 0.2  ;;  %v1393_v53 = vmul.f32 %v1265_v8, %v1265_v8 }
 0x2f8   :  { %5476 = vmatpush3.bf16.msra.mxu0 %v5848_v55  ;;  %v1490_v12 = vpack.c.bf16 %v7789_v26, %v7803_v49  ;;  %v5864_v55 = vld [vmem:[#allocation5 + $0x730] sm:$0xff]   ;;  %v7827_v40 = vmul.f32 %v7368_v54, %v8724_v7  ;;  %v1104_v23 = vmax.f32 %v7785_v25, 0.2  ;;  %v1395_v59 = vmul.f32 %v1267_v47, %v1267_v47  ;;  %v5875_v38 = vld [vmem:[#allocation5 + $0x758] sm:$0xff]  }
 0x2f9   :  { %5477 = vmatprep.subr.bf16.mxu0 %v5851_v62  ;;  %v1523_v45 = vpack.c.bf16 %v7797_v13, %v7809_v14  ;;  %v1233_v62 = vmin.f32 %v1105_v15, 1.0  ;;  %v1169_v61 = vmax.f32 %v7793_v4, 0.2  ;;  %v1106_v46 = vmax.f32 %v7803_v49, 0.2  ;;  %v5879_v7 = vld [vmem:[#allocation5 + $0x750] sm:$0xff]  }
 0x2fa   :  { %5516 = vmatpush3.bf16.msra.mxu1 %v5850_v19  ;;  %v8722_v19 = vld [vmem:[#allocation81_spill] sm:$0xff]  ;;  %v1171_v9 = vmax.f32 %v7809_v14, 0.2  ;;  %v1392_v49 = vmul.f32 %v1264_v6, %v1264_v6  ;;  %v1168_v47 = vmax.f32 %v7823_v31, 0.2 }
 0x2fb   :  { %4347 = vmatmul.mubr.bf16.gmra.mxu0 %v1580_v20  ;;  %5517 = vmatprep.subr.bf16.mxu1 %v5853_v35  ;;  %v7817_v27 = vmul.f32 %v7368_v54, %v8722_v19  ;;  %v1235_v35 = vmin.f32 %v1107_v28, 1.0  ;;  %v5869_v20 = vld [vmem:[#allocation5 + $0x7e8] sm:$0xff]  }
 0x2fc   :  { %5478 = vmatpush3.bf16.msra.mxu0 %v5852_v3  ;;  %4452 = vmatprep.mubr.bf16.mxu0 %v1489_v30  ;;  %v1201_v3 = vmax.f32 %v7781_v36, 0.2  ;;  %v5868_v30 = vld [vmem:[#allocation5 + $0x728] sm:$0xff]   ;;  %v1299_v28 = vmin.f32 %v1171_v9, 1.0 }
 0x2fd   :  { %4412 = vmatmul.mubr.bf16.gmra.mxu1 %v1582_v17  ;;  %5479 = vmatprep.subr.bf16.mxu0 %v5855_v32  ;;  %v1138_v32 = vmax.f32 %v7789_v26, 0.2  ;;  %v1203_v17 = vmax.f32 %v7797_v13, 0.2  ;;  %v1363_v51 = vmul.f32 %v1235_v35, %v1235_v35  ;;  %v5870_v36 = vld [vmem:[#allocation5 + $0x7a8] sm:$0xff]   ;;  %v1297_v13 = vmin.f32 %v1169_v61, 1.0 }
 0x2fe   :  { %5518 = vmatpush3.bf16.msra.mxu1 %v5854_v0  ;;  %4517 = vmatprep.mubr.bf16.mxu1 %v1491_v50  ;;  %v1361_v0 = vmul.f32 %v1233_v62, %v1233_v62  ;;  %v8725_v50 = vld [vmem:[#allocation32_spill] sm:$0xff]  ;;  %v1329_v10 = vmin.f32 %v1201_v3, 1.0  ;;  %v5877_v62 = vld [vmem:[#allocation5 + $0x7d8] sm:$0xff]  }
 0x2ff   :  { %5519 = vmatprep.subr.bf16.mxu1 %v5857_v21  ;;  %v1520_v21 = vpack.c.bf16 %v7817_v27, %v7823_v31  ;;  %v1266_v24 = vmin.f32 %v1138_v32, 1.0  ;;  %v1555_v4 = vpack.c.bf16 %v1395_v59, %v1363_v51  ;;  %v1331_v15 = vmin.f32 %v1203_v17, 1.0 }
 0x300   :  { %5480 = vmatpush3.bf16.msra.mxu0 %v5856_v57  ;;  %v7837_v57 = vmul.f32 %v7359_v58, %v8725_v50  ;;  %v1457_v8 = vmul.f32 %v1329_v10, %v1329_v10  ;;  %v1425_v56 = vmul.f32 %v1297_v13, %v1297_v13  ;;  %v1296_v50 = vmin.f32 %v1168_v47, 1.0 }
 0x301   :  { %5545 = vmatprep.subr.bf16.mxu0 %v5859_v44  ;;  %v5871_v44 = vld [vmem:[#allocation5 + $0x760] sm:$0xff]  }
 0x302   :  { %5520 = vmatpush3.bf16.msra.mxu1 %v5858_v18  ;;  %v1553_v18 = vpack.c.bf16 %v1393_v53, %v1361_v0  ;;  %v1522_v26 = vpack.c.bf16 %v7827_v40, %v7837_v57  ;;  %v5878_v0 = vld [vmem:[#allocation5 + $0x798] sm:$0xff]  }
 0x303   :  { %4453 = vmatmul.mubr.bf16.vlgmr.msra.gmra.mxu0 %v1488_v34  ;;  %5585 = vmatprep.subr.bf16.mxu1 %v5861_v52  ;;  %v5873_v52 = vld [vmem:[#allocation5 + $0x7e0] sm:$0xff]  }
 0x304   :  { %5546 = vmatpush3.bf16.msra.mxu0 %v5860_v63  ;;  %4460 = vmatprep.mubr.bf16.mxu0 %v1521_v5  ;;  %v1232_v63 = vmin.f32 %v1104_v23, 1.0  ;;  %v1200_v5 = vmax.f32 %v7817_v27, 0.2  ;;  %v5876_v27 = vld [vmem:[#allocation5 + $0x718] sm:$0xff]   ;;  %v1170_v23 = vmax.f32 %v7837_v57, 0.2 }
 0x305   :  { %4518 = vmatmul.mubr.bf16.vlgmr.msra.gmra.mxu1 %v1490_v12  ;;  %5547 = vmatprep.subr.bf16.mxu0 %v5863_v29  ;;  %v1234_v29 = vmin.f32 %v1106_v46, 1.0  ;;  %v5880_v57 = vld [vmem:[#allocation5 + $0x710] sm:$0xff]  }
 0x306   :  { %4525 = vmatprep.mubr.bf16.mxu1 %v1523_v45  ;;  %5586 = vmatpush3.bf16.msra.mxu1 %v5862_v48  ;;  %v5874_v48 = vld [vmem:[#allocation5 + $0x7a0] sm:$0xff]   ;;  %v1360_v45 = vmul.f32 %v1232_v63, %v1232_v63  ;;  %v1298_v9 = vmin.f32 %v1170_v23, 1.0 }
 0x307   :  { %5587 = vmatprep.subr.bf16.mxu1 %v5865_v2  ;;  %v1362_v33 = vmul.f32 %v1234_v29, %v1234_v29  ;;  %v8728_v29 = vld [vmem:[#allocation76_spill] sm:$0xff] }
 0x308   :  { %5548 = vmatpush3.bf16.msra.mxu0 %v5864_v55  ;;  %v1394_v55 = vmul.f32 %v1266_v24, %v1266_v24  ;;  %v1552_v3 = vpack.c.bf16 %v1392_v49, %v1360_v45 }
 0x309   :  { %5549 = vmatprep.subr.bf16.mxu0 %v5867_v42  ;;  %v1202_v42 = vmax.f32 %v7827_v40, 0.2  ;;  %v1427_v40 = vmul.f32 %v1299_v28, %v1299_v28  ;;  %v5887_v28 = vld [vmem:[#allocation5 + $0x740] sm:$0xff]  }
 0x30a   :  { %5588 = vmatpush3.bf16.msra.mxu1 %v5866_v41  ;;  %v1459_v41 = vmul.f32 %v1331_v15, %v1331_v15  ;;  %v1554_v17 = vpack.c.bf16 %v1394_v55, %v1362_v33  ;;  %v5885_v15 = vld [vmem:[#allocation5 + $0x7c8] sm:$0xff]  }
 0x30b   :  { %v5007_v25 = vpop.f32.mrf.mxu0  ;;  %v5047_v11 = vpop.f32.mrf.mxu1  ;;  %4461 = vmatmul.mubr.bf16.gmra.mxu0 %v1520_v21  ;;  %5589 = vmatprep.subr.bf16.mxu1 %v5869_v20  ;;  %v1328_v20 = vmin.f32 %v1200_v5, 1.0  ;;  %v5881_v21 = vld [vmem:[#allocation5 + $0x7d0] sm:$0xff]   ;;  %v7861_v5 = vmul.f32 %v7313_v37, %v8728_v29  ;;  %v5886_v55 = vld [vmem:[#allocation5 + $0x788] sm:$0xff]  }
 0x30c   :  { %5550 = vmatpush3.bf16.msra.mxu0 %v5868_v30  ;;  %4468 = vmatprep.mubr.bf16.mxu0 %v1553_v18  ;;  %v1585_v30 = vpack.c.bf16 %v1457_v8, %v1425_v56  ;;  %v1587_v46 = vpack.c.bf16 %v1459_v41, %v1427_v40  ;;  %v1426_v8 = vmul.f32 %v1298_v9, %v1298_v9  ;;  %v5889_v41 = vld [vmem:[#allocation5 + $0x7c0] sm:$0xff]  }
 0x30d   :  { %4526 = vmatmul.mubr.bf16.gmra.mxu1 %v1522_v26  ;;  %v5008_v16 = vpop.f32.mrf.mxu0  ;;  %v5048_v34 = vpop.f32.mrf.mxu1  ;;  %5551 = vmatprep.subr.bf16.mxu0 %v5871_v44  ;;  %v1330_v44 = vmin.f32 %v1202_v42, 1.0  ;;  %v1456_v10 = vmul.f32 %v1328_v20, %v1328_v20  ;;  %v5882_v26 = vld [vmem:[#allocation5 + $0x790] sm:$0xff]   ;;  %v8730_v20 = vld [vmem:[#allocation70_spill] sm:$0xff] }
 0x30e   :  { %4533 = vmatprep.mubr.bf16.mxu1 %v1555_v4  ;;  %5590 = vmatpush3.bf16.msra.mxu1 %v5870_v36  ;;  %v5009_v22 = vadd.f32 %v5008_v16, %v5007_v25  ;;  %v5049_v14 = vadd.f32 %v5048_v34, %v5047_v11  ;;  %v5883_v36 = vld [vmem:[#allocation5 + $0x748] sm:$0xff]   ;;  %v7874_v23 = vmul.f32 %v7313_v37, %v8730_v20  ;;  %v5890_v40 = vld [vmem:[#allocation5 + $0x780] sm:$0xff]  }
 0x30f   :  { %v5010_v12 = vpop.f32.mrf.mxu0  ;;  %v5050_v2 = vpop.f32.mrf.mxu1  ;;  %5591 = vmatprep.subr.bf16.mxu1 %v5873_v52  ;;  %v8726_v52 = vld [vmem:[#allocation72_spill] sm:$0xff]  ;;  %v1458_v13 = vmul.f32 %v1330_v44, %v1330_v44  ;;  %v5884_v34 = vld [vmem:[#allocation5 + $0x708] sm:$0xff]   ;;  %v8733_v44 = vld [vmem:[#allocation74_spill] sm:$0xff] }
 0x310   :  { %v7846_v19 = vadd.f32 %v5049_v14, %v5009_v22  ;;  %5552 = vmatpush3.bf16.msra.mxu0 %v5872_v1  ;;  %v1013_v63 = vmul.f32 %v7313_v37, %v8726_v52  ;;  %v1424_v1 = vmul.f32 %v1296_v50, %v1296_v50 }
 0x311   :  { %v5011_v53 = vpop.f32.mrf.mxu0  ;;  %v5051_v35 = vpop.f32.mrf.mxu1  ;;  %5553 = vmatprep.subr.bf16.mxu0 %v5875_v38  ;;  %v8727_v38 = vld [vmem:[#allocation17_spill] sm:$0xff]  ;;  %v1586_v56 = vpack.c.bf16 %v1458_v13, %v1426_v8  ;;  %v8739_v8 = vld [vmem:[#allocation36_spill] sm:$0xff] }
 0x312   :  { %5592 = vmatpush3.bf16.msra.mxu1 %v5874_v48  ;;  %v5012_v32 = vadd.f32 %v5011_v53, %v5010_v12  ;;  %v5052_v31 = vadd.f32 %v5051_v35, %v5050_v2  ;;  %v7857_v49 = vmul.f32 %v7311_v39, %v8727_v38  ;;  %v1584_v48 = vpack.c.bf16 %v1456_v10, %v1424_v1  ;;  %v8735_v10 = vld [vmem:[#allocation88_spill] sm:$0xff]  ;;  %v8737_v38 = vld [vmem:[#allocation99_spill] sm:$0xff] }
 0x313   :  { %v5013_v59 = vpop.f32.mrf.mxu0  ;;  %v5053_v61 = vpop.f32.mrf.mxu1  ;;  %4469 = vmatmul.mubr.bf16.gmra.mxu0 %v1552_v3  ;;  %5593 = vmatprep.subr.bf16.mxu1 %v5877_v62  ;;  %v8729_v62 = vld [vmem:[#allocation21_spill] sm:$0xff]  ;;  %v5888_v3 = vld [vmem:[#allocation5 + $0x700] sm:$0xff]   ;;  %v7897_v9 = vmul.f32 %v7368_v54, %v8735_v10 }
 0x314   :  { %v7849_v6 = vadd.f32 %v5052_v31, %v5012_v32  ;;  %5554 = vmatpush3.bf16.msra.mxu0 %v5876_v27  ;;  %4476 = vmatprep.mubr.bf16.mxu0 %v1585_v30  ;;  %v1493_v45 = vpack.c.bf16 %v1013_v63, %v7857_v49  ;;  %v7866_v47 = vmul.f32 %v7311_v39, %v8729_v62  ;;  %v1141_v32 = vmax.f32 %v1013_v63, 0.2  ;;  %v8736_v63 = vld [vmem:[#allocation19_spill] sm:$0xff] }
 0x315   :  { %4534 = vmatmul.mubr.bf16.gmra.mxu1 %v1554_v17  ;;  %v5014_v18 = vpop.f32.mrf.mxu0  ;;  %v5054_v51 = vpop.f32.mrf.mxu1  ;;  %5555 = vmatprep.subr.bf16.mxu0 %v5879_v7 }
 0x316   :  { %4541 = vmatprep.mubr.bf16.mxu1 %v1587_v46  ;;  %5594 = vmatpush3.bf16.msra.mxu1 %v5878_v0  ;;  %v5015_v25 = vadd.f32 %v5014_v18, %v5013_v59  ;;  %v5055_v11 = vadd.f32 %v5054_v51, %v5053_v61  ;;  %v1495_v35 = vpack.c.bf16 %v7861_v5, %v7866_v47  ;;  %v8731_v0 = vld [vmem:[#allocation86_spill] sm:$0xff]  ;;  %v8734_v51 = vld [vmem:[#allocation35_spill] sm:$0xff]  ;;  %v1111_v1 = vmax.f32 %v7866_v47, 0.2 }
 0x317   :  { %v5016_v24 = vpop.f32.mrf.mxu0  ;;  %v5056_v4 = vpop.f32.mrf.mxu1  ;;  %5595 = vmatprep.subr.bf16.mxu1 %v5881_v21  ;;  %v7878_v59 = vmul.f32 %v7368_v54, %v8731_v0  ;;  %v8732_v21 = vld [vmem:[#allocation55_spill] sm:$0xff]  ;;  %v7886_v46 = vmul.f32 %v7313_v37, %v8733_v44 }
 0x318   :  { %v7853_v16 = vadd.f32 %v5055_v11, %v5015_v25  ;;  %5556 = vmatpush3.bf16.msra.mxu0 %v5880_v57  ;;  %v7882_v50 = vmul.f32 %v7311_v39, %v8732_v21  ;;  %v1109_v57 = vmax.f32 %v7857_v49, 0.2  ;;  %v1143_v25 = vmax.f32 %v7861_v5, 0.2 }
 0x319   :  { %v5017_v22 = vpop.f32.mrf.mxu0  ;;  %v5057_v14 = vpop.f32.mrf.mxu1  ;;  %5557 = vmatprep.subr.bf16.mxu0 %v5883_v36  ;;  %v7893_v36 = vmul.f32 %v7359_v58, %v8734_v51  ;;  %v1047_v49 = vmul.f32 %v7359_v58, %v8737_v38 }
 0x31a   :  { %5596 = vmatpush3.bf16.msra.mxu1 %v5882_v26  ;;  %v5018_v12 = vadd.f32 %v5017_v22, %v5016_v24  ;;  %v5058_v2 = vadd.f32 %v5057_v14, %v5056_v4  ;;  %v1492_v52 = vpack.c.bf16 %v7874_v23, %v7882_v50  ;;  %v982_v24 = vmul.f32 %v7311_v39, %v8736_v63  ;;  %v8738_v14 = vld [vmem:[#allocation34_spill] sm:$0xff] }
 0x31b   :  { %v5019_v42 = vpop.f32.mrf.mxu0  ;;  %v5059_v27 = vpop.f32.mrf.mxu1  ;;  %4477 = vmatmul.mubr.bf16.gmra.mxu0 %v1584_v48  ;;  %5597 = vmatprep.subr.bf16.mxu1 %v5885_v15  ;;  %v1269_v4 = vmin.f32 %v1141_v32, 1.0  ;;  %v7912_v48 = vmul.f32 %v7359_v58, %v8738_v14  ;;  %v1108_v62 = vmax.f32 %v7882_v50, 0.2  ;;  %v1205_v32 = vmax.f32 %v7878_v59, 0.2 }
 0x31c   :  { %v7868_v53 = vadd.f32 %v5058_v2, %v5018_v12  ;;  %5558 = vmatpush3.bf16.msra.mxu0 %v5884_v34  ;;  %4582 = vmatprep.mubr.bf16.mxu0 %v1493_v45  ;;  %v1525_v34 = vpack.c.bf16 %v7878_v59, %v7893_v36  ;;  %v1494_v22 = vpack.c.bf16 %v7886_v46, %v982_v24  ;;  %v1237_v12 = vmin.f32 %v1109_v57, 1.0 }
 0x31d   :  { %4542 = vmatmul.mubr.bf16.gmra.mxu1 %v1586_v56  ;;  %v5020_v33 = vpop.f32.mrf.mxu0  ;;  %v5060_v7 = vpop.f32.mrf.mxu1  ;;  %5559 = vmatprep.subr.bf16.mxu0 %v5887_v28  ;;  %v7916_v28 = vmul.f32 %v7359_v58, %v8739_v8  ;;  %v1527_v45 = vpack.c.bf16 %v7897_v9, %v1047_v49  ;;  %v1110_v20 = vmax.f32 %v982_v24, 0.2  ;;  %v1173_v21 = vmax.f32 %v7893_v36, 0.2 }
 0x31e   :  { %5598 = vmatpush3.bf16.msra.mxu1 %v5886_v55  ;;  %4647 = vmatprep.mubr.bf16.mxu1 %v1495_v35  ;;  %v5021_v31 = vadd.f32 %v5020_v33, %v5019_v42  ;;  %v5061_v30 = vadd.f32 %v5060_v7, %v5059_v27  ;;  %v1271_v55 = vmin.f32 %v1143_v25, 1.0  ;;  %v8740_v27 = vld [vmem:[#allocation85_spill] sm:$0xff]  ;;  %v1239_v35 = vmin.f32 %v1111_v1, 1.0 }
 0x31f   :  { %v5022_v61 = vpop.f32.mrf.mxu0  ;;  %v5062_v17 = vpop.f32.mrf.mxu1  ;;  %5599 = vmatprep.subr.bf16.mxu1 %v5889_v41  ;;  %v7924_v56 = vmul.f32 %v7368_v54, %v8740_v27  ;;  %v1397_v41 = vmul.f32 %v1269_v4, %v1269_v4  ;;  %v1175_v44 = vmax.f32 %v1047_v49, 0.2  ;;  %v1207_v57 = vmax.f32 %v7897_v9, 0.2 }
 0x320   :  { %v7889_v18 = vadd.f32 %v5061_v30, %v5021_v31  ;;  %5560 = vmatpush3.bf16.msra.mxu0 %v5888_v3  ;;  %v1140_v3 = vmax.f32 %v7874_v23, 0.2  ;;  %v1399_v23 = vmul.f32 %v1271_v55, %v1271_v55  ;;  %v1333_v24 = vmin.f32 %v1205_v32, 1.0 }
 0x321   :  { %v5023_v11 = vpop.f32.mrf.mxu0  ;;  %v5063_v26 = vpop.f32.mrf.mxu1  ;;  %v1524_v59 = vpack.c.bf16 %v7924_v56, %v7912_v48  ;;  %v1236_v9 = vmin.f32 %v1108_v62, 1.0  ;;  %v1238_v1 = vmin.f32 %v1110_v20, 1.0  ;;  %v1301_v38 = vmin.f32 %v1173_v21, 1.0 }
 0x322   :  { %5600 = vmatpush3.bf16.msra.mxu1 %v5890_v40  ;;  %v5024_v13 = vadd.f32 %v5023_v11, %v5022_v61  ;;  %v5064_v15 = vadd.f32 %v5063_v26, %v5062_v17  ;;  %v8741_v40 = vld [vmem:[#allocation87_spill] sm:$0xff]  ;;  %v1365_v61 = vmul.f32 %v1237_v12, %v1237_v12  ;;  %v1142_v17 = vmax.f32 %v7886_v46, 0.2 }
 0x323   :  { %v5081_v29 = vpop.f32.mrf.mxu0  ;;  %v5121_v5 = vpop.f32.mrf.mxu1  ;;  %4583 = vmatmul.mubr.bf16.vlgmr.msra.gmra.mxu0 %v1492_v52  ;;  %v7930_v0 = vmul.f32 %v7368_v54, %v8741_v40  ;;  %v1367_v11 = vmul.f32 %v1239_v35, %v1239_v35  ;;  %v1268_v26 = vmin.f32 %v1140_v3, 1.0  ;;  %v1335_v49 = vmin.f32 %v1207_v57, 1.0 }
 0x324   :  { %v7918_v2 = vadd.f32 %v5064_v15, %v5024_v13  ;;  %4590 = vmatprep.mubr.bf16.mxu0 %v1525_v34  ;;  %v1557_v25 = vpack.c.bf16 %v1397_v41, %v1365_v61  ;;  %v1270_v13 = vmin.f32 %v1142_v17, 1.0  ;;  %v1303_v14 = vmin.f32 %v1175_v44, 1.0 }
 0x325   :  { %4648 = vmatmul.mubr.bf16.vlgmr.msra.gmra.mxu1 %v1494_v22  ;;  %v5082_v47 = vpop.f32.mrf.mxu0  ;;  %v5122_v42 = vpop.f32.mrf.mxu1  ;;  %v1559_v34 = vpack.c.bf16 %v1399_v23, %v1367_v11  ;;  %v1396_v22 = vmul.f32 %v1268_v26, %v1268_v26  ;;  %v1204_v8 = vmax.f32 %v7924_v56, 0.2  ;;  %v1461_v62 = vmul.f32 %v1333_v24, %v1333_v24 }
 0x326   :  { %4655 = vmatprep.mubr.bf16.mxu1 %v1527_v45  ;;  %v5083_v33 = vadd.f32 %v5082_v47, %v5081_v29  ;;  %v5123_v7 = vadd.f32 %v5122_v42, %v5121_v5  ;;  %v1398_v27 = vmul.f32 %v1270_v13, %v1270_v13  ;;  %v1172_v41 = vmax.f32 %v7912_v48, 0.2 }
 0x327   :  { %v5084_v31 = vpop.f32.mrf.mxu0  ;;  %v5124_v30 = vpop.f32.mrf.mxu1  ;;  %v1206_v35 = vmax.f32 %v7930_v0, 0.2  ;;  %v1463_v20 = vmul.f32 %v1335_v49, %v1335_v49  ;;  %v1332_v40 = vmin.f32 %v1204_v8, 1.0  ;;  %v1174_v61 = vmax.f32 %v7916_v28, 0.2 }
 0x328   :  { %v3805_v50 = vadd.f32 %v5083_v33, %v7762_v60  ;;  %v1526_v60 = vpack.c.bf16 %v7930_v0, %v7916_v28  ;;  %v1366_v33 = vmul.f32 %v1238_v1, %v1238_v1 }
 0x329   :  { %v5085_v51 = vpop.f32.mrf.mxu0  ;;  %v5125_v10 = vpop.f32.mrf.mxu1  ;;  %v1334_v57 = vmin.f32 %v1206_v35, 1.0  ;;  %v1460_v11 = vmul.f32 %v1332_v40, %v1332_v40  ;;  %v1302_v28 = vmin.f32 %v1174_v61, 1.0 }
 0x32a   :  { %v7938_v52 = vadd.f32 %v5123_v7, %v3805_v50  ;;  %v5086_v63 = vadd.f32 %v5085_v51, %v5084_v31  ;;  %v5126_v46 = vadd.f32 %v5125_v10, %v5124_v30  ;;  %v1429_v7 = vmul.f32 %v1301_v38, %v1301_v38 }
 0x32b   :  { %v5087_v36 = vpop.f32.mrf.mxu0  ;;  %v5127_v4 = vpop.f32.mrf.mxu1  ;;  %4591 = vmatmul.mubr.bf16.gmra.mxu0 %v1524_v59  ;;  %v1431_v30 = vmul.f32 %v1303_v14, %v1303_v14  ;;  %v1558_v0 = vpack.c.bf16 %v1398_v27, %v1366_v33 }
 0x32c   :  { %v3808_v15 = vadd.f32 %v5086_v63, %v7765_v43  ;;  %4598 = vmatprep.mubr.bf16.mxu0 %v1557_v25  ;;  %v1364_v43 = vmul.f32 %v1236_v9, %v1236_v9  ;;  %v1589_v23 = vpack.c.bf16 %v1461_v62, %v1429_v7 }
 0x32d   :  { %4656 = vmatmul.mubr.bf16.gmra.mxu1 %v1526_v60  ;;  %v5088_v29 = vpop.f32.mrf.mxu0  ;;  %v5128_v5 = vpop.f32.mrf.mxu1  ;;  %v1591_v10 = vpack.c.bf16 %v1463_v20, %v1431_v30  ;;  %v1462_v60 = vmul.f32 %v1334_v57, %v1334_v57 }
 0x32e   :  { %v7944_v12 = vadd.f32 %v5126_v46, %v3808_v15  ;;  %4663 = vmatprep.mubr.bf16.mxu1 %v1559_v34  ;;  %v5089_v45 = vadd.f32 %v5088_v29, %v5087_v36  ;;  %v5129_v55 = vadd.f32 %v5128_v5, %v5127_v4  ;;  %v1556_v31 = vpack.c.bf16 %v1396_v22, %v1364_v43 }
 0x32f   :  { %v5090_v47 = vpop.f32.mrf.mxu0  ;;  %v5130_v42 = vpop.f32.mrf.mxu1  ;;  %v1430_v15 = vmul.f32 %v1302_v28, %v1302_v28 }
 0x330   :  { %v3813_v3 = vadd.f32 %v5089_v45, %v7846_v19  ;;  %v1300_v19 = vmin.f32 %v1172_v41, 1.0 }
 0x331   :  { %v5091_v56 = vpop.f32.mrf.mxu0  ;;  %v5131_v32 = vpop.f32.mrf.mxu1  ;;  %v1590_v22 = vpack.c.bf16 %v1462_v60, %v1430_v15 }
 0x332   :  { %v7950_v17 = vadd.f32 %v5129_v55, %v3813_v3  ;;  %v5092_v21 = vadd.f32 %v5091_v56, %v5090_v47  ;;  %v5132_v50 = vadd.f32 %v5131_v32, %v5130_v42  ;;  %v1428_v4 = vmul.f32 %v1300_v19, %v1300_v19 }
 0x333   :  { %v5093_v48 = vpop.f32.mrf.mxu0  ;;  %v5133_v44 = vpop.f32.mrf.mxu1  ;;  %4599 = vmatmul.mubr.bf16.gmra.mxu0 %v1556_v31 }
 0x334   :  { %v3816_v51 = vadd.f32 %v5092_v21, %v7849_v6  ;;  %4606 = vmatprep.mubr.bf16.mxu0 %v1589_v23  ;;  %v1588_v13 = vpack.c.bf16 %v1460_v11, %v1428_v4 }
 0x335   :  { %4664 = vmatmul.mubr.bf16.gmra.mxu1 %v1558_v0  ;;  %v5094_v59 = vpop.f32.mrf.mxu0  ;;  %v5134_v25 = vpop.f32.mrf.mxu1 }
 0x336   :  { %v7953_v26 = vadd.f32 %v5132_v50, %v3816_v51  ;;  %4671 = vmatprep.mubr.bf16.mxu1 %v1591_v10  ;;  %v5095_v63 = vadd.f32 %v5094_v59, %v5093_v48  ;;  %v5135_v46 = vadd.f32 %v5134_v25, %v5133_v44 }
 0x337   :  { %v5096_v24 = vpop.f32.mrf.mxu0  ;;  %v5136_v36 = vpop.f32.mrf.mxu1 }
 0x338   :  { %v3821_v9 = vadd.f32 %v5095_v63, %v7853_v16 }
 0x339   :  { %v5097_v1 = vpop.f32.mrf.mxu0  ;;  %v5137_v6 = vpop.f32.mrf.mxu1 }
 0x33a   :  { %v7956_v34 = vadd.f32 %v5135_v46, %v3821_v9  ;;  %v5098_v38 = vadd.f32 %v5097_v1, %v5096_v24  ;;  %v5138_v49 = vadd.f32 %v5137_v6, %v5136_v36 }
 0x33b   :  { %v5099_v29 = vpop.f32.mrf.mxu0  ;;  %v5139_v5 = vpop.f32.mrf.mxu1  ;;  %4607 = vmatmul.mubr.bf16.gmra.mxu0 %v1588_v13 }
 0x33c   :  { %v3824_v14 = vadd.f32 %v5098_v38, %v7868_v53 }
 0x33d   :  { %4672 = vmatmul.mubr.bf16.gmra.mxu1 %v1590_v22  ;;  %v5100_v8 = vpop.f32.mrf.mxu0  ;;  %v5140_v45 = vpop.f32.mrf.mxu1 }
 0x33e   :  { %v3889_v55 = vadd.f32 %v5138_v49, %v3824_v14  ;;  %v5101_v62 = vadd.f32 %v5100_v8, %v5099_v29  ;;  %v5141_v16 = vadd.f32 %v5140_v45, %v5139_v5 }
 0x33f   :  { %v5102_v47 = vpop.f32.mrf.mxu0  ;;  %v5142_v42 = vpop.f32.mrf.mxu1 }
 0x340   :  { %v3829_v43 = vadd.f32 %v5101_v62, %v7889_v18 }
 0x341   :  { %v5103_v27 = vpop.f32.mrf.mxu0  ;;  %v5143_v41 = vpop.f32.mrf.mxu1 }
 0x342   :  { %v3894_v35 = vadd.f32 %v5141_v16, %v3829_v43  ;;  %v5104_v3 = vadd.f32 %v5103_v27, %v5102_v47  ;;  %v5144_v33 = vadd.f32 %v5143_v41, %v5142_v42 }
 0x343   :  { %v5161_v7 = vpop.f32.mrf.mxu0 }
 0x344   :  { %v3832_v20 = vadd.f32 %v5104_v3, %v7918_v2  ;;  %v5201_v56 = vpop.f32.mrf.mxu1 }
 0x345   :  { %v5162_v53 = vpop.f32.mrf.mxu0 }
 0x346   :  { %v3897_v32 = vadd.f32 %v5144_v33, %v3832_v20  ;;  %v5163_v31 = vadd.f32 %v5162_v53, %v5161_v7  ;;  %v5202_v30 = vpop.f32.mrf.mxu1 }
 0x347   :  { %v5203_v40 = vadd.f32 %v5202_v30, %v5201_v56  ;;  %v5164_v61 = vpop.f32.mrf.mxu0 }
 0x348   :  { %v3935_v21 = vadd.f32 %v5163_v31, %v7938_v52  ;;  %v5204_v50 = vpop.f32.mrf.mxu1 }
 0x349   :  { %v5165_v23 = vpop.f32.mrf.mxu0 }
 0x34a   :  { %v4000_v18 = vadd.f32 %v5203_v40, %v3935_v21  ;;  %v5166_v48 = vadd.f32 %v5165_v23, %v5164_v61  ;;  %v5205_v44 = vpop.f32.mrf.mxu1 }
 0x34b   :  { %v5206_v0 = vadd.f32 %v5205_v44, %v5204_v50  ;;  %v5167_v19 = vpop.f32.mrf.mxu0 }
 0x34c   :  { %v3938_v57 = vadd.f32 %v5166_v48, %v7944_v12  ;;  %v5207_v51 = vpop.f32.mrf.mxu1 }
 0x34d   :  { %v5168_v2 = vpop.f32.mrf.mxu0 }
 0x34e   :  { %v4003_v10 = vadd.f32 %v5206_v0, %v3938_v57  ;;  %v5169_v59 = vadd.f32 %v5168_v2, %v5167_v19  ;;  %v5208_v25 = vpop.f32.mrf.mxu1 }
 0x34f   :  { %v5209_v11 = vadd.f32 %v5208_v25, %v5207_v51  ;;  %v5170_v28 = vpop.f32.mrf.mxu0 }
 0x350   :  { %v3943_v63 = vadd.f32 %v5169_v59, %v7950_v17  ;;  %v5210_v46 = vpop.f32.mrf.mxu1 }
 0x351   :  { %v5171_v52 = vpop.f32.mrf.mxu0 }
 0x352   :  { %v4008_v24 = vadd.f32 %v5209_v11, %v3943_v63  ;;  %v5172_v36 = vadd.f32 %v5171_v52, %v5170_v28  ;;  %v5211_v4 = vpop.f32.mrf.mxu1 }
 0x353   :  { %v5212_v60 = vadd.f32 %v5211_v4, %v5210_v46  ;;  %v5173_v9 = vpop.f32.mrf.mxu0 }
 0x354   :  { %v3946_v1 = vadd.f32 %v5172_v36, %v7953_v26  ;;  %v5213_v6 = vpop.f32.mrf.mxu1 }
 0x355   :  { %v5174_v12 = vpop.f32.mrf.mxu0 }
 0x356   :  { %v4011_v13 = vadd.f32 %v5212_v60, %v3946_v1  ;;  %v5175_v15 = vadd.f32 %v5174_v12, %v5173_v9  ;;  %v5214_v38 = vpop.f32.mrf.mxu1 }
 0x357   :  { %v5215_v49 = vadd.f32 %v5214_v38, %v5213_v6  ;;  %v5176_v29 = vpop.f32.mrf.mxu0 }
 0x358   :  { %v3951_v5 = vadd.f32 %v5175_v15, %v7956_v34  ;;  %v5216_v22 = vpop.f32.mrf.mxu1 }
 0x359   :  { %v5177_v17 = vpop.f32.mrf.mxu0 }
 0x35a   :  { %v4016_v14 = vadd.f32 %v5215_v49, %v3951_v5  ;;  %v5178_v8 = vadd.f32 %v5177_v17, %v5176_v29  ;;  %v5217_v45 = vpop.f32.mrf.mxu1 }
 0x35b   :  { %v5218_v62 = vadd.f32 %v5217_v45, %v5216_v22  ;;  %v5179_v16 = vpop.f32.mrf.mxu0 }
 0x35c   :  { %v3954_v47 = vadd.f32 %v5178_v8, %v3889_v55  ;;  %v5219_v42 = vpop.f32.mrf.mxu1 }
 0x35d   :  { %v5180_v43 = vpop.f32.mrf.mxu0 }
 0x35e   :  { %v4019_v26 = vadd.f32 %v5218_v62, %v3954_v47  ;;  %v5181_v27 = vadd.f32 %v5180_v43, %v5179_v16  ;;  %v5220_v41 = vpop.f32.mrf.mxu1 }
 0x35f   :  { %v5221_v3 = vadd.f32 %v5220_v41, %v5219_v42  ;;  %v5182_v33 = vpop.f32.mrf.mxu0 }
 0x360   :  { %v3959_v7 = vadd.f32 %v5181_v27, %v3894_v35  ;;  %v5222_v20 = vpop.f32.mrf.mxu1 }
 0x361   :  { %v5183_v56 = vpop.f32.mrf.mxu0 }
 0x362   :  { %v4024_v53 = vadd.f32 %v5221_v3, %v3959_v7  ;;  %v5184_v34 = vadd.f32 %v5183_v56, %v5182_v33  ;;  %v5223_v31 = vpop.f32.mrf.mxu1 }
 0x363   :  { %v5224_v30 = vadd.f32 %v5223_v31, %v5222_v20  ;;  %v5241_v40 = vpop.f32.mrf.mxu0 }
 0x364   :  { %v3962_v61 = vadd.f32 %v5184_v34, %v3897_v32 }
 0x365   :  { %v5281_v21 = vpop.f32.mrf.mxu1  ;;  %v5242_v50 = vpop.f32.mrf.mxu0 }
 0x366   :  { %v4027_v23 = vadd.f32 %v5224_v30, %v3962_v61  ;;  %v5243_v55 = vadd.f32 %v5242_v50, %v5241_v40 }
 0x367   :  { %v5282_v48 = vpop.f32.mrf.mxu1  ;;  %v5244_v44 = vpop.f32.mrf.mxu0 }
 0x368   :  { %v4065_v0 = vadd.f32 %v5243_v55, %v4000_v18  ;;  %v5283_v19 = vadd.f32 %v5282_v48, %v5281_v21 }
 0x369   :  { %v5284_v57 = vpop.f32.mrf.mxu1  ;;  %v5245_v51 = vpop.f32.mrf.mxu0 }
 0x36a   :  { %v4130_v2 = vadd.f32 %v5283_v19, %v4065_v0  ;;  %v5246_v35 = vadd.f32 %v5245_v51, %v5244_v44 }
 0x36b   :  { %v5285_v59 = vpop.f32.mrf.mxu1  ;;  %v5247_v25 = vpop.f32.mrf.mxu0 }
 0x36c   :  { %v4068_v11 = vadd.f32 %v5246_v35, %v4003_v10  ;;  %v5286_v28 = vadd.f32 %v5285_v59, %v5284_v57 }
 0x36d   :  { %v5287_v63 = vpop.f32.mrf.mxu1  ;;  %v5248_v46 = vpop.f32.mrf.mxu0 }
 0x36e   :  { %v4133_v52 = vadd.f32 %v5286_v28, %v4068_v11  ;;  %v5249_v32 = vadd.f32 %v5248_v46, %v5247_v25 }
 0x36f   :  { %v5288_v36 = vpop.f32.mrf.mxu1  ;;  %v5250_v4 = vpop.f32.mrf.mxu0 }
 0x370   :  { %v4073_v60 = vadd.f32 %v5249_v32, %v4008_v24  ;;  %v5289_v9 = vadd.f32 %v5288_v36, %v5287_v63 }
 0x371   :  { %v5290_v1 = vpop.f32.mrf.mxu1  ;;  %v5251_v6 = vpop.f32.mrf.mxu0 }
 0x372   :  { %v4138_v18 = vadd.f32 %v5289_v9, %v4073_v60  ;;  %v5252_v12 = vadd.f32 %v5251_v6, %v5250_v4 }
 0x373   :  { %v5291_v15 = vpop.f32.mrf.mxu1  ;;  %v5253_v38 = vpop.f32.mrf.mxu0 }
 0x374   :  { %v4076_v49 = vadd.f32 %v5252_v12, %v4011_v13  ;;  %v5292_v29 = vadd.f32 %v5291_v15, %v5290_v1 }
 0x375   :  { %v5293_v5 = vpop.f32.mrf.mxu1  ;;  %v5254_v22 = vpop.f32.mrf.mxu0 }
 0x376   :  { %v4141_v10 = vadd.f32 %v5292_v29, %v4076_v49  ;;  %v5255_v17 = vadd.f32 %v5254_v22, %v5253_v38 }
 0x377   :  { %v5294_v8 = vpop.f32.mrf.mxu1  ;;  %v5256_v45 = vpop.f32.mrf.mxu0 }
 0x378   :  { %v4081_v62 = vadd.f32 %v5255_v17, %v4016_v14  ;;  %v5295_v16 = vadd.f32 %v5294_v8, %v5293_v5 }
 0x379   :  { %v5296_v47 = vpop.f32.mrf.mxu1  ;;  %v5257_v42 = vpop.f32.mrf.mxu0 }
 0x37a   :  { %v4146_v24 = vadd.f32 %v5295_v16, %v4081_v62  ;;  %v5258_v43 = vadd.f32 %v5257_v42, %v5256_v45 }
 0x37b   :  { %v5297_v27 = vpop.f32.mrf.mxu1  ;;  %v5259_v41 = vpop.f32.mrf.mxu0 }
 0x37c   :  { %v4084_v3 = vadd.f32 %v5258_v43, %v4019_v26  ;;  %v5298_v33 = vadd.f32 %v5297_v27, %v5296_v47 }
 0x37d   :  { %v5299_v7 = vpop.f32.mrf.mxu1  ;;  %v5260_v20 = vpop.f32.mrf.mxu0 }
 0x37e   :  { %v4149_v13 = vadd.f32 %v5298_v33, %v4084_v3  ;;  %v5261_v56 = vadd.f32 %v5260_v20, %v5259_v41 }
 0x37f   :  { %v5300_v34 = vpop.f32.mrf.mxu1  ;;  %v5262_v31 = vpop.f32.mrf.mxu0 }
 0x380   :  { %v4089_v30 = vadd.f32 %v5261_v56, %v4024_v53  ;;  %v5301_v40 = vadd.f32 %v5300_v34, %v5299_v7 }
 0x381   :  { %v5302_v61 = vpop.f32.mrf.mxu1  ;;  %v5263_v21 = vpop.f32.mrf.mxu0 }
 0x382   :  { %v4154_v14 = vadd.f32 %v5301_v40, %v4089_v30  ;;  %v5264_v50 = vadd.f32 %v5263_v21, %v5262_v31 }
 0x383   :  { %v5303_v55 = vpop.f32.mrf.mxu1  ;;  %v5321_v48 = vpop.f32.mrf.mxu0 }
 0x384   :  { %v4092_v44 = vadd.f32 %v5264_v50, %v4027_v23  ;;  %v5304_v0 = vadd.f32 %v5303_v55, %v5302_v61 }
 0x385   :  { %v5361_v19 = vpop.f32.mrf.mxu1  ;;  %v5322_v57 = vpop.f32.mrf.mxu0 }
 0x386   :  { %v4157_v26 = vadd.f32 %v5304_v0, %v4092_v44  ;;  %v5323_v51 = vadd.f32 %v5322_v57, %v5321_v48 }
 0x387   :  { %v5362_v35 = vpop.f32.mrf.mxu1  ;;  %v5324_v59 = vpop.f32.mrf.mxu0 }
 0x388   :  { %v4195_v25 = vadd.f32 %v5323_v51, %v4130_v2  ;;  %v5363_v11 = vadd.f32 %v5362_v35, %v5361_v19 }
 0x389   :  { %v5364_v28 = vpop.f32.mrf.mxu1  ;;  %v5325_v63 = vpop.f32.mrf.mxu0 }
 0x38a   :  { %v7966_v53 = vadd.f32 %v5363_v11, %v4195_v25  ;;  %v5326_v46 = vadd.f32 %v5325_v63, %v5324_v59 }
 0x38b   :  { %v5365_v32 = vpop.f32.mrf.mxu1  ;;  %v5327_v36 = vpop.f32.mrf.mxu0 }
 0x38c   :  { %v4198_v4 = vadd.f32 %v5326_v46, %v4133_v52  ;;  %v5366_v60 = vadd.f32 %v5365_v32, %v5364_v28 }
 0x38d   :  { %v5367_v9 = vpop.f32.mrf.mxu1  ;;  %v5328_v23 = vpop.f32.mrf.mxu0 }
 0x38e   :  { %v7968_v1 = vadd.f32 %v5366_v60, %v4198_v4  ;;  %v5329_v6 = vadd.f32 %v5328_v23, %v5327_v36 }
 0x38f   :  { %v5368_v12 = vpop.f32.mrf.mxu1  ;;  %v5330_v15 = vpop.f32.mrf.mxu0 }
 0x390   :  { %v4203_v38 = vadd.f32 %v5329_v6, %v4138_v18  ;;  %v5369_v49 = vadd.f32 %v5368_v12, %v5367_v9 }
 0x391   :  { %v5370_v2 = vpop.f32.mrf.mxu1  ;;  %v5331_v29 = vpop.f32.mrf.mxu0 }
 0x392   :  { %v7970_v5 = vadd.f32 %v5369_v49, %v4203_v38  ;;  %v5332_v22 = vadd.f32 %v5331_v29, %v5330_v15 }
 0x393   :  { %v5371_v17 = vpop.f32.mrf.mxu1  ;;  %v5333_v8 = vpop.f32.mrf.mxu0 }
 0x394   :  { %v4206_v45 = vadd.f32 %v5332_v22, %v4141_v10  ;;  %v5372_v62 = vadd.f32 %v5371_v17, %v5370_v2 }
 0x395   :  { %v5373_v52 = vpop.f32.mrf.mxu1  ;;  %v5334_v16 = vpop.f32.mrf.mxu0 }
 0x396   :  { %v7972_v47 = vadd.f32 %v5372_v62, %v4206_v45  ;;  %v5335_v42 = vadd.f32 %v5334_v16, %v5333_v8 }
 0x397   :  { %v5374_v43 = vpop.f32.mrf.mxu1  ;;  %v5336_v27 = vpop.f32.mrf.mxu0 }
 0x398   :  { %v4211_v41 = vadd.f32 %v5335_v42, %v4146_v24  ;;  %v5375_v3 = vadd.f32 %v5374_v43, %v5373_v52 }
 0x399   :  { %v5376_v18 = vpop.f32.mrf.mxu1  ;;  %v5337_v33 = vpop.f32.mrf.mxu0 }
 0x39a   :  { %v7974_v7 = vadd.f32 %v5375_v3, %v4211_v41  ;;  %v5338_v20 = vadd.f32 %v5337_v33, %v5336_v27 }
 0x39b   :  { %v5377_v56 = vpop.f32.mrf.mxu1  ;;  %v5339_v34 = vpop.f32.mrf.mxu0 }
 0x39c   :  { %v4214_v31 = vadd.f32 %v5338_v20, %v4149_v13  ;;  %v5378_v30 = vadd.f32 %v5377_v56, %v5376_v18 }
 0x39d   :  { %v5379_v10 = vpop.f32.mrf.mxu1  ;;  %v5340_v40 = vpop.f32.mrf.mxu0 }
 0x39e   :  { %v7976_v61 = vadd.f32 %v5378_v30, %v4214_v31  ;;  %v5341_v21 = vadd.f32 %v5340_v40, %v5339_v34 }
 0x39f   :  { %v5380_v50 = vpop.f32.mrf.mxu1  ;;  %v5342_v55 = vpop.f32.mrf.mxu0 }
 0x3a0   :  { %v4219_v48 = vadd.f32 %v5341_v21, %v4154_v14  ;;  %v5381_v44 = vadd.f32 %v5380_v50, %v5379_v10 }
 0x3a1   :  { %v5382_v24 = vpop.f32.mrf.mxu1  ;;  %v5343_v0 = vpop.f32.mrf.mxu0 }
 0x3a2   :  { %v7978_v19 = vadd.f32 %v5381_v44, %v4219_v48  ;;  %v5344_v57 = vadd.f32 %v5343_v0, %v5342_v55 }
 0x3a3   :  { %v5383_v51 = vpop.f32.mrf.mxu1  ;;  %v5401_v35 = vpop.f32.mrf.mxu0 }
 0x3a4   :  { %8742 = vst [vmem:[#allocation91_spill] sm:$0xff] %v7978_v19  ;;  %v4222_v59 = vadd.f32 %v5344_v57, %v4157_v26  ;;  %v5384_v25 = vadd.f32 %v5383_v51, %v5382_v24 }
 0x3a5   :  { %v5441_v13 = vpop.f32.mrf.mxu1  ;;  %v5402_v11 = vpop.f32.mrf.mxu0 }
 0x3a6   :  { %v7980_v28 = vadd.f32 %v5384_v25, %v4222_v59 }
 0x3a7   :  { %v5442_v63 = vpop.f32.mrf.mxu1  ;;  %v5404_v46 = vpop.f32.mrf.mxu0 }
 0x3a8   :  { %8743 = vst [vmem:[#allocation92_spill] sm:$0xff] %v7980_v28  ;;  %v5443_v19 = vadd.f32 %v5442_v63, %v5441_v13 }
 0x3a9   :  { %v7982_v32 = vpop.f32.mrf.mxu1  ;;  %v5405_v36 = vpop.f32.mrf.mxu0 }
 0x3ab   :  { %v7984_v14 = vpop.f32.mrf.mxu1  ;;  %v5407_v4 = vpop.f32.mrf.mxu0 }
 0x3ad   :  { %v7986_v60 = vpop.f32.mrf.mxu1  ;;  %v5408_v9 = vpop.f32.mrf.mxu0 }
 0x3af   :  { %v7988_v23 = vpop.f32.mrf.mxu1  ;;  %v7990_v6 = vpop.f32.mrf.mxu0 }
 0x3b1   :  { %v7992_v26 = vpop.f32.mrf.mxu1  ;;  %v7994_v12 = vpop.f32.mrf.mxu0 }
 0x3b3   :  { %v7996_v15 = vpop.f32.mrf.mxu1  ;;  %v7998_v38 = vpop.f32.mrf.mxu0 }
 0x3b5   :  { %v8000_v49 = vpop.f32.mrf.mxu1  ;;  %v8002_v2 = vpop.f32.mrf.mxu0 }
 0x3b7   :  { %v8004_v29 = vpop.f32.mrf.mxu1  ;;  %v8006_v22 = vpop.f32.mrf.mxu0 }
 0x3b9   :  { %v8008_v17 = vpop.f32.mrf.mxu1  ;;  %v8010_v8 = vpop.f32.mrf.mxu0 }
 0x3bb   :  { %v8012_v45 = vpop.f32.mrf.mxu1  ;;  %v8014_v62 = vpop.f32.mrf.mxu0 }
 0x3bc   :  { %8744 = vst [vmem:[#allocation93_spill] sm:$0xff] %v8012_v45  ;;  %v5409_v45 = vadd.f32 %v5408_v9, %v5407_v4 }
 0x3bd   :  { %v8016_v52 = vpop.f32.mrf.mxu1  ;;  %v8018_v16 = vpop.f32.mrf.mxu0 }
 0x3be   :  { %8745 = vst [vmem:[#allocation94_spill] sm:$0xff] %v8016_v52  ;;  %v4333_v13 = vadd.f32 %v5409_v45, %v7970_v5  ;;  %v5415_v45 = vadd.f32 %v8002_v2, %v7998_v38 }
 0x3bf   :  { %v8020_v42 = vpop.f32.mrf.mxu1  ;;  %v8022_v43 = vpop.f32.mrf.mxu0 }
 0x3c0   :  { %8746 = vst [vmem:[#allocation95_spill] sm:$0xff] %v8020_v42  ;;  %8747 = vst [vmem:[#allocation96_spill] sm:$0xff] %v8022_v43  ;;  %v4341_v38 = vadd.f32 %v5415_v45, %v7974_v7 }
 0x3c1   :  { %v8024_v27 = vpop.f32.mrf.mxu1  ;;  %v8026_v41 = vpop.f32.mrf.mxu0 }
 0x3c2   :  { %8748 = vst [vmem:[#allocation97_spill] sm:$0xff] %v8024_v27  ;;  %8749 = vst [vmem:[#allocation58_spill] sm:$0xff] %v8026_v41  ;;  %v5403_v27 = vadd.f32 %v5402_v11, %v5401_v35  ;;  %v5406_v41 = vadd.f32 %v5405_v36, %v5404_v46  ;;  %v5446_v46 = vadd.f32 %v7984_v14, %v7982_v32 }
 0x3c3   :  { %v8028_v3 = vpop.f32.mrf.mxu1  ;;  %v5481_v18 = vpop.f32.mrf.mxu0 }
 0x3c4   :  { %8750 = vst [vmem:[#allocation57_spill] sm:$0xff] %v8028_v3  ;;  %v4325_v58 = vadd.f32 %v5403_v27, %v7966_v53  ;;  %v4680_v53 = vlaneseq }
 0x3c5   :  { %v5521_v33 = vpop.f32.mrf.mxu1  ;;  %v5482_v20 = vpop.f32.mrf.mxu0 }
 0x3c6   :  { %v4390_v11 = vadd.f32 %v5443_v19, %v4325_v58  ;;  %v5412_v58 = vadd.f32 %v7994_v12, %v7990_v6  ;;  %v5449_v19 = vadd.f32 %v7988_v23, %v7986_v60  ;;  %v5452_v60 = vadd.f32 %v7996_v15, %v7992_v26 }
 0x3c7   :  { %v5522_v56 = vpop.f32.mrf.mxu1  ;;  %v5484_v34 = vpop.f32.mrf.mxu0  ;;  %v8761_v45 = vld [vmem:[#allocation96_spill] sm:$0xff] }
 0x3c8   :  { %v4398_v5 = vadd.f32 %v5449_v19, %v4333_v13  ;;  %v4336_v6 = vadd.f32 %v5412_v58, %v7972_v47  ;;  %v5418_v47 = vadd.f32 %v8010_v8, %v8006_v22 }
 0x3c9   :  { %v5524_v31 = vpop.f32.mrf.mxu1  ;;  %v5485_v30 = vpop.f32.mrf.mxu0 }
 0x3ca   :  { %v5486_v27 = vadd.f32 %v5485_v30, %v5484_v34  ;;  %v4401_v26 = vadd.f32 %v5452_v60, %v4336_v6 }
 0x3cb   :  { %v5525_v10 = vpop.f32.mrf.mxu1  ;;  %v5487_v40 = vpop.f32.mrf.mxu0 }
 0x3cc   :  { %v5526_v12 = vadd.f32 %v5525_v10, %v5524_v31 }
 0x3cd   :  { %v8030_v21 = vpop.f32.mrf.mxu1  ;;  %v5488_v50 = vpop.f32.mrf.mxu0 }
 0x3cf   :  { %v8032_v55 = vpop.f32.mrf.mxu1  ;;  %v5490_v48 = vpop.f32.mrf.mxu0 }
 0x3d0   :  { %v5529_v2 = vadd.f32 %v8032_v55, %v8030_v21 }
 0x3d1   :  { %v8034_v44 = vpop.f32.mrf.mxu1  ;;  %v5491_v24 = vpop.f32.mrf.mxu0 }
 0x3d3   :  { %v8036_v0 = vpop.f32.mrf.mxu1  ;;  %v8038_v57 = vpop.f32.mrf.mxu0 }
 0x3d5   :  { %v8040_v51 = vpop.f32.mrf.mxu1  ;;  %v8042_v59 = vpop.f32.mrf.mxu0 }
 0x3d6   :  { %8751 = vst [vmem:[#allocation42_spill] sm:$0xff] %v8040_v51  ;;  %v5495_v8 = vadd.f32 %v8042_v59, %v8038_v57  ;;  %v8758_v57 = vld [vmem:[#allocation93_spill] sm:$0xff] }
 0x3d7   :  { %v8044_v25 = vpop.f32.mrf.mxu1  ;;  %v8046_v3 = vpop.f32.mrf.mxu0  ;;  %v5458_v59 = vadd.f32 %v8758_v57, %v8008_v17 }
 0x3d8   :  { %8752 = vst [vmem:[#allocation60_spill] sm:$0xff] %v8044_v25  ;;  %8753 = vst [vmem:[#allocation62_spill] sm:$0xff] %v8046_v3  ;;  %v5483_v25 = vadd.f32 %v5482_v20, %v5481_v18 }
 0x3d9   :  { %v8048_v54 = vpop.f32.mrf.mxu1  ;;  %v8050_v28 = vpop.f32.mrf.mxu0 }
 0x3da   :  { %8754 = vst [vmem:[#allocation59_spill] sm:$0xff] %v8048_v54  ;;  %v4328_v54 = vadd.f32 %v5406_v41, %v7968_v1  ;;  %v4455_v36 = vadd.f32 %v5483_v25, %v4390_v11  ;;  %v5523_v1 = vadd.f32 %v5522_v56, %v5521_v33  ;;  %v5489_v41 = vadd.f32 %v5488_v50, %v5487_v40 }
 0x3db   :  { %v8052_v42 = vpop.f32.mrf.mxu1  ;;  %v8054_v52 = vpop.f32.mrf.mxu0  ;;  %v5492_v11 = vadd.f32 %v5491_v24, %v5490_v48  ;;  %v5455_v48 = vadd.f32 %v8004_v29, %v8000_v49  ;;  %v5532_v49 = vadd.f32 %v8036_v0, %v8034_v44  ;;  %v8760_v0 = vld [vmem:[#allocation91_spill] sm:$0xff] }
 0x3dc   :  { %8755 = vst [vmem:[#allocation61_spill] sm:$0xff] %v8052_v42  ;;  %8756 = vst [vmem:[#allocation64_spill] sm:$0xff] %v8054_v52  ;;  %v4393_v9 = vadd.f32 %v5446_v46, %v4328_v54  ;;  %v4520_v32 = vadd.f32 %v5523_v1, %v4455_v36  ;;  %v4463_v23 = vadd.f32 %v5489_v41, %v4398_v5 }
 0x3dd   :  { %v8057_v43 = vpop.f32.mrf.mxu1  ;;  %v8059_v51 = vpop.f32.mrf.mxu0  ;;  %v4466_v22 = vadd.f32 %v5492_v11, %v4401_v26 }
 0x3de   :  { %v4458_v14 = vadd.f32 %v5486_v27, %v4393_v9  ;;  %v4528_v24 = vadd.f32 %v5529_v2, %v4463_v23  ;;  %v4344_v9 = vadd.f32 %v5418_v47, %v7976_v61 }
 0x3df   :  { %v8061_v3 = vpop.f32.mrf.mxu1  ;;  %v8063_v35 = vpop.f32.mrf.mxu0  ;;  %v8764_v17 = vld [vmem:[#allocation60_spill] sm:$0xff] }
 0x3e0   :  { %v4523_v25 = vadd.f32 %v5526_v12, %v4458_v14  ;;  %v4409_v44 = vadd.f32 %v5458_v59, %v4344_v9  ;;  %v8763_v12 = vld [vmem:[#allocation42_spill] sm:$0xff]  ;;  %v8774_v9 = vld [vmem:[#allocation57_spill] sm:$0xff] }
 0x3e1   :  { %v8066_v42 = vpop.f32.mrf.mxu1  ;;  %v8068_v52 = vpop.f32.mrf.mxu0 }
 0x3e2   :  { %8757 = vst [vmem:[#allocation105_spill] sm:$0xff] %v8066_v42  ;;  %v8079_v42 = vand.u32 127, %v4680_v53 }
 0x3e3   :  { %v8073_v63 = vpop.f32.mrf.mxu1  ;;  %v5561_v4 = vpop.f32.mrf.mxu0  ;;  %v8768_v47 = vld [vmem:[#allocation64_spill] sm:$0xff] }
 0x3e4   :  { %vm4682_vm0 = vcmp.eq.s32.totalorder %v8079_v42, 4  ;;  %v5501_v2 = vadd.f32 %v8059_v51, %v8768_v47 }
 0x3e5   :  { %v5601_v18 = vpop.f32.mrf.mxu1  ;;  %v5562_v20 = vpop.f32.mrf.mxu0 }
 0x3e6   :  { %v5563_v34 = vadd.f32 %v5562_v20, %v5561_v4  ;;  %v4406_v4 = vadd.f32 %v5455_v48, %v4341_v38 }
 0x3e7   :  { %v5602_v54 = vpop.f32.mrf.mxu1  ;;  %v5564_v30 = vpop.f32.mrf.mxu0 }
 0x3e8   :  { %v4585_v33 = vadd.f32 %v5563_v34, %v4520_v32  ;;  %v5603_v56 = vadd.f32 %v5602_v54, %v5601_v18  ;;  %v8759_v18 = vld [vmem:[#allocation62_spill] sm:$0xff]  ;;  %v4471_v32 = vadd.f32 %v5495_v8, %v4406_v4  ;;  %v8773_v4 = vld [vmem:[#allocation97_spill] sm:$0xff] }
 0x3e9   :  { %v5604_v40 = vpop.f32.mrf.mxu1  ;;  %v5565_v50 = vpop.f32.mrf.mxu0  ;;  %v5498_v61 = vadd.f32 %v8050_v28, %v8759_v18  ;;  %v5464_v51 = vadd.f32 %v8774_v9, %v8773_v4 }
 0x3ea   :  { %v4650_v53 = vadd.f32 %v5603_v56, %v4585_v33  ;;  %v5566_v46 = vadd.f32 %v5565_v50, %v5564_v30  ;;  %v5535_v33 = vadd.f32 %v8764_v17, %v8763_v12  ;;  %v8765_v56 = vld [vmem:[#allocation89_spill] sm:$0xff]  ;;  %v8767_v50 = vld [vmem:[#allocation95_spill] sm:$0xff] }
 0x3eb   :  { %v5605_v31 = vpop.f32.mrf.mxu1  ;;  %v5567_v10 = vpop.f32.mrf.mxu0  ;;  %v4474_v11 = vadd.f32 %v5498_v61, %v4409_v44 }
 0x3ec   :  { %v4683_v15 = vsel %vm4682_vm0, %v7311_v39, %v4650_v53  ;;  %v4588_v36 = vadd.f32 %v5566_v46, %v4523_v25  ;;  %v5606_v27 = vadd.f32 %v5605_v31, %v5604_v40  ;;  %v5421_v39 = vadd.f32 %v8018_v16, %v8014_v62  ;;  %v8766_v40 = vld [vmem:[#allocation94_spill] sm:$0xff] }
 0x3ed   :  { %4687 = vst [vmem:[#allocation7] sm:$0xff] %v4683_v15  ;;  %v5607_v7 = vpop.f32.mrf.mxu1  ;;  %v5568_v13 = vpop.f32.mrf.mxu0  ;;  %v4531_v16 = vadd.f32 %v5532_v49, %v4466_v22  ;;  %v5461_v25 = vadd.f32 %v8767_v50, %v8766_v40  ;;  %v4536_v38 = vadd.f32 %v5535_v33, %v4471_v32  ;;  %v8769_v15 = vld [vmem:[#allocation59_spill] sm:$0xff]  ;;  %v8772_v22 = vld [vmem:[#allocation90_spill] sm:$0xff] }
 0x3ee   :  { %v4653_v21 = vadd.f32 %v5606_v27, %v4588_v36  ;;  %v5569_v55 = vadd.f32 %v5568_v13, %v5567_v10  ;;  %v4349_v5 = vadd.f32 %v5421_v39, %v8760_v0  ;;  %v8770_v36 = vld [vmem:[#allocation61_spill] sm:$0xff] }
 0x3ef   :  { %v5608_v58 = vpop.f32.mrf.mxu1  ;;  %v5570_v1 = vpop.f32.mrf.mxu0  ;;  %v5538_v27 = vadd.f32 %v8770_v36, %v8769_v15 }
 0x3f0   :  { %v4684_v29 = vsel %vm4682_vm0, %v7313_v37, %v4653_v21  ;;  %v4593_v19 = vadd.f32 %v5569_v55, %v4528_v24  ;;  %v5609_v41 = vadd.f32 %v5608_v58, %v5607_v7  ;;  %v8762_v37 = vld [vmem:[#allocation58_spill] sm:$0xff]  ;;  %v4414_v26 = vadd.f32 %v5461_v25, %v4349_v5  ;;  %v8771_v7 = vld [vmem:[#allocation92_spill] sm:$0xff] }
 0x3f1   :  { %4688 = vst [vmem:[#allocation7 + $0x8] sm:$0xff] %v4684_v29  ;;  %v5610_v20 = vpop.f32.mrf.mxu1  ;;  %v5571_v62 = vpop.f32.mrf.mxu0  ;;  %v5424_v54 = vadd.f32 %v8762_v37, %v8761_v45  ;;  %v4539_v39 = vadd.f32 %v5538_v27, %v4474_v11  ;;  %v5504_v29 = vadd.f32 %v8068_v52, %v8063_v35 }
 0x3f2   :  { %v4658_v14 = vadd.f32 %v5609_v41, %v4593_v19  ;;  %v5572_v34 = vadd.f32 %v5571_v62, %v5570_v1  ;;  %v4479_v49 = vadd.f32 %v5501_v2, %v4414_v26 }
 0x3f3   :  { %v5611_v30 = vpop.f32.mrf.mxu1  ;;  %v5573_v6 = vpop.f32.mrf.mxu0  ;;  %v4352_v13 = vadd.f32 %v5424_v54, %v8771_v7 }
 0x3f4   :  { %v4685_v28 = vsel %vm4682_vm0, %v8765_v56, %v4658_v14  ;;  %v4596_v60 = vadd.f32 %v5572_v34, %v4531_v16  ;;  %v5612_v23 = vadd.f32 %v5611_v30, %v5610_v20 }
 0x3f5   :  { %4689 = vst [vmem:[#allocation7 + $0x10] sm:$0xff] %v4685_v28  ;;  %v5613_v53 = vpop.f32.mrf.mxu1  ;;  %v5574_v46 = vpop.f32.mrf.mxu0 }
 0x3f6   :  { %v4661_v31 = vadd.f32 %v5612_v23, %v4596_v60  ;;  %v5575_v10 = vadd.f32 %v5574_v46, %v5573_v6 }
 0x3f7   :  { %v5614_v48 = vpop.f32.mrf.mxu1  ;;  %v5576_v24 = vpop.f32.mrf.mxu0 }
 0x3f8   :  { %v4686_v8 = vsel %vm4682_vm0, %v8772_v22, %v4661_v31  ;;  %v4601_v21 = vadd.f32 %v5575_v10, %v4536_v38  ;;  %v5615_v55 = vadd.f32 %v5614_v48, %v5613_v53 }
 0x3f9   :  { %4690 = vst [vmem:[#allocation7 + $0x18] sm:$0xff] %v4686_v8  ;;  %v5616_v58 = vpop.f32.mrf.mxu1  ;;  %v5577_v1 = vpop.f32.mrf.mxu0 }
 0x3fa   :  { %v4666_v19 = vadd.f32 %v5615_v55, %v4601_v21  ;;  %v5578_v41 = vadd.f32 %v5577_v1, %v5576_v24 }
 0x3fb   :  { %6206 = shalt.err (!%p6203_p0)
}
 0x3fc   :  { %s6250_s27 = smov 128   ;;  %s6251_s28 = smov 8   ;;  %v5617_v42 = vpop.f32.mrf.mxu1  ;;  %v5579_v52 = vpop.f32.mrf.mxu0  ;;  %v4417_v35 = vadd.f32 %v5464_v51, %v4352_v13  ;;  %v5541_v57 = vadd.f32 %v8061_v3, %v8057_v43  ;;  %4691 = vst [vmem:[#allocation8] sm:$0xff] %v4666_v19  ;;  %v4604_v59 = vadd.f32 %v5578_v41, %v4539_v39  ;;  %v8775_v0 = vld [vmem:[#allocation105_spill] sm:$0xff] }
 0x3fd   :  { %4706 = dma.vmem_to_hbm [thread:$0]  %s4701_s1, 512, %s8151_s2, [#allocation4], %s6250_s27, %s6250_s27, %s6251_s28   ;;  %v5618_v18 = vadd.f32 %v5617_v42, %v5616_v58  ;;  %v5544_v5 = vadd.f32 %v8073_v63, %v8775_v0 }
 0x3fe   :  { %v5619_v61 = vpop.f32.mrf.mxu1  ;;  %v5580_v20 = vpop.f32.mrf.mxu0  ;;  %v4544_v62 = vadd.f32 %v5541_v57, %v4479_v49  ;;  %v4482_v16 = vadd.f32 %v5504_v29, %v4417_v35  ;;  %s6252_s2 = smov [#allocation8]  }
 0x3ff   :  { %v4669_v32 = vadd.f32 %v5618_v18, %v4604_v59  ;;  %v5581_v14 = vadd.f32 %v5580_v20, %v5579_v52  ;;  %s4712_s4 = sshll.u32 %s6252_s2, 4  ;;  %s4713_s4 = int_to_ptr.vmem [resolvable:$true] %s4712_s4 }
 0x400   :  { %v5620_v34 = vpop.f32.mrf.mxu1  ;;  %v5582_v44 = vpop.f32.mrf.mxu0  ;;  %v4547_v43 = vadd.f32 %v5544_v5, %v4482_v16  ;;  %s6215_s5 = scalar_lea.vmem %s4713_s4, 512  ;;  %p6220_p2 = scmp.lt.s32.totalorder %s4713_s4, %s4713_s4 }
 0x401   :  { %4692 = vst [vmem:[#allocation8 + $0x8] sm:$0xff] %v4669_v32  ;;  %v4609_v45 = vadd.f32 %v5581_v14, %v4544_v62  ;;  %v5621_v37 = vadd.f32 %v5620_v34, %v5619_v61  ;;  %p6216_p1 = scmp.ne.s32.totalorder %s4713_s4, %s6215_s5  ;;  %p6221_p3 = scmp.lt.s32.totalorder %s6215_s5, %s6215_s5 }
 0x402   :  { %v5622_v54 = vpop.f32.mrf.mxu1  ;;  %v5583_v30 = vpop.f32.mrf.mxu0 }
 0x403   :  { %v4674_v3 = vadd.f32 %v5621_v37, %v4609_v45  ;;  %v5584_v6 = vadd.f32 %v5583_v30, %v5582_v44  ;;  %p6222_p4 = por %p6221_p3, %p6220_p2 }
 0x404   :  { %v5623_v12 = vpop.f32.mrf.mxu1 }
 0x405   :  { %4693 = vst [vmem:[#allocation8 + $0x10] sm:$0xff] %v4674_v3  ;;  %v4612_v17 = vadd.f32 %v5584_v6, %v4547_v43  ;;  %v5624_v33 = vadd.f32 %v5623_v12, %v5622_v54  ;;  %p6223_p5 = pnand %p6222_p4, %p6216_p1 }
 0x407   :  { %v4677_v56 = vadd.f32 %v5624_v33, %v4612_v17 }
 0x409   :  { %4694 = vst [vmem:[#allocation8 + $0x18] sm:$0xff] %v4677_v56 }
 0x40a   :  { %6226 = shalt.err (!%p6223_p5)
}
 0x40b   :  { %4718 = dma.vmem_to_hbm [thread:$0]  %s4713_s4, 512, %s8152_s3, [#allocation9], %s6250_s27, %s6250_s27, %s6251_s28  }
 0x40c   :  { %6239 = dma.done.wait [#allocation4], 512  }
 0x40d   :  { %6240 = vsyncadd [#allocation4], 4294966784 }
 0x40e   :  { %6241 = dma.done.wait [#allocation9], 512  }
 0x40f   :  { %6242 = vsyncadd [#allocation9], 4294966784 }
 0x410   :  { %4725 = vsyncpa [#allocation3], 1 }
 0x411   :  { %4726 = vsyncpa [#allocation6], 1 }
 0x412   :  { %4727 = vsyncpa [#allocation4], 1 }
 0x413   :  { %4728 = vsyncpa [#allocation9], 1 }

</bundles_post_ra>
